<compile_context>
chip_gen: v5e
topology: v5e:2x2
jax: 0.10.0
libtpu: 0.0.40
codegen_flags: <defaults>
</compile_context>

<pallas_src>
import functools
import math

import jax
import jax.numpy as jnp
from jax.experimental import pallas as pl
from jax.experimental.pallas import tpu as pltpu

NEG_INF = -1e30  # finite "minus infinity": avoids NaN from (-inf) - (-inf)


# ----------------------------------------------------------------------------
# helpers
# ----------------------------------------------------------------------------

def _round_up(x, m):
    return ((x + m - 1) // m) * m


def _pick_row_tile(M, max_tile):
    """Row (sublane) tile: multiple of 8, aiming for >=2 blocks (megacore)."""
    if M <= 8:
        return M                       # full-dim block
    half = _round_up((M + 1) // 2, 8)
    return min(max_tile, half)


# ----------------------------------------------------------------------------
# Pallas kernels
# ----------------------------------------------------------------------------

def _linear_kernel(x_ref, w_ref, b_ref, o_ref, acc_ref, *, relu):
    # x: [tm, tk] bf16, w: [tk, tn] bf16, b: [1, tn] f32 -> o: [tm, tn]
    # K is the last grid axis (accumulator resident across it).
    @pl.when(pl.program_id(2) == 0)
    def _():
        acc_ref[...] = jnp.zeros_like(acc_ref)

    acc_ref[...] += jnp.dot(x_ref[...], w_ref[...],
                            preferred_element_type=jnp.float32)

    @pl.when(pl.program_id(2) == pl.num_programs(2) - 1)
    def _():
        y = acc_ref[...] + b_ref[...]
        if relu:
            y = jnp.maximum(y, 0.0)
        o_ref[...] = y.astype(o_ref.dtype)


def _ffn_kernel(x_ref, w1_ref, b1_ref, w2_ref, b2_ref, o_ref):
    # Fused feed-forward: relu(x @ W1 + b1) @ W2 + b2.  The [tm, dff]
    # intermediate lives in VMEM only (never written to HBM).
    # TODO(synk): for very large dim_feedforward, tile the dff contraction of
    # the second matmul with a scratch accumulator instead of full-dff blocks.
    h = jnp.dot(x_ref[...], w1_ref[...], preferred_element_type=jnp.float32)
    h = jnp.maximum(h + b1_ref[...], 0.0).astype(jnp.bfloat16)
    y = jnp.dot(h, w2_ref[...], preferred_element_type=jnp.float32) + b2_ref[...]
    o_ref[...] = y.astype(o_ref.dtype)


def _layernorm_kernel(x_ref, g_ref, b_ref, o_ref):
    x = x_ref[...].astype(jnp.float32)
    mean = jnp.mean(x, axis=-1, keepdims=True)
    var = jnp.mean(jnp.square(x - mean), axis=-1, keepdims=True)
    y = (x - mean) * jax.lax.rsqrt(var + 1e-5) * g_ref[...] + b_ref[...]
    o_ref[...] = y.astype(o_ref.dtype)


def _add_layernorm_kernel(x_ref, r_ref, g_ref, b_ref, o_ref):
    # fused residual + layernorm: norm(x + r), math in f32
    x = x_ref[...].astype(jnp.float32) + r_ref[...].astype(jnp.float32)
    mean = jnp.mean(x, axis=-1, keepdims=True)
    var = jnp.mean(jnp.square(x - mean), axis=-1, keepdims=True)
    y = (x - mean) * jax.lax.rsqrt(var + 1e-5) * g_ref[...] + b_ref[...]
    o_ref[...] = y.astype(o_ref.dtype)


def _attn_kernel(q_ref, k_ref, v_ref, bias_ref, o_ref,
                 m_sc, l_sc, acc_sc, *, nhead, causal):
    # q_ref: [1, tq, D] bf16 (Q projection already carries the 1/sqrt(Dh) scale)
    # k_ref/v_ref: [1, tk, D] bf16; bias_ref: [1, 1, tk] f32 additive key bias
    # o_ref: [1, tq, D] bf16 (lane-dense, heads already merged)
    # scratch: m_sc/l_sc [tq, nhead] f32, acc_sc [tq, D] f32 (flash accumulators)
    kv_idx = pl.program_id(2)
    tq = q_ref.shape[1]
    tk = k_ref.shape[1]
    D = q_ref.shape[2]
    Dh = D // nhead

    @pl.when(kv_idx == 0)
    def _():
        m_sc[...] = jnp.full_like(m_sc, NEG_INF)
        l_sc[...] = jnp.zeros_like(l_sc)
        acc_sc[...] = jnp.zeros_like(acc_sc)

    bias = bias_ref[0]                                       # [1, tk] f32
    if causal:
        q_pos = pl.program_id(1) * tq + jax.lax.broadcasted_iota(
            jnp.int32, (tq, tk), 0)
        k_pos = kv_idx * tk + jax.lax.broadcasted_iota(jnp.int32, (tq, tk), 1)
        bias = bias + jnp.where(k_pos <= q_pos, 0.0, NEG_INF)  # [tq, tk]

    q = q_ref[0]                                             # [tq, D] bf16
    k = k_ref[0]
    v = v_ref[0]

    for h in range(nhead):                 # static unroll; static lane slices
        hs = slice(h * Dh, (h + 1) * Dh)
        s = jax.lax.dot_general(q[:, hs], k[:, hs], (((1,), (1,)), ((), ())),
                                preferred_element_type=jnp.float32)  # [tq, tk]
        s = s + bias
        m_prev = m_sc[:, h:h + 1]
        m_new = jnp.maximum(m_prev, jnp.max(s, axis=-1, keepdims=True))
        alpha = jnp.exp(m_prev - m_new)
        p = jnp.exp(s - m_new)
        l_sc[:, h:h + 1] = alpha * l_sc[:, h:h + 1] + jnp.sum(
            p, axis=-1, keepdims=True)
        acc_sc[:, hs] = alpha * acc_sc[:, hs] + jnp.dot(
            p.astype(v.dtype), v[:, hs], preferred_element_type=jnp.float32)
        m_sc[:, h:h + 1] = m_new

    @pl.when(kv_idx == pl.num_programs(2) - 1)
    def _():
        for h in range(nhead):
            hs = slice(h * Dh, (h + 1) * Dh)
            acc_sc[:, hs] = acc_sc[:, hs] * pl.reciprocal(
                l_sc[:, h:h + 1], approx=True)
        o_ref[0] = acc_sc[...].astype(o_ref.dtype)           # one dense store


# ----------------------------------------------------------------------------
# Kernel wrappers
# ----------------------------------------------------------------------------

def linear(x, w_t, b, relu=False, out_dtype=jnp.bfloat16,
           tm_max=256, tn_max=512, tk_max=512):
    """y = x @ w_t + b.  w_t is pre-transposed [K, N] and bf16 at init."""
    orig_shape = x.shape
    K = orig_shape[-1]
    M = math.prod(orig_shape[:-1])
    N = w_t.shape[1]
    assert w_t.shape[0] == K

    # Contraction axis must be exactly covered by tiles (zero-padded at init
    # if necessary) — partial blocks are only safe on the M / N axes.
    if K <= tk_max:
        tk = K
    else:
        assert K % tk_max == 0, "pad the contraction dim at init"
        tk = tk_max
    tn = N if N <= tn_max else tn_max
    tm = _pick_row_tile(M, tm_max)

    x2 = x.reshape(M, K).astype(jnp.bfloat16)
    b2 = b.reshape(1, N).astype(jnp.float32)

    grid = (pl.cdiv(M, tm), pl.cdiv(N, tn), K // tk)
    y = pl.pallas_call(
        functools.partial(_linear_kernel, relu=relu),
        out_shape=jax.ShapeDtypeStruct((M, N), out_dtype),
        grid=grid,
        in_specs=[pl.BlockSpec((tm, tk), lambda i, j, k: (i, k)),
                  pl.BlockSpec((tk, tn), lambda i, j, k: (k, j)),
                  pl.BlockSpec((1, tn), lambda i, j, k: (0, j))],
        out_specs=pl.BlockSpec((tm, tn), lambda i, j, k: (i, j)),
        scratch_shapes=[pltpu.VMEM((tm, tn), jnp.float32)],
        compiler_params=pltpu.CompilerParams(
            dimension_semantics=("parallel", "parallel", "arbitrary")),
    )(x2, w_t, b2)
    return y.reshape(orig_shape[:-1] + (N,))


def ffn(x, w1, b1, w2, b2, out_dtype=jnp.bfloat16, tm_max=256):
    """Fused feed-forward: relu(x @ w1 + b1) @ w2 + b2 in a single kernel."""
    orig_shape = x.shape
    D = orig_shape[-1]
    M = math.prod(orig_shape[:-1])
    dff = w1.shape[1]
    tm = _pick_row_tile(M, tm_max)

    x2 = x.reshape(M, D).astype(jnp.bfloat16)
    y = pl.pallas_call(
        _ffn_kernel,
        out_shape=jax.ShapeDtypeStruct((M, D), out_dtype),
        grid=(pl.cdiv(M, tm),),
        in_specs=[pl.BlockSpec((tm, D), lambda i: (i, 0)),
                  pl.BlockSpec((D, dff), lambda i: (0, 0)),
                  pl.BlockSpec((1, dff), lambda i: (0, 0)),
                  pl.BlockSpec((dff, D), lambda i: (0, 0)),
                  pl.BlockSpec((1, D), lambda i: (0, 0))],
        out_specs=pl.BlockSpec((tm, D), lambda i: (i, 0)),
        compiler_params=pltpu.CompilerParams(
            dimension_semantics=("parallel",)),
    )(x2, w1, b1.reshape(1, dff).astype(jnp.float32),
      w2, b2.reshape(1, D).astype(jnp.float32))
    return y.reshape(orig_shape)


def layer_norm(x, g, b, residual=None, out_dtype=jnp.bfloat16, tm_max=256):
    """LayerNorm over the last dim (f32 math); optionally fused residual add."""
    orig_shape = x.shape
    D = orig_shape[-1]
    M = math.prod(orig_shape[:-1])
    tm = _pick_row_tile(M, tm_max)

    x2 = x.reshape(M, D)
    g2 = g.reshape(1, D).astype(jnp.float32)
    b2 = b.reshape(1, D).astype(jnp.float32)
    row_spec = pl.BlockSpec((tm, D), lambda i: (i, 0))
    vec_spec = pl.BlockSpec((1, D), lambda i: (0, 0))
    grid = (pl.cdiv(M, tm),)
    cp = pltpu.CompilerParams(dimension_semantics=("parallel",))

    if residual is None:
        y = pl.pallas_call(
            _layernorm_kernel,
            out_shape=jax.ShapeDtypeStruct((M, D), out_dtype),
            grid=grid, in_specs=[row_spec, vec_spec, vec_spec],
            out_specs=row_spec, compiler_params=cp,
        )(x2, g2, b2)
    else:
        r2 = residual.reshape(M, D)
        y = pl.pallas_call(
            _add_layernorm_kernel,
            out_shape=jax.ShapeDtypeStruct((M, D), out_dtype),
            grid=grid, in_specs=[row_spec, row_spec, vec_spec, vec_spec],
            out_specs=row_spec, compiler_params=cp,
        )(x2, r2, g2, b2)
    return y.reshape(orig_shape)


def attention(q_src, k_src, v_src, key_padding_mask, *, nhead, q_col, k_col,
              v_col, causal, d_model, tq_max=256, tk_max=256):
    """Flash-style multi-head attention.

    q_src / k_src / v_src may all be the SAME array (fused QKV projection of
    shape [B, S, 3D]) — q_col/k_col/v_col pick the D-wide column block, so no
    split/transpose glue is ever materialized.  Output is [B, Sq, D] bf16
    (lane-dense, heads merged).
    """
    B, sq, _ = q_src.shape
    sk = k_src.shape[1]
    D = d_model
    assert D % nhead == 0
    # Lane-dense head slicing assumes d_model is a multiple of 128 (true for
    # the module default d_model=512 and for this demo).
    assert D % 128 == 0, "attention kernel assumes d_model % 128 == 0"
    Dh = D // nhead

    # --- Sk tiling: the key axis must be exactly covered; padded keys are
    # masked through the additive bias and their (zero) values contribute 0.
    if sk <= tk_max:
        tk = max(8, _round_up(sk, 8))
        sk_pad = tk
    else:
        tk = tk_max
        sk_pad = _round_up(sk, tk)

    pad_k = sk_pad - sk
    if pad_k:
        shared_q = q_src is k_src
        shared_v = v_src is k_src
        k_src = jnp.pad(k_src, ((0, 0), (0, pad_k), (0, 0)))
        v_src = k_src if shared_v else jnp.pad(
            v_src, ((0, 0), (0, pad_k), (0, 0)))
        if shared_q:
            q_src = k_src

    sq_arr = q_src.shape[1]
    tq = min(tq_max, max(8, _round_up(sq_arr, 8)))

    # Additive key bias, shared across heads: 0 for valid keys, NEG_INF for
    # padded / key-padding-masked keys.  Only [B, 1, sk_pad] f32 in HBM.
    col_ids = jnp.arange(sk_pad)
    masked = jnp.broadcast_to(col_ids >= sk, (B, sk_pad))
    if key_padding_mask is not None:
        kpm = key_padding_mask
        if kpm.shape[1] < sk_pad:
            kpm = jnp.pad(kpm, ((0, 0), (0, sk_pad - kpm.shape[1])),
                          constant_values=True)
        masked = jnp.logical_or(masked, kpm)
    bias = jnp.where(masked, NEG_INF, 0.0).astype(jnp.float32)[:, None, :]

    grid = (B, pl.cdiv(sq_arr, tq), sk_pad // tk)
    out = pl.pallas_call(
        functools.partial(_attn_kernel, nhead=nhead, causal=causal),
        out_shape=jax.ShapeDtypeStruct((B, sq_arr, D), jnp.bfloat16),
        grid=grid,
        in_specs=[
            pl.BlockSpec((1, tq, D), lambda b, qi, ki, c=q_col: (b, qi, c)),
            pl.BlockSpec((1, tk, D), lambda b, qi, ki, c=k_col: (b, ki, c)),
            pl.BlockSpec((1, tk, D), lambda b, qi, ki, c=v_col: (b, ki, c)),
            pl.BlockSpec((1, 1, tk), lambda b, qi, ki: (b, 0, ki)),
        ],
        out_specs=pl.BlockSpec((1, tq, D), lambda b, qi, ki: (b, qi, 0)),
        scratch_shapes=[pltpu.VMEM((tq, nhead), jnp.float32),
                        pltpu.VMEM((tq, nhead), jnp.float32),
                        pltpu.VMEM((tq, D), jnp.float32)],
        compiler_params=pltpu.CompilerParams(
            dimension_semantics=("parallel", "parallel", "arbitrary")),
    )(q_src, k_src, v_src, bias)

    if sq_arr != sq:
        out = out[:, :sq, :]
    return out


# ----------------------------------------------------------------------------
# Transformer building blocks (glue in JAX, hot path in Pallas)
# ----------------------------------------------------------------------------

def multi_head_attention(q_in, kv_in, p, key_padding_mask, nhead, causal):
    B, Sq, D = q_in.shape
    if q_in is kv_in:
        # self-attention: single fused QKV projection [D, 3D]; q/k/v are just
        # different column blocks of the same array.
        qkv = linear(q_in, p["qkv_wt"], p["qkv_b"])
        q_src = k_src = v_src = qkv
        q_col, k_col, v_col = 0, 1, 2
    else:
        # cross-attention: Q from the query input, fused KV from memory.
        q_src = linear(q_in, p["q_wt"], p["q_b"])
        kv = linear(kv_in, p["kv_wt"], p["kv_b"])
        k_src = v_src = kv
        q_col, k_col, v_col = 0, 0, 1

    o = attention(q_src, k_src, v_src, key_padding_mask, nhead=nhead,
                  q_col=q_col, k_col=k_col, v_col=v_col, causal=causal,
                  d_model=D)
    return linear(o, p["out_wt"], p["out_b"])


def encoder_layer(x, p, nhead, src_key_padding_mask=None):
    sa = multi_head_attention(x, x, p["self_attn"], src_key_padding_mask,
                              nhead, causal=False)
    x = layer_norm(sa, p["norm1_g"], p["norm1_b"], residual=x)
    ff = ffn(x, p["lin1_wt"], p["lin1_b"], p["lin2_wt"], p["lin2_b"])
    x = layer_norm(ff, p["norm2_g"], p["norm2_b"], residual=x)
    return x


def decoder_layer(x, memory, p, nhead, tgt_key_padding_mask=None,
                  memory_key_padding_mask=None):
    sa = multi_head_attention(x, x, p["self_attn"], tgt_key_padding_mask,
                              nhead, causal=True)
    x = layer_norm(sa, p["norm1_g"], p["norm1_b"], residual=x)
    ca = multi_head_attention(x, memory, p["cross_attn"],
                              memory_key_padding_mask, nhead, causal=False)
    x = layer_norm(ca, p["norm2_g"], p["norm2_b"], residual=x)
    ff = ffn(x, p["lin1_wt"], p["lin1_b"], p["lin2_wt"], p["lin2_b"])
    x = layer_norm(ff, p["norm3_g"], p["norm3_b"], residual=x)
    return x


def baseline_transformer_forward(params, src, tgt, *, nhead,
                                 src_key_padding_mask=None,
                                 tgt_key_padding_mask=None,
                                 memory_key_padding_mask=None):
    """Eval-mode forward: returns logits [B, tgt_len-1, vocab_size] (f32)."""
    pe = params["pe"]
    # Embeddings (gather is glue) + positional encoding.  Reproduces the
    # reference exactly — pe is indexed by the *batch* dimension because the
    # PyTorch PositionalEncoding assumes seq-first while the model is
    # batch_first.
    src_emb = jnp.take(params["emb_src"], src, axis=0)
    src_emb = (src_emb + pe[:src_emb.shape[0]][:, None, :]).astype(jnp.bfloat16)

    dec_in = tgt[:, :-1]
    dec_emb = jnp.take(params["emb_tgt"], dec_in, axis=0)
    dec_emb = (dec_emb + pe[:dec_emb.shape[0]][:, None, :]).astype(jnp.bfloat16)

    if tgt_key_padding_mask is not None:
        tgt_key_padding_mask = tgt_key_padding_mask[:, :-1]

    # Encoder stack (+ final norm, as in nn.Transformer).
    x = src_emb
    for lp in params["enc_layers"]:
        x = encoder_layer(x, lp, nhead, src_key_padding_mask)
    memory = layer_norm(x, params["enc_norm_g"], params["enc_norm_b"])

    # Decoder stack (+ final norm).  Causal mask is generated in-kernel.
    y = dec_emb
    for lp in params["dec_layers"]:
        y = decoder_layer(y, memory, lp, nhead,
                          tgt_key_padding_mask, memory_key_padding_mask)
    y = layer_norm(y, params["dec_norm_g"], params["dec_norm_b"])

    # Final projection to vocab (N-tiled), f32 logits.
    return linear(y, params["proj_wt"], params["proj_b"],
                  out_dtype=jnp.float32)
    # TODO(synk): training-mode branches (dropout, teacher forcing via
    # random.random(), autoregressive generate_sequence) not implemented;
    # eval-mode path only.


# ----------------------------------------------------------------------------
# Deterministic parameter initialization
# (weights pre-transposed [K, N], pre-cast to bf16; Q weights pre-scaled by
#  1/sqrt(Dh).  Loading PyTorch weights would require the same transforms.)
# ----------------------------------------------------------------------------

def _w(key, shape, scale=0.02):
    return scale * jax.random.normal(key, shape, dtype=jnp.float32)


def _init_self_attn(key, d, nhead):
    scale = 1.0 / math.sqrt(d // nhead)
    k1, k2 = jax.random.split(key)
    w = _w(k1, (d, 3 * d))
    b = jnp.zeros((3 * d,), jnp.float32)
    w = w.at[:, :d].multiply(scale)      # fold softmax scale into Q projection
    b = b.at[:d].multiply(scale)
    return {"qkv_wt": w.astype(jnp.bfloat16), "qkv_b": b,
            "out_wt": _w(k2, (d, d)).astype(jnp.bfloat16),
            "out_b": jnp.zeros((d,), jnp.float32)}


def _init_cross_attn(key, d, nhead):
    scale = 1.0 / math.sqrt(d // nhead)
    k1, k2, k3 = jax.random.split(key, 3)
    return {"q_wt": (_w(k1, (d, d)) * scale).astype(jnp.bfloat16),
            "q_b": jnp.zeros((d,), jnp.float32),
            "kv_wt": _w(k2, (d, 2 * d)).astype(jnp.bfloat16),
            "kv_b": jnp.zeros((2 * d,), jnp.float32),
            "out_wt": _w(k3, (d, d)).astype(jnp.bfloat16),
            "out_b": jnp.zeros((d,), jnp.float32)}


def _init_enc_layer(key, d, dff, nhead):
    k1, k2, k3 = jax.random.split(key, 3)
    return {"self_attn": _init_self_attn(k1, d, nhead),
            "lin1_wt": _w(k2, (d, dff)).astype(jnp.bfloat16),
            "lin1_b": jnp.zeros((dff,), jnp.float32),
            "lin2_wt": _w(k3, (dff, d)).astype(jnp.bfloat16),
            "lin2_b": jnp.zeros((d,), jnp.float32),
            "norm1_g": jnp.ones((d,), jnp.float32),
            "norm1_b": jnp.zeros((d,), jnp.float32),
            "norm2_g": jnp.ones((d,), jnp.float32),
            "norm2_b": jnp.zeros((d,), jnp.float32)}


def _init_dec_layer(key, d, dff, nhead):
    k1, k2, k3, k4 = jax.random.split(key, 4)
    return {"self_attn": _init_self_attn(k1, d, nhead),
            "cross_attn": _init_cross_attn(k2, d, nhead),
            "lin1_wt": _w(k3, (d, dff)).astype(jnp.bfloat16),
            "lin1_b": jnp.zeros((dff,), jnp.float32),
            "lin2_wt": _w(k4, (dff, d)).astype(jnp.bfloat16),
            "lin2_b": jnp.zeros((d,), jnp.float32),
            "norm1_g": jnp.ones((d,), jnp.float32),
            "norm1_b": jnp.zeros((d,), jnp.float32),
            "norm2_g": jnp.ones((d,), jnp.float32),
            "norm2_b": jnp.zeros((d,), jnp.float32),
            "norm3_g": jnp.ones((d,), jnp.float32),
            "norm3_b": jnp.zeros((d,), jnp.float32)}


def init_params(key, d_model, nhead, n_enc, n_dec, dim_ff, vocab_size,
                max_len=64):
    assert d_model % nhead == 0 and d_model % 128 == 0
    keys = jax.random.split(key, 3 + n_enc + n_dec)
    # sinusoidal PE table (exact PositionalEncoding formula)
    position = jnp.arange(max_len, dtype=jnp.float32)[:, None]
    div_term = jnp.exp(jnp.arange(0, d_model, 2, dtype=jnp.float32)
                       * (-jnp.log(10000.0) / d_model))
    pe = jnp.zeros((max_len, d_model), jnp.float32)
    pe = pe.at[:, 0::2].set(jnp.sin(position * div_term))
    pe = pe.at[:, 1::2].set(jnp.cos(position * div_term))
    return {
        "emb_src": _w(keys[0], (vocab_size, d_model), 1.0),
        "emb_tgt": _w(keys[1], (vocab_size, d_model), 1.0),
        "pe": pe,
        "enc_layers": [_init_enc_layer(keys[3 + i], d_model, dim_ff, nhead)
                       for i in range(n_enc)],
        "dec_layers": [_init_dec_layer(keys[3 + n_enc + i], d_model, dim_ff,
                                       nhead) for i in range(n_dec)],
        "enc_norm_g": jnp.ones((d_model,), jnp.float32),
        "enc_norm_b": jnp.zeros((d_model,), jnp.float32),
        "dec_norm_g": jnp.ones((d_model,), jnp.float32),
        "dec_norm_b": jnp.zeros((d_model,), jnp.float32),
        "proj_wt": _w(keys[2], (d_model, vocab_size)).astype(jnp.bfloat16),
        "proj_b": jnp.zeros((vocab_size,), jnp.float32),
    }


# ----------------------------------------------------------------------------
# Demo
# ----------------------------------------------------------------------------

if __name__ == "__main__":
    # Small, module-consistent shapes (d_model kept a multiple of 128 so the
    # lane-dense head slicing applies — the module default is 512).
    d_model, nhead = 128, 4
    num_encoder_layers, num_decoder_layers = 2, 2
    dim_feedforward, vocab_size = 256, 256
    B, src_len, tgt_len = 2, 8, 9

    root = jax.random.PRNGKey(0)
    kp, ks, kt = jax.random.split(root, 3)
    params = init_params(kp, d_model, nhead, num_encoder_layers,
                         num_decoder_layers, dim_feedforward, vocab_size)
    src = jax.random.randint(ks, (B, src_len), 0, vocab_size, dtype=jnp.int32)
    tgt = jax.random.randint(kt, (B, tgt_len), 0, vocab_size, dtype=jnp.int32)

    fwd = jax.jit(functools.partial(baseline_transformer_forward, nhead=nhead))
    logits = fwd(params, src, tgt)
    jax.block_until_ready(logits)

    assert logits.shape == (B, tgt_len - 1, vocab_size), logits.shape
    assert logits.dtype == jnp.float32
    assert bool(jnp.all(jnp.isfinite(logits)))
    print("KERNEL_OK")
</pallas_src>

<mosaic_0001>
module attributes {stable_mosaic.version = 11 : i64} {
  func.func @_linear_kernel(%arg0: i32, %arg1: i32, %arg2: i32, %arg3: memref<8x128xbf16, #tpu.memory_space<vmem>>, %arg4: memref<128x128xbf16, #tpu.memory_space<vmem>>, %arg5: memref<1x128xf32, #tpu.memory_space<vmem>>, %arg6: memref<8x128xbf16, #tpu.memory_space<vmem>>, %arg7: memref<8x128xf32, #tpu.memory_space<vmem>>) attributes {dimension_semantics = [#tpu.dimension_semantics<parallel>, #tpu.dimension_semantics<parallel>, #tpu.dimension_semantics<arbitrary>], iteration_bounds = array<i64: 2, 1, 1>, scalar_prefetch = 0 : i64, scratch_operands = 1 : i64, tpu.core_type = #tpu.core_type<tc>, window_params = [{transform_indices = @transform_0, window_bounds = array<i64: 8, 128>}, {transform_indices = @transform_1, window_bounds = array<i64: 128, 128>}, {transform_indices = @transform_2, window_bounds = array<i64: 1, 128>}, {transform_indices = @transform_3, window_bounds = array<i64: 8, 128>}]} {
    %c0_i32 = arith.constant 0 : i32
    %0 = arith.cmpi eq, %arg2, %c0_i32 : i32
    %1 = arith.extui %0 : i1 to i32
    %c0_i32_0 = arith.constant 0 : i32
    %2 = arith.cmpi ne, %1, %c0_i32_0 : i32
    scf.if %2 {
      %cst_10 = arith.constant 0.000000e+00 : f32
      %12 = vector.broadcast %cst_10 : f32 to vector<8x128xf32>
      %c0_11 = arith.constant 0 : index
      %c0_12 = arith.constant 0 : index
      %13 = vector.load %arg7[%c0_11, %c0_12] : memref<8x128xf32, #tpu.memory_space<vmem>>, vector<8x128xf32>
      tpu.vector_store %arg7[%c0_11, %c0_12], %12 {strides = array<i32>} : memref<8x128xf32, #tpu.memory_space<vmem>>, vector<8x128xf32>,
    } else {
    }
    %c0 = arith.constant 0 : index
    %c0_1 = arith.constant 0 : index
    %3 = vector.load %arg7[%c0, %c0_1] : memref<8x128xf32, #tpu.memory_space<vmem>>, vector<8x128xf32>
    %c0_2 = arith.constant 0 : index
    %c0_3 = arith.constant 0 : index
    %4 = vector.load %arg3[%c0_2, %c0_3] : memref<8x128xbf16, #tpu.memory_space<vmem>>, vector<8x128xbf16>
    %c0_4 = arith.constant 0 : index
    %c0_5 = arith.constant 0 : index
    %5 = vector.load %arg4[%c0_4, %c0_5] : memref<128x128xbf16, #tpu.memory_space<vmem>>, vector<128x128xbf16>
    %cst = arith.constant dense<0.000000e+00> : vector<8x128xf32>
    %6 = tpu.matmul %4, %5, %cst {dimension_numbers = #tpu.dot_dimension_numbers<[1], [0], [0], [1], [0, 0, 1, 1], [], []>} : vector<8x128xbf16>, vector<128x128xbf16>, vector<8x128xf32> -> vector<8x128xf32>
    %7 = arith.addf %3, %6 : vector<8x128xf32>
    %c0_6 = arith.constant 0 : index
    %c0_7 = arith.constant 0 : index
    %8 = vector.load %arg7[%c0_6, %c0_7] : memref<8x128xf32, #tpu.memory_space<vmem>>, vector<8x128xf32>
    tpu.vector_store %arg7[%c0_6, %c0_7], %7 {strides = array<i32>} : memref<8x128xf32, #tpu.memory_space<vmem>>, vector<8x128xf32>,
    %c0_i32_8 = arith.constant 0 : i32
    %9 = arith.cmpi eq, %arg2, %c0_i32_8 : i32
    %10 = arith.extui %9 : i1 to i32
    %c0_i32_9 = arith.constant 0 : i32
    %11 = arith.cmpi ne, %10, %c0_i32_9 : i32
    scf.if %11 {
      %c0_10 = arith.constant 0 : index
      %c0_11 = arith.constant 0 : index
      %12 = vector.load %arg7[%c0_10, %c0_11] : memref<8x128xf32, #tpu.memory_space<vmem>>, vector<8x128xf32>
      %c0_12 = arith.constant 0 : index
      %c0_13 = arith.constant 0 : index
      %13 = vector.load %arg5[%c0_12, %c0_13] : memref<1x128xf32, #tpu.memory_space<vmem>>, vector<1x128xf32>
      %14 = vector.broadcast %13 : vector<1x128xf32> to vector<8x128xf32>
      %15 = arith.addf %12, %14 : vector<8x128xf32>
      %16 = arith.truncf %15 : vector<8x128xf32> to vector<8x128xbf16>
      %c0_14 = arith.constant 0 : index
      %c0_15 = arith.constant 0 : index
      %17 = vector.load %arg6[%c0_14, %c0_15] : memref<8x128xbf16, #tpu.memory_space<vmem>>, vector<8x128xbf16>
      tpu.vector_store %arg6[%c0_14, %c0_15], %16 {strides = array<i32>} : memref<8x128xbf16, #tpu.memory_space<vmem>>, vector<8x128xbf16>,
    } else {
    }
    return
  }
  func.func @transform_0(%arg0: i32, %arg1: i32, %arg2: i32) -> (i32, i32) {
    %c0_i32 = arith.constant 0 : i32
    return %arg0, %arg2 : i32, i32
  }
  func.func @transform_1(%arg0: i32, %arg1: i32, %arg2: i32) -> (i32, i32) {
    %c0_i32 = arith.constant 0 : i32
    return %arg2, %arg1 : i32, i32
  }
  func.func @transform_2(%arg0: i32, %arg1: i32, %arg2: i32) -> (i32, i32) {
    %c0_i32 = arith.constant 0 : i32
    %c0_i32_0 = arith.constant 0 : i32
    return %c0_i32, %arg1 : i32, i32
  }
  func.func @transform_3(%arg0: i32, %arg1: i32, %arg2: i32) -> (i32, i32) {
    %c0_i32 = arith.constant 0 : i32
    return %arg0, %arg1 : i32, i32
  }
}

module attributes {stable_mosaic.version = 11 : i64} {
  func.func @_linear_kernel(%arg0: i32, %arg1: i32, %arg2: i32, %arg3: memref<8x128xbf16, #tpu.memory_space<vmem>>, %arg4: memref<128x384xbf16, #tpu.memory_space<vmem>>, %arg5: memref<1x384xf32, #tpu.memory_space<vmem>>, %arg6: memref<8x384xbf16, #tpu.memory_space<vmem>>, %arg7: memref<8x384xf32, #tpu.memory_space<vmem>>) attributes {dimension_semantics = [#tpu.dimension_semantics<parallel>, #tpu.dimension_semantics<parallel>, #tpu.dimension_semantics<arbitrary>], iteration_bounds = array<i64: 2, 1, 1>, scalar_prefetch = 0 : i64, scratch_operands = 1 : i64, tpu.core_type = #tpu.core_type<tc>, window_params = [{transform_indices = @transform_0, window_bounds = array<i64: 8, 128>}, {transform_indices = @transform_1, window_bounds = array<i64: 128, 384>}, {transform_indices = @transform_2, window_bounds = array<i64: 1, 384>}, {transform_indices = @transform_3, window_bounds = array<i64: 8, 384>}]} {
    %c0_i32 = arith.constant 0 : i32
    %0 = arith.cmpi eq, %arg2, %c0_i32 : i32
    %1 = arith.extui %0 : i1 to i32
    %c0_i32_0 = arith.constant 0 : i32
    %2 = arith.cmpi ne, %1, %c0_i32_0 : i32
    scf.if %2 {
      %cst_10 = arith.constant 0.000000e+00 : f32
      %12 = vector.broadcast %cst_10 : f32 to vector<8x384xf32>
      %c0_11 = arith.constant 0 : index
      %c0_12 = arith.constant 0 : index
      %13 = vector.load %arg7[%c0_11, %c0_12] : memref<8x384xf32, #tpu.memory_space<vmem>>, vector<8x384xf32>
      tpu.vector_store %arg7[%c0_11, %c0_12], %12 {strides = array<i32>} : memref<8x384xf32, #tpu.memory_space<vmem>>, vector<8x384xf32>,
    } else {
    }
    %c0 = arith.constant 0 : index
    %c0_1 = arith.constant 0 : index
    %3 = vector.load %arg7[%c0, %c0_1] : memref<8x384xf32, #tpu.memory_space<vmem>>, vector<8x384xf32>
    %c0_2 = arith.constant 0 : index
    %c0_3 = arith.constant 0 : index
    %4 = vector.load %arg3[%c0_2, %c0_3] : memref<8x128xbf16, #tpu.memory_space<vmem>>, vector<8x128xbf16>
    %c0_4 = arith.constant 0 : index
    %c0_5 = arith.constant 0 : index
    %5 = vector.load %arg4[%c0_4, %c0_5] : memref<128x384xbf16, #tpu.memory_space<vmem>>, vector<128x384xbf16>
    %cst = arith.constant dense<0.000000e+00> : vector<8x384xf32>
    %6 = tpu.matmul %4, %5, %cst {dimension_numbers = #tpu.dot_dimension_numbers<[1], [0], [0], [1], [0, 0, 1, 1], [], []>} : vector<8x128xbf16>, vector<128x384xbf16>, vector<8x384xf32> -> vector<8x384xf32>
    %7 = arith.addf %3, %6 : vector<8x384xf32>
    %c0_6 = arith.constant 0 : index
    %c0_7 = arith.constant 0 : index
    %8 = vector.load %arg7[%c0_6, %c0_7] : memref<8x384xf32, #tpu.memory_space<vmem>>, vector<8x384xf32>
    tpu.vector_store %arg7[%c0_6, %c0_7], %7 {strides = array<i32>} : memref<8x384xf32, #tpu.memory_space<vmem>>, vector<8x384xf32>,
    %c0_i32_8 = arith.constant 0 : i32
    %9 = arith.cmpi eq, %arg2, %c0_i32_8 : i32
    %10 = arith.extui %9 : i1 to i32
    %c0_i32_9 = arith.constant 0 : i32
    %11 = arith.cmpi ne, %10, %c0_i32_9 : i32
    scf.if %11 {
      %c0_10 = arith.constant 0 : index
      %c0_11 = arith.constant 0 : index
      %12 = vector.load %arg7[%c0_10, %c0_11] : memref<8x384xf32, #tpu.memory_space<vmem>>, vector<8x384xf32>
      %c0_12 = arith.constant 0 : index
      %c0_13 = arith.constant 0 : index
      %13 = vector.load %arg5[%c0_12, %c0_13] : memref<1x384xf32, #tpu.memory_space<vmem>>, vector<1x384xf32>
      %14 = vector.broadcast %13 : vector<1x384xf32> to vector<8x384xf32>
      %15 = arith.addf %12, %14 : vector<8x384xf32>
      %16 = arith.truncf %15 : vector<8x384xf32> to vector<8x384xbf16>
      %c0_14 = arith.constant 0 : index
      %c0_15 = arith.constant 0 : index
      %17 = vector.load %arg6[%c0_14, %c0_15] : memref<8x384xbf16, #tpu.memory_space<vmem>>, vector<8x384xbf16>
      tpu.vector_store %arg6[%c0_14, %c0_15], %16 {strides = array<i32>} : memref<8x384xbf16, #tpu.memory_space<vmem>>, vector<8x384xbf16>,
    } else {
    }
    return
  }
  func.func @transform_0(%arg0: i32, %arg1: i32, %arg2: i32) -> (i32, i32) {
    %c0_i32 = arith.constant 0 : i32
    return %arg0, %arg2 : i32, i32
  }
  func.func @transform_1(%arg0: i32, %arg1: i32, %arg2: i32) -> (i32, i32) {
    %c0_i32 = arith.constant 0 : i32
    return %arg2, %arg1 : i32, i32
  }
  func.func @transform_2(%arg0: i32, %arg1: i32, %arg2: i32) -> (i32, i32) {
    %c0_i32 = arith.constant 0 : i32
    %c0_i32_0 = arith.constant 0 : i32
    return %c0_i32, %arg1 : i32, i32
  }
  func.func @transform_3(%arg0: i32, %arg1: i32, %arg2: i32) -> (i32, i32) {
    %c0_i32 = arith.constant 0 : i32
    return %arg0, %arg1 : i32, i32
  }
}

module attributes {stable_mosaic.version = 11 : i64} {
  func.func @_add_layernorm_kernel(%arg0: i32, %arg1: memref<8x128xbf16, #tpu.memory_space<vmem>>, %arg2: memref<8x128xbf16, #tpu.memory_space<vmem>>, %arg3: memref<1x128xf32, #tpu.memory_space<vmem>>, %arg4: memref<1x128xf32, #tpu.memory_space<vmem>>, %arg5: memref<8x128xbf16, #tpu.memory_space<vmem>>) attributes {dimension_semantics = [#tpu.dimension_semantics<parallel>], iteration_bounds = array<i64: 2>, scalar_prefetch = 0 : i64, scratch_operands = 0 : i64, tpu.core_type = #tpu.core_type<tc>, window_params = [{transform_indices = @transform_0, window_bounds = array<i64: 8, 128>}, {transform_indices = @transform_1, window_bounds = array<i64: 8, 128>}, {pipeline_mode = #tpu.pipeline_mode<synchronous>, transform_indices = @transform_2, window_bounds = array<i64: 1, 128>}, {pipeline_mode = #tpu.pipeline_mode<synchronous>, transform_indices = @transform_3, window_bounds = array<i64: 1, 128>}, {transform_indices = @transform_4, window_bounds = array<i64: 8, 128>}]} {
    %c0 = arith.constant 0 : index
    %c0_0 = arith.constant 0 : index
    %0 = vector.load %arg1[%c0, %c0_0] : memref<8x128xbf16, #tpu.memory_space<vmem>>, vector<8x128xbf16>
    %1 = arith.extf %0 : vector<8x128xbf16> to vector<8x128xf32>
    %c0_1 = arith.constant 0 : index
    %c0_2 = arith.constant 0 : index
    %2 = vector.load %arg2[%c0_1, %c0_2] : memref<8x128xbf16, #tpu.memory_space<vmem>>, vector<8x128xbf16>
    %3 = arith.extf %2 : vector<8x128xbf16> to vector<8x128xf32>
    %4 = arith.addf %1, %3 : vector<8x128xf32>
    %cst = arith.constant dense<0.000000e+00> : vector<8xf32>
    %5 = vector.multi_reduction <add>, %4, %cst [1] : vector<8x128xf32> to vector<8xf32>
    %6 = vector.shape_cast %5 : vector<8xf32> to vector<8x1xf32>
    %cst_3 = arith.constant 1.280000e+02 : f32
    %7 = vector.broadcast %cst_3 : f32 to vector<8x1xf32>
    %8 = arith.divf %6, %7 : vector<8x1xf32>
    %9 = vector.broadcast %8 : vector<8x1xf32> to vector<8x128xf32>
    %10 = arith.subf %4, %9 : vector<8x128xf32>
    %11 = arith.mulf %10, %10 : vector<8x128xf32>
    %cst_4 = arith.constant dense<0.000000e+00> : vector<8xf32>
    %12 = vector.multi_reduction <add>, %11, %cst_4 [1] : vector<8x128xf32> to vector<8xf32>
    %13 = vector.shape_cast %12 : vector<8xf32> to vector<8x1xf32>
    %cst_5 = arith.constant 1.280000e+02 : f32
    %14 = vector.broadcast %cst_5 : f32 to vector<8x1xf32>
    %15 = arith.divf %13, %14 : vector<8x1xf32>
    %16 = vector.broadcast %8 : vector<8x1xf32> to vector<8x128xf32>
    %17 = arith.subf %4, %16 : vector<8x128xf32>
    %cst_6 = arith.constant 9.99999974E-6 : f32
    %18 = vector.broadcast %cst_6 : f32 to vector<8x1xf32>
    %19 = arith.addf %15, %18 : vector<8x1xf32>
    %20 = math.rsqrt %19 : vector<8x1xf32>
    %21 = vector.broadcast %20 : vector<8x1xf32> to vector<8x128xf32>
    %22 = arith.mulf %17, %21 : vector<8x128xf32>
    %c0_7 = arith.constant 0 : index
    %c0_8 = arith.constant 0 : index
    %23 = vector.load %arg3[%c0_7, %c0_8] : memref<1x128xf32, #tpu.memory_space<vmem>>, vector<1x128xf32>
    %24 = vector.broadcast %23 : vector<1x128xf32> to vector<8x128xf32>
    %25 = arith.mulf %22, %24 : vector<8x128xf32>
    %c0_9 = arith.constant 0 : index
    %c0_10 = arith.constant 0 : index
    %26 = vector.load %arg4[%c0_9, %c0_10] : memref<1x128xf32, #tpu.memory_space<vmem>>, vector<1x128xf32>
    %27 = vector.broadcast %26 : vector<1x128xf32> to vector<8x128xf32>
    %28 = arith.addf %25, %27 : vector<8x128xf32>
    %29 = arith.truncf %28 : vector<8x128xf32> to vector<8x128xbf16>
    %c0_11 = arith.constant 0 : index
    %c0_12 = arith.constant 0 : index
    %30 = vector.load %arg5[%c0_11, %c0_12] : memref<8x128xbf16, #tpu.memory_space<vmem>>, vector<8x128xbf16>
    tpu.vector_store %arg5[%c0_11, %c0_12], %29 {strides = array<i32>} : memref<8x128xbf16, #tpu.memory_space<vmem>>, vector<8x128xbf16>,
    return
  }
  func.func @transform_0(%arg0: i32) -> (i32, i32) {
    %c0_i32 = arith.constant 0 : i32
    %c0_i32_0 = arith.constant 0 : i32
    return %arg0, %c0_i32 : i32, i32
  }
  func.func @transform_1(%arg0: i32) -> (i32, i32) {
    %c0_i32 = arith.constant 0 : i32
    %c0_i32_0 = arith.constant 0 : i32
    return %arg0, %c0_i32 : i32, i32
  }
  func.func @transform_2(%arg0: i32) -> (i32, i32) {
    %c0_i32 = arith.constant 0 : i32
    %c0_i32_0 = arith.constant 0 : i32
    %c0_i32_1 = arith.constant 0 : i32
    return %c0_i32, %c0_i32_0 : i32, i32
  }
  func.func @transform_3(%arg0: i32) -> (i32, i32) {
    %c0_i32 = arith.constant 0 : i32
    %c0_i32_0 = arith.constant 0 : i32
    %c0_i32_1 = arith.constant 0 : i32
    return %c0_i32, %c0_i32_0 : i32, i32
  }
  func.func @transform_4(%arg0: i32) -> (i32, i32) {
    %c0_i32 = arith.constant 0 : i32
    %c0_i32_0 = arith.constant 0 : i32
    return %arg0, %c0_i32 : i32, i32
  }
}

module attributes {stable_mosaic.version = 11 : i64} {
  func.func @_attn_kernel(%arg0: i32, %arg1: i32, %arg2: i32, %arg3: memref<1x8x128xbf16, #tpu.memory_space<vmem>>, %arg4: memref<1x8x128xbf16, #tpu.memory_space<vmem>>, %arg5: memref<1x8x128xbf16, #tpu.memory_space<vmem>>, %arg6: memref<1x1x8xf32, #tpu.memory_space<vmem>>, %arg7: memref<1x8x128xbf16, #tpu.memory_space<vmem>>, %arg8: memref<8x4xf32, #tpu.memory_space<vmem>>, %arg9: memref<8x4xf32, #tpu.memory_space<vmem>>, %arg10: memref<8x128xf32, #tpu.memory_space<vmem>>) attributes {dimension_semantics = [#tpu.dimension_semantics<parallel>, #tpu.dimension_semantics<parallel>, #tpu.dimension_semantics<arbitrary>], iteration_bounds = array<i64: 2, 1, 1>, scalar_prefetch = 0 : i64, scratch_operands = 3 : i64, tpu.core_type = #tpu.core_type<tc>, window_params = [{transform_indices = @transform_0, window_bounds = array<i64: 1, 8, 128>}, {transform_indices = @transform_1, window_bounds = array<i64: 1, 8, 128>}, {transform_indices = @transform_2, window_bounds = array<i64: 1, 8, 128>}, {transform_indices = @transform_3, window_bounds = array<i64: 1, 1, 8>}, {transform_indices = @transform_4, window_bounds = array<i64: 1, 8, 128>}]} {
    %c0_i32 = arith.constant 0 : i32
    %0 = arith.cmpi eq, %arg2, %c0_i32 : i32
    %1 = arith.extui %0 : i1 to i32
    %c0_i32_0 = arith.constant 0 : i32
    %2 = arith.cmpi ne, %1, %c0_i32_0 : i32
    scf.if %2 {
      %cst_74 = arith.constant -1.000000e+30 : f32
      %140 = vector.broadcast %cst_74 : f32 to vector<8x4xf32>
      %c0_75 = arith.constant 0 : index
      %c0_76 = arith.constant 0 : index
      %141 = vector.load %arg8[%c0_75, %c0_76] : memref<8x4xf32, #tpu.memory_space<vmem>>, vector<8x4xf32>
      tpu.vector_store %arg8[%c0_75, %c0_76], %140 {strides = array<i32>} : memref<8x4xf32, #tpu.memory_space<vmem>>, vector<8x4xf32>,
      %cst_77 = arith.constant 0.000000e+00 : f32
      %142 = vector.broadcast %cst_77 : f32 to vector<8x4xf32>
      %c0_78 = arith.constant 0 : index
      %c0_79 = arith.constant 0 : index
      %143 = vector.load %arg9[%c0_78, %c0_79] : memref<8x4xf32, #tpu.memory_space<vmem>>, vector<8x4xf32>
      tpu.vector_store %arg9[%c0_78, %c0_79], %142 {strides = array<i32>} : memref<8x4xf32, #tpu.memory_space<vmem>>, vector<8x4xf32>,
      %cst_80 = arith.constant 0.000000e+00 : f32
      %144 = vector.broadcast %cst_80 : f32 to vector<8x128xf32>
      %c0_81 = arith.constant 0 : index
      %c0_82 = arith.constant 0 : index
      %145 = vector.load %arg10[%c0_81, %c0_82] : memref<8x128xf32, #tpu.memory_space<vmem>>, vector<8x128xf32>
      tpu.vector_store %arg10[%c0_81, %c0_82], %144 {strides = array<i32>} : memref<8x128xf32, #tpu.memory_space<vmem>>, vector<8x128xf32>,
    } else {
    }
    %c0 = arith.constant 0 : index
    %c0_1 = arith.constant 0 : index
    %c0_2 = arith.constant 0 : index
    %3 = vector.load %arg6[%c0, %c0_1, %c0_2] : memref<1x1x8xf32, #tpu.memory_space<vmem>>, vector<1x1x8xf32>
    %4 = vector.shape_cast %3 : vector<1x1x8xf32> to vector<1x8xf32>
    %c8_i32 = arith.constant 8 : i32
    %5 = arith.muli %arg1, %c8_i32 : i32
    %6 = tpu.iota {dimensions = array<i32: 0>} : vector<8x8xi32>
    %7 = vector.broadcast %5 : i32 to vector<8x8xi32>
    %8 = arith.addi %7, %6 : vector<8x8xi32>
    %c8_i32_3 = arith.constant 8 : i32
    %9 = arith.muli %arg2, %c8_i32_3 : i32
    %10 = tpu.iota {dimensions = array<i32: 1>} : vector<8x8xi32>
    %11 = vector.broadcast %9 : i32 to vector<8x8xi32>
    %12 = arith.addi %11, %10 : vector<8x8xi32>
    %13 = arith.cmpi sle, %12, %8 : vector<8x8xi32>
    %cst = arith.constant 0.000000e+00 : f32
    %cst_4 = arith.constant -1.000000e+30 : f32
    %14 = vector.broadcast %cst : f32 to vector<8x8xf32>
    %15 = vector.broadcast %cst_4 : f32 to vector<8x8xf32>
    %16 = arith.select %13, %14, %15 : vector<8x8xi1>, vector<8x8xf32>
    %17 = vector.broadcast %4 : vector<1x8xf32> to vector<8x8xf32>
    %18 = arith.addf %17, %16 : vector<8x8xf32>
    %c0_5 = arith.constant 0 : index
    %c0_6 = arith.constant 0 : index
    %c0_7 = arith.constant 0 : index
    %19 = vector.load %arg3[%c0_5, %c0_6, %c0_7] : memref<1x8x128xbf16, #tpu.memory_space<vmem>>, vector<1x8x128xbf16>
    %20 = vector.shape_cast %19 : vector<1x8x128xbf16> to vector<8x128xbf16>
    %c0_8 = arith.constant 0 : index
    %c0_9 = arith.constant 0 : index
    %c0_10 = arith.constant 0 : index
    %21 = vector.load %arg4[%c0_8, %c0_9, %c0_10] : memref<1x8x128xbf16, #tpu.memory_space<vmem>>, vector<1x8x128xbf16>
    %22 = vector.shape_cast %21 : vector<1x8x128xbf16> to vector<8x128xbf16>
    %c0_11 = arith.constant 0 : index
    %c0_12 = arith.constant 0 : index
    %c0_13 = arith.constant 0 : index
    %23 = vector.load %arg5[%c0_11, %c0_12, %c0_13] : memref<1x8x128xbf16, #tpu.memory_space<vmem>>, vector<1x8x128xbf16>
    %24 = vector.shape_cast %23 : vector<1x8x128xbf16> to vector<8x128xbf16>
    %25 = vector.extract_strided_slice %20 {offsets = [0, 0], sizes = [8, 32], strides = [1, 1]} : vector<8x128xbf16> to vector<8x32xbf16>
    %26 = vector.extract_strided_slice %22 {offsets = [0, 0], sizes = [8, 32], strides = [1, 1]} : vector<8x128xbf16> to vector<8x32xbf16>
    %cst_14 = arith.constant dense<0.000000e+00> : vector<8x8xf32>
    %27 = tpu.matmul %25, %26, %cst_14 {dimension_numbers = #tpu.dot_dimension_numbers<[1], [1], [0], [0], [0, 0, 1, 0], [], []>} : vector<8x32xbf16>, vector<8x32xbf16>, vector<8x8xf32> -> vector<8x8xf32>
    %28 = arith.addf %27, %18 : vector<8x8xf32>
    %c0_15 = arith.constant 0 : index
    %c0_16 = arith.constant 0 : index
    %29 = vector.load %arg8[%c0_15, %c0_16] : memref<8x4xf32, #tpu.memory_space<vmem>>, vector<8x1xf32>
    %cst_17 = arith.constant dense<0xFF800000> : vector<8xf32>
    %30 = vector.multi_reduction <maximumf>, %28, %cst_17 [1] : vector<8x8xf32> to vector<8xf32>
    %31 = vector.shape_cast %30 : vector<8xf32> to vector<8x1xf32>
    %32 = arith.maximumf %29, %31 : vector<8x1xf32>
    %33 = arith.subf %29, %32 : vector<8x1xf32>
    %34 = math.exp %33 : vector<8x1xf32>
    %35 = vector.broadcast %32 : vector<8x1xf32> to vector<8x8xf32>
    %36 = arith.subf %28, %35 : vector<8x8xf32>
    %37 = math.exp %36 : vector<8x8xf32>
    %c0_18 = arith.constant 0 : index
    %c0_19 = arith.constant 0 : index
    %38 = vector.load %arg9[%c0_18, %c0_19] : memref<8x4xf32, #tpu.memory_space<vmem>>, vector<8x1xf32>
    %39 = arith.mulf %34, %38 : vector<8x1xf32>
    %cst_20 = arith.constant dense<0.000000e+00> : vector<8xf32>
    %40 = vector.multi_reduction <add>, %37, %cst_20 [1] : vector<8x8xf32> to vector<8xf32>
    %41 = vector.shape_cast %40 : vector<8xf32> to vector<8x1xf32>
    %42 = arith.addf %39, %41 : vector<8x1xf32>
    %c0_21 = arith.constant 0 : index
    %c0_22 = arith.constant 0 : index
    %43 = vector.load %arg9[%c0_21, %c0_22] : memref<8x4xf32, #tpu.memory_space<vmem>>, vector<8x1xf32>
    tpu.vector_store %arg9[%c0_21, %c0_22], %42 {strides = array<i32>} : memref<8x4xf32, #tpu.memory_space<vmem>>, vector<8x1xf32>,
    %c0_23 = arith.constant 0 : index
    %c0_24 = arith.constant 0 : index
    %44 = vector.load %arg10[%c0_23, %c0_24] : memref<8x128xf32, #tpu.memory_space<vmem>>, vector<8x32xf32>
    %45 = vector.broadcast %34 : vector<8x1xf32> to vector<8x32xf32>
    %46 = arith.mulf %45, %44 : vector<8x32xf32>
    %47 = arith.truncf %37 : vector<8x8xf32> to vector<8x8xbf16>
    %48 = vector.extract_strided_slice %24 {offsets = [0, 0], sizes = [8, 32], strides = [1, 1]} : vector<8x128xbf16> to vector<8x32xbf16>
    %cst_25 = arith.constant dense<0.000000e+00> : vector<8x32xf32>
    %49 = tpu.matmul %47, %48, %cst_25 {dimension_numbers = #tpu.dot_dimension_numbers<[1], [0], [0], [1], [0, 0, 1, 1], [], []>} : vector<8x8xbf16>, vector<8x32xbf16>, vector<8x32xf32> -> vector<8x32xf32>
    %50 = arith.addf %46, %49 : vector<8x32xf32>
    %c0_26 = arith.constant 0 : index
    %c0_27 = arith.constant 0 : index
    %51 = vector.load %arg10[%c0_26, %c0_27] : memref<8x128xf32, #tpu.memory_space<vmem>>, vector<8x32xf32>
    tpu.vector_store %arg10[%c0_26, %c0_27], %50 {strides = array<i32>} : memref<8x128xf32, #tpu.memory_space<vmem>>, vector<8x32xf32>,
    %c0_28 = arith.constant 0 : index
    %c0_29 = arith.constant 0 : index
    %52 = vector.load %arg8[%c0_28, %c0_29] : memref<8x4xf32, #tpu.memory_space<vmem>>, vector<8x1xf32>
    tpu.vector_store %arg8[%c0_28, %c0_29], %32 {strides = array<i32>} : memref<8x4xf32, #tpu.memory_space<vmem>>, vector<8x1xf32>,
    %53 = vector.extract_strided_slice %20 {offsets = [0, 32], sizes = [8, 32], strides = [1, 1]} : vector<8x128xbf16> to vector<8x32xbf16>
    %54 = vector.extract_strided_slice %22 {offsets = [0, 32], sizes = [8, 32], strides = [1, 1]} : vector<8x128xbf16> to vector<8x32xbf16>
    %cst_30 = arith.constant dense<0.000000e+00> : vector<8x8xf32>
    %55 = tpu.matmul %53, %54, %cst_30 {dimension_numbers = #tpu.dot_dimension_numbers<[1], [1], [0], [0], [0, 0, 1, 0], [], []>} : vector<8x32xbf16>, vector<8x32xbf16>, vector<8x8xf32> -> vector<8x8xf32>
    %56 = arith.addf %55, %18 : vector<8x8xf32>
    %c0_31 = arith.constant 0 : index
    %c1 = arith.constant 1 : index
    %57 = vector.load %arg8[%c0_31, %c1] : memref<8x4xf32, #tpu.memory_space<vmem>>, vector<8x1xf32>
    %cst_32 = arith.constant dense<0xFF800000> : vector<8xf32>
    %58 = vector.multi_reduction <maximumf>, %56, %cst_32 [1] : vector<8x8xf32> to vector<8xf32>
    %59 = vector.shape_cast %58 : vector<8xf32> to vector<8x1xf32>
    %60 = arith.maximumf %57, %59 : vector<8x1xf32>
    %61 = arith.subf %57, %60 : vector<8x1xf32>
    %62 = math.exp %61 : vector<8x1xf32>
    %63 = vector.broadcast %60 : vector<8x1xf32> to vector<8x8xf32>
    %64 = arith.subf %56, %63 : vector<8x8xf32>
    %65 = math.exp %64 : vector<8x8xf32>
    %c0_33 = arith.constant 0 : index
    %c1_34 = arith.constant 1 : index
    %66 = vector.load %arg9[%c0_33, %c1_34] : memref<8x4xf32, #tpu.memory_space<vmem>>, vector<8x1xf32>
    %67 = arith.mulf %62, %66 : vector<8x1xf32>
    %cst_35 = arith.constant dense<0.000000e+00> : vector<8xf32>
    %68 = vector.multi_reduction <add>, %65, %cst_35 [1] : vector<8x8xf32> to vector<8xf32>
    %69 = vector.shape_cast %68 : vector<8xf32> to vector<8x1xf32>
    %70 = arith.addf %67, %69 : vector<8x1xf32>
    %c0_36 = arith.constant 0 : index
    %c1_37 = arith.constant 1 : index
    %71 = vector.load %arg9[%c0_36, %c1_37] : memref<8x4xf32, #tpu.memory_space<vmem>>, vector<8x1xf32>
    tpu.vector_store %arg9[%c0_36, %c1_37], %70 {strides = array<i32>} : memref<8x4xf32, #tpu.memory_space<vmem>>, vector<8x1xf32>,
    %c0_38 = arith.constant 0 : index
    %c32 = arith.constant 32 : index
    %72 = vector.load %arg10[%c0_38, %c32] : memref<8x128xf32, #tpu.memory_space<vmem>>, vector<8x32xf32>
    %73 = vector.broadcast %62 : vector<8x1xf32> to vector<8x32xf32>
    %74 = arith.mulf %73, %72 : vector<8x32xf32>
    %75 = arith.truncf %65 : vector<8x8xf32> to vector<8x8xbf16>
    %76 = vector.extract_strided_slice %24 {offsets = [0, 32], sizes = [8, 32], strides = [1, 1]} : vector<8x128xbf16> to vector<8x32xbf16>
    %cst_39 = arith.constant dense<0.000000e+00> : vector<8x32xf32>
    %77 = tpu.matmul %75, %76, %cst_39 {dimension_numbers = #tpu.dot_dimension_numbers<[1], [0], [0], [1], [0, 0, 1, 1], [], []>} : vector<8x8xbf16>, vector<8x32xbf16>, vector<8x32xf32> -> vector<8x32xf32>
    %78 = arith.addf %74, %77 : vector<8x32xf32>
    %c0_40 = arith.constant 0 : index
    %c32_41 = arith.constant 32 : index
    %79 = vector.load %arg10[%c0_40, %c32_41] : memref<8x128xf32, #tpu.memory_space<vmem>>, vector<8x32xf32>
    tpu.vector_store %arg10[%c0_40, %c32_41], %78 {strides = array<i32>} : memref<8x128xf32, #tpu.memory_space<vmem>>, vector<8x32xf32>,
    %c0_42 = arith.constant 0 : index
    %c1_43 = arith.constant 1 : index
    %80 = vector.load %arg8[%c0_42, %c1_43] : memref<8x4xf32, #tpu.memory_space<vmem>>, vector<8x1xf32>
    tpu.vector_store %arg8[%c0_42, %c1_43], %60 {strides = array<i32>} : memref<8x4xf32, #tpu.memory_space<vmem>>, vector<8x1xf32>,
    %81 = vector.extract_strided_slice %20 {offsets = [0, 64], sizes = [8, 32], strides = [1, 1]} : vector<8x128xbf16> to vector<8x32xbf16>
    %82 = vector.extract_strided_slice %22 {offsets = [0, 64], sizes = [8, 32], strides = [1, 1]} : vector<8x128xbf16> to vector<8x32xbf16>
    %cst_44 = arith.constant dense<0.000000e+00> : vector<8x8xf32>
    %83 = tpu.matmul %81, %82, %cst_44 {dimension_numbers = #tpu.dot_dimension_numbers<[1], [1], [0], [0], [0, 0, 1, 0], [], []>} : vector<8x32xbf16>, vector<8x32xbf16>, vector<8x8xf32> -> vector<8x8xf32>
    %84 = arith.addf %83, %18 : vector<8x8xf32>
    %c0_45 = arith.constant 0 : index
    %c2 = arith.constant 2 : index
    %85 = vector.load %arg8[%c0_45, %c2] : memref<8x4xf32, #tpu.memory_space<vmem>>, vector<8x1xf32>
    %cst_46 = arith.constant dense<0xFF800000> : vector<8xf32>
    %86 = vector.multi_reduction <maximumf>, %84, %cst_46 [1] : vector<8x8xf32> to vector<8xf32>
    %87 = vector.shape_cast %86 : vector<8xf32> to vector<8x1xf32>
    %88 = arith.maximumf %85, %87 : vector<8x1xf32>
    %89 = arith.subf %85, %88 : vector<8x1xf32>
    %90 = math.exp %89 : vector<8x1xf32>
    %91 = vector.broadcast %88 : vector<8x1xf32> to vector<8x8xf32>
    %92 = arith.subf %84, %91 : vector<8x8xf32>
    %93 = math.exp %92 : vector<8x8xf32>
    %c0_47 = arith.constant 0 : index
    %c2_48 = arith.constant 2 : index
    %94 = vector.load %arg9[%c0_47, %c2_48] : memref<8x4xf32, #tpu.memory_space<vmem>>, vector<8x1xf32>
    %95 = arith.mulf %90, %94 : vector<8x1xf32>
    %cst_49 = arith.constant dense<0.000000e+00> : vector<8xf32>
    %96 = vector.multi_reduction <add>, %93, %cst_49 [1] : vector<8x8xf32> to vector<8xf32>
    %97 = vector.shape_cast %96 : vector<8xf32> to vector<8x1xf32>
    %98 = arith.addf %95, %97 : vector<8x1xf32>
    %c0_50 = arith.constant 0 : index
    %c2_51 = arith.constant 2 : index
    %99 = vector.load %arg9[%c0_50, %c2_51] : memref<8x4xf32, #tpu.memory_space<vmem>>, vector<8x1xf32>
    tpu.vector_store %arg9[%c0_50, %c2_51], %98 {strides = array<i32>} : memref<8x4xf32, #tpu.memory_space<vmem>>, vector<8x1xf32>,
    %c0_52 = arith.constant 0 : index
    %c64 = arith.constant 64 : index
    %100 = vector.load %arg10[%c0_52, %c64] : memref<8x128xf32, #tpu.memory_space<vmem>>, vector<8x32xf32>
    %101 = vector.broadcast %90 : vector<8x1xf32> to vector<8x32xf32>
    %102 = arith.mulf %101, %100 : vector<8x32xf32>
    %103 = arith.truncf %93 : vector<8x8xf32> to vector<8x8xbf16>
    %104 = vector.extract_strided_slice %24 {offsets = [0, 64], sizes = [8, 32], strides = [1, 1]} : vector<8x128xbf16> to vector<8x32xbf16>
    %cst_53 = arith.constant dense<0.000000e+00> : vector<8x32xf32>
    %105 = tpu.matmul %103, %104, %cst_53 {dimension_numbers = #tpu.dot_dimension_numbers<[1], [0], [0], [1], [0, 0, 1, 1], [], []>} : vector<8x8xbf16>, vector<8x32xbf16>, vector<8x32xf32> -> vector<8x32xf32>
    %106 = arith.addf %102, %105 : vector<8x32xf32>
    %c0_54 = arith.constant 0 : index
    %c64_55 = arith.constant 64 : index
    %107 = vector.load %arg10[%c0_54, %c64_55] : memref<8x128xf32, #tpu.memory_space<vmem>>, vector<8x32xf32>
    tpu.vector_store %arg10[%c0_54, %c64_55], %106 {strides = array<i32>} : memref<8x128xf32, #tpu.memory_space<vmem>>, vector<8x32xf32>,
    %c0_56 = arith.constant 0 : index
    %c2_57 = arith.constant 2 : index
    %108 = vector.load %arg8[%c0_56, %c2_57] : memref<8x4xf32, #tpu.memory_space<vmem>>, vector<8x1xf32>
    tpu.vector_store %arg8[%c0_56, %c2_57], %88 {strides = array<i32>} : memref<8x4xf32, #tpu.memory_space<vmem>>, vector<8x1xf32>,
    %109 = vector.extract_strided_slice %20 {offsets = [0, 96], sizes = [8, 32], strides = [1, 1]} : vector<8x128xbf16> to vector<8x32xbf16>
    %110 = vector.extract_strided_slice %22 {offsets = [0, 96], sizes = [8, 32], strides = [1, 1]} : vector<8x128xbf16> to vector<8x32xbf16>
    %cst_58 = arith.constant dense<0.000000e+00> : vector<8x8xf32>
    %111 = tpu.matmul %109, %110, %cst_58 {dimension_numbers = #tpu.dot_dimension_numbers<[1], [1], [0], [0], [0, 0, 1, 0], [], []>} : vector<8x32xbf16>, vector<8x32xbf16>, vector<8x8xf32> -> vector<8x8xf32>
    %112 = arith.addf %111, %18 : vector<8x8xf32>
    %c0_59 = arith.constant 0 : index
    %c3 = arith.constant 3 : index
    %113 = vector.load %arg8[%c0_59, %c3] : memref<8x4xf32, #tpu.memory_space<vmem>>, vector<8x1xf32>
    %cst_60 = arith.constant dense<0xFF800000> : vector<8xf32>
    %114 = vector.multi_reduction <maximumf>, %112, %cst_60 [1] : vector<8x8xf32> to vector<8xf32>
    %115 = vector.shape_cast %114 : vector<8xf32> to vector<8x1xf32>
    %116 = arith.maximumf %113, %115 : vector<8x1xf32>
    %117 = arith.subf %113, %116 : vector<8x1xf32>
    %118 = math.exp %117 : vector<8x1xf32>
    %119 = vector.broadcast %116 : vector<8x1xf32> to vector<8x8xf32>
    %120 = arith.subf %112, %119 : vector<8x8xf32>
    %121 = math.exp %120 : vector<8x8xf32>
    %c0_61 = arith.constant 0 : index
    %c3_62 = arith.constant 3 : index
    %122 = vector.load %arg9[%c0_61, %c3_62] : memref<8x4xf32, #tpu.memory_space<vmem>>, vector<8x1xf32>
    %123 = arith.mulf %118, %122 : vector<8x1xf32>
    %cst_63 = arith.constant dense<0.000000e+00> : vector<8xf32>
    %124 = vector.multi_reduction <add>, %121, %cst_63 [1] : vector<8x8xf32> to vector<8xf32>
    %125 = vector.shape_cast %124 : vector<8xf32> to vector<8x1xf32>
    %126 = arith.addf %123, %125 : vector<8x1xf32>
    %c0_64 = arith.constant 0 : index
    %c3_65 = arith.constant 3 : index
    %127 = vector.load %arg9[%c0_64, %c3_65] : memref<8x4xf32, #tpu.memory_space<vmem>>, vector<8x1xf32>
    tpu.vector_store %arg9[%c0_64, %c3_65], %126 {strides = array<i32>} : memref<8x4xf32, #tpu.memory_space<vmem>>, vector<8x1xf32>,
    %c0_66 = arith.constant 0 : index
    %c96 = arith.constant 96 : index
    %128 = vector.load %arg10[%c0_66, %c96] : memref<8x128xf32, #tpu.memory_space<vmem>>, vector<8x32xf32>
    %129 = vector.broadcast %118 : vector<8x1xf32> to vector<8x32xf32>
    %130 = arith.mulf %129, %128 : vector<8x32xf32>
    %131 = arith.truncf %121 : vector<8x8xf32> to vector<8x8xbf16>
    %132 = vector.extract_strided_slice %24 {offsets = [0, 96], sizes = [8, 32], strides = [1, 1]} : vector<8x128xbf16> to vector<8x32xbf16>
    %cst_67 = arith.constant dense<0.000000e+00> : vector<8x32xf32>
    %133 = tpu.matmul %131, %132, %cst_67 {dimension_numbers = #tpu.dot_dimension_numbers<[1], [0], [0], [1], [0, 0, 1, 1], [], []>} : vector<8x8xbf16>, vector<8x32xbf16>, vector<8x32xf32> -> vector<8x32xf32>
    %134 = arith.addf %130, %133 : vector<8x32xf32>
    %c0_68 = arith.constant 0 : index
    %c96_69 = arith.constant 96 : index
    %135 = vector.load %arg10[%c0_68, %c96_69] : memref<8x128xf32, #tpu.memory_space<vmem>>, vector<8x32xf32>
    tpu.vector_store %arg10[%c0_68, %c96_69], %134 {strides = array<i32>} : memref<8x128xf32, #tpu.memory_space<vmem>>, vector<8x32xf32>,
    %c0_70 = arith.constant 0 : index
    %c3_71 = arith.constant 3 : index
    %136 = vector.load %arg8[%c0_70, %c3_71] : memref<8x4xf32, #tpu.memory_space<vmem>>, vector<8x1xf32>
    tpu.vector_store %arg8[%c0_70, %c3_71], %116 {strides = array<i32>} : memref<8x4xf32, #tpu.memory_space<vmem>>, vector<8x1xf32>,
    %c0_i32_72 = arith.constant 0 : i32
    %137 = arith.cmpi eq, %arg2, %c0_i32_72 : i32
    %138 = arith.extui %137 : i1 to i32
    %c0_i32_73 = arith.constant 0 : i32
    %139 = arith.cmpi ne, %138, %c0_i32_73 : i32
    scf.if %139 {
      %c0_74 = arith.constant 0 : index
      %c0_75 = arith.constant 0 : index
      %140 = vector.load %arg10[%c0_74, %c0_75] : memref<8x128xf32, #tpu.memory_space<vmem>>, vector<8x32xf32>
      %c0_76 = arith.constant 0 : index
      %c0_77 = arith.constant 0 : index
      %141 = vector.load %arg9[%c0_76, %c0_77] : memref<8x4xf32, #tpu.memory_space<vmem>>, vector<8x1xf32>
      %142 = tpu.reciprocal %141 {approx = true} : vector<8x1xf32> -> vector<8x1xf32>
      %143 = vector.broadcast %142 : vector<8x1xf32> to vector<8x32xf32>
      %144 = arith.mulf %140, %143 : vector<8x32xf32>
      %c0_78 = arith.constant 0 : index
      %c0_79 = arith.constant 0 : index
      %145 = vector.load %arg10[%c0_78, %c0_79] : memref<8x128xf32, #tpu.memory_space<vmem>>, vector<8x32xf32>
      tpu.vector_store %arg10[%c0_78, %c0_79], %144 {strides = array<i32>} : memref<8x128xf32, #tpu.memory_space<vmem>>, vector<8x32xf32>,
      %c0_80 = arith.constant 0 : index
      %c32_81 = arith.constant 32 : index
      %146 = vector.load %arg10[%c0_80, %c32_81] : memref<8x128xf32, #tpu.memory_space<vmem>>, vector<8x32xf32>
      %c0_82 = arith.constant 0 : index
      %c1_83 = arith.constant 1 : index
      %147 = vector.load %arg9[%c0_82, %c1_83] : memref<8x4xf32, #tpu.memory_space<vmem>>, vector<8x1xf32>
      %148 = tpu.reciprocal %147 {approx = true} : vector<8x1xf32> -> vector<8x1xf32>
      %149 = vector.broadcast %148 : vector<8x1xf32> to vector<8x32xf32>
      %150 = arith.mulf %146, %149 : vector<8x32xf32>
      %c0_84 = arith.constant 0 : index
      %c32_85 = arith.constant 32 : index
      %151 = vector.load %arg10[%c0_84, %c32_85] : memref<8x128xf32, #tpu.memory_space<vmem>>, vector<8x32xf32>
      tpu.vector_store %arg10[%c0_84, %c32_85], %150 {strides = array<i32>} : memref<8x128xf32, #tpu.memory_space<vmem>>, vector<8x32xf32>,
      %c0_86 = arith.constant 0 : index
      %c64_87 = arith.constant 64 : index
      %152 = vector.load %arg10[%c0_86, %c64_87] : memref<8x128xf32, #tpu.memory_space<vmem>>, vector<8x32xf32>
      %c0_88 = arith.constant 0 : index
      %c2_89 = arith.constant 2 : index
      %153 = vector.load %arg9[%c0_88, %c2_89] : memref<8x4xf32, #tpu.memory_space<vmem>>, vector<8x1xf32>
      %154 = tpu.reciprocal %153 {approx = true} : vector<8x1xf32> -> vector<8x1xf32>
      %155 = vector.broadcast %154 : vector<8x1xf32> to vector<8x32xf32>
      %156 = arith.mulf %152, %155 : vector<8x32xf32>
      %c0_90 = arith.constant 0 : index
      %c64_91 = arith.constant 64 : index
      %157 = vector.load %arg10[%c0_90, %c64_91] : memref<8x128xf32, #tpu.memory_space<vmem>>, vector<8x32xf32>
      tpu.vector_store %arg10[%c0_90, %c64_91], %156 {strides = array<i32>} : memref<8x128xf32, #tpu.memory_space<vmem>>, vector<8x32xf32>,
      %c0_92 = arith.constant 0 : index
      %c96_93 = arith.constant 96 : index
      %158 = vector.load %arg10[%c0_92, %c96_93] : memref<8x128xf32, #tpu.memory_space<vmem>>, vector<8x32xf32>
      %c0_94 = arith.constant 0 : index
      %c3_95 = arith.constant 3 : index
      %159 = vector.load %arg9[%c0_94, %c3_95] : memref<8x4xf32, #tpu.memory_space<vmem>>, vector<8x1xf32>
      %160 = tpu.reciprocal %159 {approx = true} : vector<8x1xf32> -> vector<8x1xf32>
      %161 = vector.broadcast %160 : vector<8x1xf32> to vector<8x32xf32>
      %162 = arith.mulf %158, %161 : vector<8x32xf32>
      %c0_96 = arith.constant 0 : index
      %c96_97 = arith.constant 96 : index
      %163 = vector.load %arg10[%c0_96, %c96_97] : memref<8x128xf32, #tpu.memory_space<vmem>>, vector<8x32xf32>
      tpu.vector_store %arg10[%c0_96, %c96_97], %162 {strides = array<i32>} : memref<8x128xf32, #tpu.memory_space<vmem>>, vector<8x32xf32>,
      %c0_98 = arith.constant 0 : index
      %c0_99 = arith.constant 0 : index
      %164 = vector.load %arg10[%c0_98, %c0_99] : memref<8x128xf32, #tpu.memory_space<vmem>>, vector<8x128xf32>
      %165 = arith.truncf %164 : vector<8x128xf32> to vector<8x128xbf16>
      %c0_100 = arith.constant 0 : index
      %c0_101 = arith.constant 0 : index
      %c0_102 = arith.constant 0 : index
      %166 = vector.load %arg7[%c0_100, %c0_101, %c0_102] : memref<1x8x128xbf16, #tpu.memory_space<vmem>>, vector<1x8x128xbf16>
      %167 = vector.shape_cast %166 : vector<1x8x128xbf16> to vector<8x128xbf16>
      %168 = vector.shape_cast %165 : vector<8x128xbf16> to vector<1x8x128xbf16>
      tpu.vector_store %arg7[%c0_100, %c0_101, %c0_102], %168 {strides = array<i32>} : memref<1x8x128xbf16, #tpu.memory_space<vmem>>, vector<1x8x128xbf16>,
    } else {
    }
    return
  }
  func.func @transform_0(%arg0: i32, %arg1: i32, %arg2: i32) -> (i32, i32, i32) {
    %c0_i32 = arith.constant 0 : i32
    %c0_i32_0 = arith.constant 0 : i32
    return %arg0, %arg1, %c0_i32 : i32, i32, i32
  }
  func.func @transform_1(%arg0: i32, %arg1: i32, %arg2: i32) -> (i32, i32, i32) {
    %c1_i32 = arith.constant 1 : i32
    %c0_i32 = arith.constant 0 : i32
    return %arg0, %arg2, %c1_i32 : i32, i32, i32
  }
  func.func @transform_2(%arg0: i32, %arg1: i32, %arg2: i32) -> (i32, i32, i32) {
    %c2_i32 = arith.constant 2 : i32
    %c0_i32 = arith.constant 0 : i32
    return %arg0, %arg2, %c2_i32 : i32, i32, i32
  }
  func.func @transform_3(%arg0: i32, %arg1: i32, %arg2: i32) -> (i32, i32, i32) {
    %c0_i32 = arith.constant 0 : i32
    %c0_i32_0 = arith.constant 0 : i32
    return %arg0, %c0_i32, %arg2 : i32, i32, i32
  }
  func.func @transform_4(%arg0: i32, %arg1: i32, %arg2: i32) -> (i32, i32, i32) {
    %c0_i32 = arith.constant 0 : i32
    %c0_i32_0 = arith.constant 0 : i32
    return %arg0, %arg1, %c0_i32 : i32, i32, i32
  }
}

module attributes {stable_mosaic.version = 11 : i64} {
  func.func @_linear_kernel(%arg0: i32, %arg1: i32, %arg2: i32, %arg3: memref<8x128xbf16, #tpu.memory_space<vmem>>, %arg4: memref<128x128xbf16, #tpu.memory_space<vmem>>, %arg5: memref<1x128xf32, #tpu.memory_space<vmem>>, %arg6: memref<8x128xbf16, #tpu.memory_space<vmem>>, %arg7: memref<8x128xf32, #tpu.memory_space<vmem>>) attributes {dimension_semantics = [#tpu.dimension_semantics<parallel>, #tpu.dimension_semantics<parallel>, #tpu.dimension_semantics<arbitrary>], iteration_bounds = array<i64: 2, 1, 1>, scalar_prefetch = 0 : i64, scratch_operands = 1 : i64, tpu.core_type = #tpu.core_type<tc>, window_params = [{transform_indices = @transform_0, window_bounds = array<i64: 8, 128>}, {transform_indices = @transform_1, window_bounds = array<i64: 128, 128>}, {transform_indices = @transform_2, window_bounds = array<i64: 1, 128>}, {transform_indices = @transform_3, window_bounds = array<i64: 8, 128>}]} {
    %c0_i32 = arith.constant 0 : i32
    %0 = arith.cmpi eq, %arg2, %c0_i32 : i32
    %1 = arith.extui %0 : i1 to i32
    %c0_i32_0 = arith.constant 0 : i32
    %2 = arith.cmpi ne, %1, %c0_i32_0 : i32
    scf.if %2 {
      %cst_10 = arith.constant 0.000000e+00 : f32
      %12 = vector.broadcast %cst_10 : f32 to vector<8x128xf32>
      %c0_11 = arith.constant 0 : index
      %c0_12 = arith.constant 0 : index
      %13 = vector.load %arg7[%c0_11, %c0_12] : memref<8x128xf32, #tpu.memory_space<vmem>>, vector<8x128xf32>
      tpu.vector_store %arg7[%c0_11, %c0_12], %12 {strides = array<i32>} : memref<8x128xf32, #tpu.memory_space<vmem>>, vector<8x128xf32>,
    } else {
    }
    %c0 = arith.constant 0 : index
    %c0_1 = arith.constant 0 : index
    %3 = vector.load %arg7[%c0, %c0_1] : memref<8x128xf32, #tpu.memory_space<vmem>>, vector<8x128xf32>
    %c0_2 = arith.constant 0 : index
    %c0_3 = arith.constant 0 : index
    %4 = vector.load %arg3[%c0_2, %c0_3] : memref<8x128xbf16, #tpu.memory_space<vmem>>, vector<8x128xbf16>
    %c0_4 = arith.constant 0 : index
    %c0_5 = arith.constant 0 : index
    %5 = vector.load %arg4[%c0_4, %c0_5] : memref<128x128xbf16, #tpu.memory_space<vmem>>, vector<128x128xbf16>
    %cst = arith.constant dense<0.000000e+00> : vector<8x128xf32>
    %6 = tpu.matmul %4, %5, %cst {dimension_numbers = #tpu.dot_dimension_numbers<[1], [0], [0], [1], [0, 0, 1, 1], [], []>} : vector<8x128xbf16>, vector<128x128xbf16>, vector<8x128xf32> -> vector<8x128xf32>
    %7 = arith.addf %3, %6 : vector<8x128xf32>
    %c0_6 = arith.constant 0 : index
    %c0_7 = arith.constant 0 : index
    %8 = vector.load %arg7[%c0_6, %c0_7] : memref<8x128xf32, #tpu.memory_space<vmem>>, vector<8x128xf32>
    tpu.vector_store %arg7[%c0_6, %c0_7], %7 {strides = array<i32>} : memref<8x128xf32, #tpu.memory_space<vmem>>, vector<8x128xf32>,
    %c0_i32_8 = arith.constant 0 : i32
    %9 = arith.cmpi eq, %arg2, %c0_i32_8 : i32
    %10 = arith.extui %9 : i1 to i32
    %c0_i32_9 = arith.constant 0 : i32
    %11 = arith.cmpi ne, %10, %c0_i32_9 : i32
    scf.if %11 {
      %c0_10 = arith.constant 0 : index
      %c0_11 = arith.constant 0 : index
      %12 = vector.load %arg7[%c0_10, %c0_11] : memref<8x128xf32, #tpu.memory_space<vmem>>, vector<8x128xf32>
      %c0_12 = arith.constant 0 : index
      %c0_13 = arith.constant 0 : index
      %13 = vector.load %arg5[%c0_12, %c0_13] : memref<1x128xf32, #tpu.memory_space<vmem>>, vector<1x128xf32>
      %14 = vector.broadcast %13 : vector<1x128xf32> to vector<8x128xf32>
      %15 = arith.addf %12, %14 : vector<8x128xf32>
      %16 = arith.truncf %15 : vector<8x128xf32> to vector<8x128xbf16>
      %c0_14 = arith.constant 0 : index
      %c0_15 = arith.constant 0 : index
      %17 = vector.load %arg6[%c0_14, %c0_15] : memref<8x128xbf16, #tpu.memory_space<vmem>>, vector<8x128xbf16>
      tpu.vector_store %arg6[%c0_14, %c0_15], %16 {strides = array<i32>} : memref<8x128xbf16, #tpu.memory_space<vmem>>, vector<8x128xbf16>,
    } else {
    }
    return
  }
  func.func @transform_0(%arg0: i32, %arg1: i32, %arg2: i32) -> (i32, i32) {
    %c0_i32 = arith.constant 0 : i32
    return %arg0, %arg2 : i32, i32
  }
  func.func @transform_1(%arg0: i32, %arg1: i32, %arg2: i32) -> (i32, i32) {
    %c0_i32 = arith.constant 0 : i32
    return %arg2, %arg1 : i32, i32
  }
  func.func @transform_2(%arg0: i32, %arg1: i32, %arg2: i32) -> (i32, i32) {
    %c0_i32 = arith.constant 0 : i32
    %c0_i32_0 = arith.constant 0 : i32
    return %c0_i32, %arg1 : i32, i32
  }
  func.func @transform_3(%arg0: i32, %arg1: i32, %arg2: i32) -> (i32, i32) {
    %c0_i32 = arith.constant 0 : i32
    return %arg0, %arg1 : i32, i32
  }
}

module attributes {stable_mosaic.version = 11 : i64} {
  func.func @_ffn_kernel(%arg0: i32, %arg1: memref<8x128xbf16, #tpu.memory_space<vmem>>, %arg2: memref<128x256xbf16, #tpu.memory_space<vmem>>, %arg3: memref<1x256xf32, #tpu.memory_space<vmem>>, %arg4: memref<256x128xbf16, #tpu.memory_space<vmem>>, %arg5: memref<1x128xf32, #tpu.memory_space<vmem>>, %arg6: memref<8x128xbf16, #tpu.memory_space<vmem>>) attributes {dimension_semantics = [#tpu.dimension_semantics<parallel>], iteration_bounds = array<i64: 2>, scalar_prefetch = 0 : i64, scratch_operands = 0 : i64, tpu.core_type = #tpu.core_type<tc>, window_params = [{transform_indices = @transform_0, window_bounds = array<i64: 8, 128>}, {pipeline_mode = #tpu.pipeline_mode<synchronous>, transform_indices = @transform_1, window_bounds = array<i64: 128, 256>}, {pipeline_mode = #tpu.pipeline_mode<synchronous>, transform_indices = @transform_2, window_bounds = array<i64: 1, 256>}, {pipeline_mode = #tpu.pipeline_mode<synchronous>, transform_indices = @transform_3, window_bounds = array<i64: 256, 128>}, {pipeline_mode = #tpu.pipeline_mode<synchronous>, transform_indices = @transform_4, window_bounds = array<i64: 1, 128>}, {transform_indices = @transform_5, window_bounds = array<i64: 8, 128>}]} {
    %c0 = arith.constant 0 : index
    %c0_0 = arith.constant 0 : index
    %0 = vector.load %arg1[%c0, %c0_0] : memref<8x128xbf16, #tpu.memory_space<vmem>>, vector<8x128xbf16>
    %c0_1 = arith.constant 0 : index
    %c0_2 = arith.constant 0 : index
    %1 = vector.load %arg2[%c0_1, %c0_2] : memref<128x256xbf16, #tpu.memory_space<vmem>>, vector<128x256xbf16>
    %cst = arith.constant dense<0.000000e+00> : vector<8x256xf32>
    %2 = tpu.matmul %0, %1, %cst {dimension_numbers = #tpu.dot_dimension_numbers<[1], [0], [0], [1], [0, 0, 1, 1], [], []>} : vector<8x128xbf16>, vector<128x256xbf16>, vector<8x256xf32> -> vector<8x256xf32>
    %c0_3 = arith.constant 0 : index
    %c0_4 = arith.constant 0 : index
    %3 = vector.load %arg3[%c0_3, %c0_4] : memref<1x256xf32, #tpu.memory_space<vmem>>, vector<1x256xf32>
    %4 = vector.broadcast %3 : vector<1x256xf32> to vector<8x256xf32>
    %5 = arith.addf %2, %4 : vector<8x256xf32>
    %cst_5 = arith.constant 0.000000e+00 : f32
    %6 = vector.broadcast %cst_5 : f32 to vector<8x256xf32>
    %7 = arith.maximumf %5, %6 : vector<8x256xf32>
    %8 = arith.truncf %7 : vector<8x256xf32> to vector<8x256xbf16>
    %c0_6 = arith.constant 0 : index
    %c0_7 = arith.constant 0 : index
    %9 = vector.load %arg4[%c0_6, %c0_7] : memref<256x128xbf16, #tpu.memory_space<vmem>>, vector<256x128xbf16>
    %cst_8 = arith.constant dense<0.000000e+00> : vector<8x128xf32>
    %10 = tpu.matmul %8, %9, %cst_8 {dimension_numbers = #tpu.dot_dimension_numbers<[1], [0], [0], [1], [0, 0, 1, 1], [], []>} : vector<8x256xbf16>, vector<256x128xbf16>, vector<8x128xf32> -> vector<8x128xf32>
    %c0_9 = arith.constant 0 : index
    %c0_10 = arith.constant 0 : index
    %11 = vector.load %arg5[%c0_9, %c0_10] : memref<1x128xf32, #tpu.memory_space<vmem>>, vector<1x128xf32>
    %12 = vector.broadcast %11 : vector<1x128xf32> to vector<8x128xf32>
    %13 = arith.addf %10, %12 : vector<8x128xf32>
    %14 = arith.truncf %13 : vector<8x128xf32> to vector<8x128xbf16>
    %c0_11 = arith.constant 0 : index
    %c0_12 = arith.constant 0 : index
    %15 = vector.load %arg6[%c0_11, %c0_12] : memref<8x128xbf16, #tpu.memory_space<vmem>>, vector<8x128xbf16>
    tpu.vector_store %arg6[%c0_11, %c0_12], %14 {strides = array<i32>} : memref<8x128xbf16, #tpu.memory_space<vmem>>, vector<8x128xbf16>,
    return
  }
  func.func @transform_0(%arg0: i32) -> (i32, i32) {
    %c0_i32 = arith.constant 0 : i32
    %c0_i32_0 = arith.constant 0 : i32
    return %arg0, %c0_i32 : i32, i32
  }
  func.func @transform_1(%arg0: i32) -> (i32, i32) {
    %c0_i32 = arith.constant 0 : i32
    %c0_i32_0 = arith.constant 0 : i32
    %c0_i32_1 = arith.constant 0 : i32
    return %c0_i32, %c0_i32_0 : i32, i32
  }
  func.func @transform_2(%arg0: i32) -> (i32, i32) {
    %c0_i32 = arith.constant 0 : i32
    %c0_i32_0 = arith.constant 0 : i32
    %c0_i32_1 = arith.constant 0 : i32
    return %c0_i32, %c0_i32_0 : i32, i32
  }
  func.func @transform_3(%arg0: i32) -> (i32, i32) {
    %c0_i32 = arith.constant 0 : i32
    %c0_i32_0 = arith.constant 0 : i32
    %c0_i32_1 = arith.constant 0 : i32
    return %c0_i32, %c0_i32_0 : i32, i32
  }
  func.func @transform_4(%arg0: i32) -> (i32, i32) {
    %c0_i32 = arith.constant 0 : i32
    %c0_i32_0 = arith.constant 0 : i32
    %c0_i32_1 = arith.constant 0 : i32
    return %c0_i32, %c0_i32_0 : i32, i32
  }
  func.func @transform_5(%arg0: i32) -> (i32, i32) {
    %c0_i32 = arith.constant 0 : i32
    %c0_i32_0 = arith.constant 0 : i32
    return %arg0, %c0_i32 : i32, i32
  }
}

module attributes {stable_mosaic.version = 11 : i64} {
  func.func @_attn_kernel(%arg0: i32, %arg1: i32, %arg2: i32, %arg3: memref<1x8x128xbf16, #tpu.memory_space<vmem>>, %arg4: memref<1x8x128xbf16, #tpu.memory_space<vmem>>, %arg5: memref<1x8x128xbf16, #tpu.memory_space<vmem>>, %arg6: memref<1x1x8xf32, #tpu.memory_space<vmem>>, %arg7: memref<1x8x128xbf16, #tpu.memory_space<vmem>>, %arg8: memref<8x4xf32, #tpu.memory_space<vmem>>, %arg9: memref<8x4xf32, #tpu.memory_space<vmem>>, %arg10: memref<8x128xf32, #tpu.memory_space<vmem>>) attributes {dimension_semantics = [#tpu.dimension_semantics<parallel>, #tpu.dimension_semantics<parallel>, #tpu.dimension_semantics<arbitrary>], iteration_bounds = array<i64: 2, 1, 1>, scalar_prefetch = 0 : i64, scratch_operands = 3 : i64, tpu.core_type = #tpu.core_type<tc>, window_params = [{transform_indices = @transform_0, window_bounds = array<i64: 1, 8, 128>}, {transform_indices = @transform_1, window_bounds = array<i64: 1, 8, 128>}, {transform_indices = @transform_2, window_bounds = array<i64: 1, 8, 128>}, {transform_indices = @transform_3, window_bounds = array<i64: 1, 1, 8>}, {transform_indices = @transform_4, window_bounds = array<i64: 1, 8, 128>}]} {
    %c0_i32 = arith.constant 0 : i32
    %0 = arith.cmpi eq, %arg2, %c0_i32 : i32
    %1 = arith.extui %0 : i1 to i32
    %c0_i32_0 = arith.constant 0 : i32
    %2 = arith.cmpi ne, %1, %c0_i32_0 : i32
    scf.if %2 {
      %cst_71 = arith.constant -1.000000e+30 : f32
      %130 = vector.broadcast %cst_71 : f32 to vector<8x4xf32>
      %c0_72 = arith.constant 0 : index
      %c0_73 = arith.constant 0 : index
      %131 = vector.load %arg8[%c0_72, %c0_73] : memref<8x4xf32, #tpu.memory_space<vmem>>, vector<8x4xf32>
      tpu.vector_store %arg8[%c0_72, %c0_73], %130 {strides = array<i32>} : memref<8x4xf32, #tpu.memory_space<vmem>>, vector<8x4xf32>,
      %cst_74 = arith.constant 0.000000e+00 : f32
      %132 = vector.broadcast %cst_74 : f32 to vector<8x4xf32>
      %c0_75 = arith.constant 0 : index
      %c0_76 = arith.constant 0 : index
      %133 = vector.load %arg9[%c0_75, %c0_76] : memref<8x4xf32, #tpu.memory_space<vmem>>, vector<8x4xf32>
      tpu.vector_store %arg9[%c0_75, %c0_76], %132 {strides = array<i32>} : memref<8x4xf32, #tpu.memory_space<vmem>>, vector<8x4xf32>,
      %cst_77 = arith.constant 0.000000e+00 : f32
      %134 = vector.broadcast %cst_77 : f32 to vector<8x128xf32>
      %c0_78 = arith.constant 0 : index
      %c0_79 = arith.constant 0 : index
      %135 = vector.load %arg10[%c0_78, %c0_79] : memref<8x128xf32, #tpu.memory_space<vmem>>, vector<8x128xf32>
      tpu.vector_store %arg10[%c0_78, %c0_79], %134 {strides = array<i32>} : memref<8x128xf32, #tpu.memory_space<vmem>>, vector<8x128xf32>,
    } else {
    }
    %c0 = arith.constant 0 : index
    %c0_1 = arith.constant 0 : index
    %c0_2 = arith.constant 0 : index
    %3 = vector.load %arg6[%c0, %c0_1, %c0_2] : memref<1x1x8xf32, #tpu.memory_space<vmem>>, vector<1x1x8xf32>
    %4 = vector.shape_cast %3 : vector<1x1x8xf32> to vector<1x8xf32>
    %c0_3 = arith.constant 0 : index
    %c0_4 = arith.constant 0 : index
    %c0_5 = arith.constant 0 : index
    %5 = vector.load %arg3[%c0_3, %c0_4, %c0_5] : memref<1x8x128xbf16, #tpu.memory_space<vmem>>, vector<1x8x128xbf16>
    %6 = vector.shape_cast %5 : vector<1x8x128xbf16> to vector<8x128xbf16>
    %c0_6 = arith.constant 0 : index
    %c0_7 = arith.constant 0 : index
    %c0_8 = arith.constant 0 : index
    %7 = vector.load %arg4[%c0_6, %c0_7, %c0_8] : memref<1x8x128xbf16, #tpu.memory_space<vmem>>, vector<1x8x128xbf16>
    %8 = vector.shape_cast %7 : vector<1x8x128xbf16> to vector<8x128xbf16>
    %c0_9 = arith.constant 0 : index
    %c0_10 = arith.constant 0 : index
    %c0_11 = arith.constant 0 : index
    %9 = vector.load %arg5[%c0_9, %c0_10, %c0_11] : memref<1x8x128xbf16, #tpu.memory_space<vmem>>, vector<1x8x128xbf16>
    %10 = vector.shape_cast %9 : vector<1x8x128xbf16> to vector<8x128xbf16>
    %11 = vector.extract_strided_slice %6 {offsets = [0, 0], sizes = [8, 32], strides = [1, 1]} : vector<8x128xbf16> to vector<8x32xbf16>
    %12 = vector.extract_strided_slice %8 {offsets = [0, 0], sizes = [8, 32], strides = [1, 1]} : vector<8x128xbf16> to vector<8x32xbf16>
    %cst = arith.constant dense<0.000000e+00> : vector<8x8xf32>
    %13 = tpu.matmul %11, %12, %cst {dimension_numbers = #tpu.dot_dimension_numbers<[1], [1], [0], [0], [0, 0, 1, 0], [], []>} : vector<8x32xbf16>, vector<8x32xbf16>, vector<8x8xf32> -> vector<8x8xf32>
    %14 = vector.broadcast %4 : vector<1x8xf32> to vector<8x8xf32>
    %15 = arith.addf %13, %14 : vector<8x8xf32>
    %c0_12 = arith.constant 0 : index
    %c0_13 = arith.constant 0 : index
    %16 = vector.load %arg8[%c0_12, %c0_13] : memref<8x4xf32, #tpu.memory_space<vmem>>, vector<8x1xf32>
    %cst_14 = arith.constant dense<0xFF800000> : vector<8xf32>
    %17 = vector.multi_reduction <maximumf>, %15, %cst_14 [1] : vector<8x8xf32> to vector<8xf32>
    %18 = vector.shape_cast %17 : vector<8xf32> to vector<8x1xf32>
    %19 = arith.maximumf %16, %18 : vector<8x1xf32>
    %20 = arith.subf %16, %19 : vector<8x1xf32>
    %21 = math.exp %20 : vector<8x1xf32>
    %22 = vector.broadcast %19 : vector<8x1xf32> to vector<8x8xf32>
    %23 = arith.subf %15, %22 : vector<8x8xf32>
    %24 = math.exp %23 : vector<8x8xf32>
    %c0_15 = arith.constant 0 : index
    %c0_16 = arith.constant 0 : index
    %25 = vector.load %arg9[%c0_15, %c0_16] : memref<8x4xf32, #tpu.memory_space<vmem>>, vector<8x1xf32>
    %26 = arith.mulf %21, %25 : vector<8x1xf32>
    %cst_17 = arith.constant dense<0.000000e+00> : vector<8xf32>
    %27 = vector.multi_reduction <add>, %24, %cst_17 [1] : vector<8x8xf32> to vector<8xf32>
    %28 = vector.shape_cast %27 : vector<8xf32> to vector<8x1xf32>
    %29 = arith.addf %26, %28 : vector<8x1xf32>
    %c0_18 = arith.constant 0 : index
    %c0_19 = arith.constant 0 : index
    %30 = vector.load %arg9[%c0_18, %c0_19] : memref<8x4xf32, #tpu.memory_space<vmem>>, vector<8x1xf32>
    tpu.vector_store %arg9[%c0_18, %c0_19], %29 {strides = array<i32>} : memref<8x4xf32, #tpu.memory_space<vmem>>, vector<8x1xf32>,
    %c0_20 = arith.constant 0 : index
    %c0_21 = arith.constant 0 : index
    %31 = vector.load %arg10[%c0_20, %c0_21] : memref<8x128xf32, #tpu.memory_space<vmem>>, vector<8x32xf32>
    %32 = vector.broadcast %21 : vector<8x1xf32> to vector<8x32xf32>
    %33 = arith.mulf %32, %31 : vector<8x32xf32>
    %34 = arith.truncf %24 : vector<8x8xf32> to vector<8x8xbf16>
    %35 = vector.extract_strided_slice %10 {offsets = [0, 0], sizes = [8, 32], strides = [1, 1]} : vector<8x128xbf16> to vector<8x32xbf16>
    %cst_22 = arith.constant dense<0.000000e+00> : vector<8x32xf32>
    %36 = tpu.matmul %34, %35, %cst_22 {dimension_numbers = #tpu.dot_dimension_numbers<[1], [0], [0], [1], [0, 0, 1, 1], [], []>} : vector<8x8xbf16>, vector<8x32xbf16>, vector<8x32xf32> -> vector<8x32xf32>
    %37 = arith.addf %33, %36 : vector<8x32xf32>
    %c0_23 = arith.constant 0 : index
    %c0_24 = arith.constant 0 : index
    %38 = vector.load %arg10[%c0_23, %c0_24] : memref<8x128xf32, #tpu.memory_space<vmem>>, vector<8x32xf32>
    tpu.vector_store %arg10[%c0_23, %c0_24], %37 {strides = array<i32>} : memref<8x128xf32, #tpu.memory_space<vmem>>, vector<8x32xf32>,
    %c0_25 = arith.constant 0 : index
    %c0_26 = arith.constant 0 : index
    %39 = vector.load %arg8[%c0_25, %c0_26] : memref<8x4xf32, #tpu.memory_space<vmem>>, vector<8x1xf32>
    tpu.vector_store %arg8[%c0_25, %c0_26], %19 {strides = array<i32>} : memref<8x4xf32, #tpu.memory_space<vmem>>, vector<8x1xf32>,
    %40 = vector.extract_strided_slice %6 {offsets = [0, 32], sizes = [8, 32], strides = [1, 1]} : vector<8x128xbf16> to vector<8x32xbf16>
    %41 = vector.extract_strided_slice %8 {offsets = [0, 32], sizes = [8, 32], strides = [1, 1]} : vector<8x128xbf16> to vector<8x32xbf16>
    %cst_27 = arith.constant dense<0.000000e+00> : vector<8x8xf32>
    %42 = tpu.matmul %40, %41, %cst_27 {dimension_numbers = #tpu.dot_dimension_numbers<[1], [1], [0], [0], [0, 0, 1, 0], [], []>} : vector<8x32xbf16>, vector<8x32xbf16>, vector<8x8xf32> -> vector<8x8xf32>
    %43 = vector.broadcast %4 : vector<1x8xf32> to vector<8x8xf32>
    %44 = arith.addf %42, %43 : vector<8x8xf32>
    %c0_28 = arith.constant 0 : index
    %c1 = arith.constant 1 : index
    %45 = vector.load %arg8[%c0_28, %c1] : memref<8x4xf32, #tpu.memory_space<vmem>>, vector<8x1xf32>
    %cst_29 = arith.constant dense<0xFF800000> : vector<8xf32>
    %46 = vector.multi_reduction <maximumf>, %44, %cst_29 [1] : vector<8x8xf32> to vector<8xf32>
    %47 = vector.shape_cast %46 : vector<8xf32> to vector<8x1xf32>
    %48 = arith.maximumf %45, %47 : vector<8x1xf32>
    %49 = arith.subf %45, %48 : vector<8x1xf32>
    %50 = math.exp %49 : vector<8x1xf32>
    %51 = vector.broadcast %48 : vector<8x1xf32> to vector<8x8xf32>
    %52 = arith.subf %44, %51 : vector<8x8xf32>
    %53 = math.exp %52 : vector<8x8xf32>
    %c0_30 = arith.constant 0 : index
    %c1_31 = arith.constant 1 : index
    %54 = vector.load %arg9[%c0_30, %c1_31] : memref<8x4xf32, #tpu.memory_space<vmem>>, vector<8x1xf32>
    %55 = arith.mulf %50, %54 : vector<8x1xf32>
    %cst_32 = arith.constant dense<0.000000e+00> : vector<8xf32>
    %56 = vector.multi_reduction <add>, %53, %cst_32 [1] : vector<8x8xf32> to vector<8xf32>
    %57 = vector.shape_cast %56 : vector<8xf32> to vector<8x1xf32>
    %58 = arith.addf %55, %57 : vector<8x1xf32>
    %c0_33 = arith.constant 0 : index
    %c1_34 = arith.constant 1 : index
    %59 = vector.load %arg9[%c0_33, %c1_34] : memref<8x4xf32, #tpu.memory_space<vmem>>, vector<8x1xf32>
    tpu.vector_store %arg9[%c0_33, %c1_34], %58 {strides = array<i32>} : memref<8x4xf32, #tpu.memory_space<vmem>>, vector<8x1xf32>,
    %c0_35 = arith.constant 0 : index
    %c32 = arith.constant 32 : index
    %60 = vector.load %arg10[%c0_35, %c32] : memref<8x128xf32, #tpu.memory_space<vmem>>, vector<8x32xf32>
    %61 = vector.broadcast %50 : vector<8x1xf32> to vector<8x32xf32>
    %62 = arith.mulf %61, %60 : vector<8x32xf32>
    %63 = arith.truncf %53 : vector<8x8xf32> to vector<8x8xbf16>
    %64 = vector.extract_strided_slice %10 {offsets = [0, 32], sizes = [8, 32], strides = [1, 1]} : vector<8x128xbf16> to vector<8x32xbf16>
    %cst_36 = arith.constant dense<0.000000e+00> : vector<8x32xf32>
    %65 = tpu.matmul %63, %64, %cst_36 {dimension_numbers = #tpu.dot_dimension_numbers<[1], [0], [0], [1], [0, 0, 1, 1], [], []>} : vector<8x8xbf16>, vector<8x32xbf16>, vector<8x32xf32> -> vector<8x32xf32>
    %66 = arith.addf %62, %65 : vector<8x32xf32>
    %c0_37 = arith.constant 0 : index
    %c32_38 = arith.constant 32 : index
    %67 = vector.load %arg10[%c0_37, %c32_38] : memref<8x128xf32, #tpu.memory_space<vmem>>, vector<8x32xf32>
    tpu.vector_store %arg10[%c0_37, %c32_38], %66 {strides = array<i32>} : memref<8x128xf32, #tpu.memory_space<vmem>>, vector<8x32xf32>,
    %c0_39 = arith.constant 0 : index
    %c1_40 = arith.constant 1 : index
    %68 = vector.load %arg8[%c0_39, %c1_40] : memref<8x4xf32, #tpu.memory_space<vmem>>, vector<8x1xf32>
    tpu.vector_store %arg8[%c0_39, %c1_40], %48 {strides = array<i32>} : memref<8x4xf32, #tpu.memory_space<vmem>>, vector<8x1xf32>,
    %69 = vector.extract_strided_slice %6 {offsets = [0, 64], sizes = [8, 32], strides = [1, 1]} : vector<8x128xbf16> to vector<8x32xbf16>
    %70 = vector.extract_strided_slice %8 {offsets = [0, 64], sizes = [8, 32], strides = [1, 1]} : vector<8x128xbf16> to vector<8x32xbf16>
    %cst_41 = arith.constant dense<0.000000e+00> : vector<8x8xf32>
    %71 = tpu.matmul %69, %70, %cst_41 {dimension_numbers = #tpu.dot_dimension_numbers<[1], [1], [0], [0], [0, 0, 1, 0], [], []>} : vector<8x32xbf16>, vector<8x32xbf16>, vector<8x8xf32> -> vector<8x8xf32>
    %72 = vector.broadcast %4 : vector<1x8xf32> to vector<8x8xf32>
    %73 = arith.addf %71, %72 : vector<8x8xf32>
    %c0_42 = arith.constant 0 : index
    %c2 = arith.constant 2 : index
    %74 = vector.load %arg8[%c0_42, %c2] : memref<8x4xf32, #tpu.memory_space<vmem>>, vector<8x1xf32>
    %cst_43 = arith.constant dense<0xFF800000> : vector<8xf32>
    %75 = vector.multi_reduction <maximumf>, %73, %cst_43 [1] : vector<8x8xf32> to vector<8xf32>
    %76 = vector.shape_cast %75 : vector<8xf32> to vector<8x1xf32>
    %77 = arith.maximumf %74, %76 : vector<8x1xf32>
    %78 = arith.subf %74, %77 : vector<8x1xf32>
    %79 = math.exp %78 : vector<8x1xf32>
    %80 = vector.broadcast %77 : vector<8x1xf32> to vector<8x8xf32>
    %81 = arith.subf %73, %80 : vector<8x8xf32>
    %82 = math.exp %81 : vector<8x8xf32>
    %c0_44 = arith.constant 0 : index
    %c2_45 = arith.constant 2 : index
    %83 = vector.load %arg9[%c0_44, %c2_45] : memref<8x4xf32, #tpu.memory_space<vmem>>, vector<8x1xf32>
    %84 = arith.mulf %79, %83 : vector<8x1xf32>
    %cst_46 = arith.constant dense<0.000000e+00> : vector<8xf32>
    %85 = vector.multi_reduction <add>, %82, %cst_46 [1] : vector<8x8xf32> to vector<8xf32>
    %86 = vector.shape_cast %85 : vector<8xf32> to vector<8x1xf32>
    %87 = arith.addf %84, %86 : vector<8x1xf32>
    %c0_47 = arith.constant 0 : index
    %c2_48 = arith.constant 2 : index
    %88 = vector.load %arg9[%c0_47, %c2_48] : memref<8x4xf32, #tpu.memory_space<vmem>>, vector<8x1xf32>
    tpu.vector_store %arg9[%c0_47, %c2_48], %87 {strides = array<i32>} : memref<8x4xf32, #tpu.memory_space<vmem>>, vector<8x1xf32>,
    %c0_49 = arith.constant 0 : index
    %c64 = arith.constant 64 : index
    %89 = vector.load %arg10[%c0_49, %c64] : memref<8x128xf32, #tpu.memory_space<vmem>>, vector<8x32xf32>
    %90 = vector.broadcast %79 : vector<8x1xf32> to vector<8x32xf32>
    %91 = arith.mulf %90, %89 : vector<8x32xf32>
    %92 = arith.truncf %82 : vector<8x8xf32> to vector<8x8xbf16>
    %93 = vector.extract_strided_slice %10 {offsets = [0, 64], sizes = [8, 32], strides = [1, 1]} : vector<8x128xbf16> to vector<8x32xbf16>
    %cst_50 = arith.constant dense<0.000000e+00> : vector<8x32xf32>
    %94 = tpu.matmul %92, %93, %cst_50 {dimension_numbers = #tpu.dot_dimension_numbers<[1], [0], [0], [1], [0, 0, 1, 1], [], []>} : vector<8x8xbf16>, vector<8x32xbf16>, vector<8x32xf32> -> vector<8x32xf32>
    %95 = arith.addf %91, %94 : vector<8x32xf32>
    %c0_51 = arith.constant 0 : index
    %c64_52 = arith.constant 64 : index
    %96 = vector.load %arg10[%c0_51, %c64_52] : memref<8x128xf32, #tpu.memory_space<vmem>>, vector<8x32xf32>
    tpu.vector_store %arg10[%c0_51, %c64_52], %95 {strides = array<i32>} : memref<8x128xf32, #tpu.memory_space<vmem>>, vector<8x32xf32>,
    %c0_53 = arith.constant 0 : index
    %c2_54 = arith.constant 2 : index
    %97 = vector.load %arg8[%c0_53, %c2_54] : memref<8x4xf32, #tpu.memory_space<vmem>>, vector<8x1xf32>
    tpu.vector_store %arg8[%c0_53, %c2_54], %77 {strides = array<i32>} : memref<8x4xf32, #tpu.memory_space<vmem>>, vector<8x1xf32>,
    %98 = vector.extract_strided_slice %6 {offsets = [0, 96], sizes = [8, 32], strides = [1, 1]} : vector<8x128xbf16> to vector<8x32xbf16>
    %99 = vector.extract_strided_slice %8 {offsets = [0, 96], sizes = [8, 32], strides = [1, 1]} : vector<8x128xbf16> to vector<8x32xbf16>
    %cst_55 = arith.constant dense<0.000000e+00> : vector<8x8xf32>
    %100 = tpu.matmul %98, %99, %cst_55 {dimension_numbers = #tpu.dot_dimension_numbers<[1], [1], [0], [0], [0, 0, 1, 0], [], []>} : vector<8x32xbf16>, vector<8x32xbf16>, vector<8x8xf32> -> vector<8x8xf32>
    %101 = vector.broadcast %4 : vector<1x8xf32> to vector<8x8xf32>
    %102 = arith.addf %100, %101 : vector<8x8xf32>
    %c0_56 = arith.constant 0 : index
    %c3 = arith.constant 3 : index
    %103 = vector.load %arg8[%c0_56, %c3] : memref<8x4xf32, #tpu.memory_space<vmem>>, vector<8x1xf32>
    %cst_57 = arith.constant dense<0xFF800000> : vector<8xf32>
    %104 = vector.multi_reduction <maximumf>, %102, %cst_57 [1] : vector<8x8xf32> to vector<8xf32>
    %105 = vector.shape_cast %104 : vector<8xf32> to vector<8x1xf32>
    %106 = arith.maximumf %103, %105 : vector<8x1xf32>
    %107 = arith.subf %103, %106 : vector<8x1xf32>
    %108 = math.exp %107 : vector<8x1xf32>
    %109 = vector.broadcast %106 : vector<8x1xf32> to vector<8x8xf32>
    %110 = arith.subf %102, %109 : vector<8x8xf32>
    %111 = math.exp %110 : vector<8x8xf32>
    %c0_58 = arith.constant 0 : index
    %c3_59 = arith.constant 3 : index
    %112 = vector.load %arg9[%c0_58, %c3_59] : memref<8x4xf32, #tpu.memory_space<vmem>>, vector<8x1xf32>
    %113 = arith.mulf %108, %112 : vector<8x1xf32>
    %cst_60 = arith.constant dense<0.000000e+00> : vector<8xf32>
    %114 = vector.multi_reduction <add>, %111, %cst_60 [1] : vector<8x8xf32> to vector<8xf32>
    %115 = vector.shape_cast %114 : vector<8xf32> to vector<8x1xf32>
    %116 = arith.addf %113, %115 : vector<8x1xf32>
    %c0_61 = arith.constant 0 : index
    %c3_62 = arith.constant 3 : index
    %117 = vector.load %arg9[%c0_61, %c3_62] : memref<8x4xf32, #tpu.memory_space<vmem>>, vector<8x1xf32>
    tpu.vector_store %arg9[%c0_61, %c3_62], %116 {strides = array<i32>} : memref<8x4xf32, #tpu.memory_space<vmem>>, vector<8x1xf32>,
    %c0_63 = arith.constant 0 : index
    %c96 = arith.constant 96 : index
    %118 = vector.load %arg10[%c0_63, %c96] : memref<8x128xf32, #tpu.memory_space<vmem>>, vector<8x32xf32>
    %119 = vector.broadcast %108 : vector<8x1xf32> to vector<8x32xf32>
    %120 = arith.mulf %119, %118 : vector<8x32xf32>
    %121 = arith.truncf %111 : vector<8x8xf32> to vector<8x8xbf16>
    %122 = vector.extract_strided_slice %10 {offsets = [0, 96], sizes = [8, 32], strides = [1, 1]} : vector<8x128xbf16> to vector<8x32xbf16>
    %cst_64 = arith.constant dense<0.000000e+00> : vector<8x32xf32>
    %123 = tpu.matmul %121, %122, %cst_64 {dimension_numbers = #tpu.dot_dimension_numbers<[1], [0], [0], [1], [0, 0, 1, 1], [], []>} : vector<8x8xbf16>, vector<8x32xbf16>, vector<8x32xf32> -> vector<8x32xf32>
    %124 = arith.addf %120, %123 : vector<8x32xf32>
    %c0_65 = arith.constant 0 : index
    %c96_66 = arith.constant 96 : index
    %125 = vector.load %arg10[%c0_65, %c96_66] : memref<8x128xf32, #tpu.memory_space<vmem>>, vector<8x32xf32>
    tpu.vector_store %arg10[%c0_65, %c96_66], %124 {strides = array<i32>} : memref<8x128xf32, #tpu.memory_space<vmem>>, vector<8x32xf32>,
    %c0_67 = arith.constant 0 : index
    %c3_68 = arith.constant 3 : index
    %126 = vector.load %arg8[%c0_67, %c3_68] : memref<8x4xf32, #tpu.memory_space<vmem>>, vector<8x1xf32>
    tpu.vector_store %arg8[%c0_67, %c3_68], %106 {strides = array<i32>} : memref<8x4xf32, #tpu.memory_space<vmem>>, vector<8x1xf32>,
    %c0_i32_69 = arith.constant 0 : i32
    %127 = arith.cmpi eq, %arg2, %c0_i32_69 : i32
    %128 = arith.extui %127 : i1 to i32
    %c0_i32_70 = arith.constant 0 : i32
    %129 = arith.cmpi ne, %128, %c0_i32_70 : i32
    scf.if %129 {
      %c0_71 = arith.constant 0 : index
      %c0_72 = arith.constant 0 : index
      %130 = vector.load %arg10[%c0_71, %c0_72] : memref<8x128xf32, #tpu.memory_space<vmem>>, vector<8x32xf32>
      %c0_73 = arith.constant 0 : index
      %c0_74 = arith.constant 0 : index
      %131 = vector.load %arg9[%c0_73, %c0_74] : memref<8x4xf32, #tpu.memory_space<vmem>>, vector<8x1xf32>
      %132 = tpu.reciprocal %131 {approx = true} : vector<8x1xf32> -> vector<8x1xf32>
      %133 = vector.broadcast %132 : vector<8x1xf32> to vector<8x32xf32>
      %134 = arith.mulf %130, %133 : vector<8x32xf32>
      %c0_75 = arith.constant 0 : index
      %c0_76 = arith.constant 0 : index
      %135 = vector.load %arg10[%c0_75, %c0_76] : memref<8x128xf32, #tpu.memory_space<vmem>>, vector<8x32xf32>
      tpu.vector_store %arg10[%c0_75, %c0_76], %134 {strides = array<i32>} : memref<8x128xf32, #tpu.memory_space<vmem>>, vector<8x32xf32>,
      %c0_77 = arith.constant 0 : index
      %c32_78 = arith.constant 32 : index
      %136 = vector.load %arg10[%c0_77, %c32_78] : memref<8x128xf32, #tpu.memory_space<vmem>>, vector<8x32xf32>
      %c0_79 = arith.constant 0 : index
      %c1_80 = arith.constant 1 : index
      %137 = vector.load %arg9[%c0_79, %c1_80] : memref<8x4xf32, #tpu.memory_space<vmem>>, vector<8x1xf32>
      %138 = tpu.reciprocal %137 {approx = true} : vector<8x1xf32> -> vector<8x1xf32>
      %139 = vector.broadcast %138 : vector<8x1xf32> to vector<8x32xf32>
      %140 = arith.mulf %136, %139 : vector<8x32xf32>
      %c0_81 = arith.constant 0 : index
      %c32_82 = arith.constant 32 : index
      %141 = vector.load %arg10[%c0_81, %c32_82] : memref<8x128xf32, #tpu.memory_space<vmem>>, vector<8x32xf32>
      tpu.vector_store %arg10[%c0_81, %c32_82], %140 {strides = array<i32>} : memref<8x128xf32, #tpu.memory_space<vmem>>, vector<8x32xf32>,
      %c0_83 = arith.constant 0 : index
      %c64_84 = arith.constant 64 : index
      %142 = vector.load %arg10[%c0_83, %c64_84] : memref<8x128xf32, #tpu.memory_space<vmem>>, vector<8x32xf32>
      %c0_85 = arith.constant 0 : index
      %c2_86 = arith.constant 2 : index
      %143 = vector.load %arg9[%c0_85, %c2_86] : memref<8x4xf32, #tpu.memory_space<vmem>>, vector<8x1xf32>
      %144 = tpu.reciprocal %143 {approx = true} : vector<8x1xf32> -> vector<8x1xf32>
      %145 = vector.broadcast %144 : vector<8x1xf32> to vector<8x32xf32>
      %146 = arith.mulf %142, %145 : vector<8x32xf32>
      %c0_87 = arith.constant 0 : index
      %c64_88 = arith.constant 64 : index
      %147 = vector.load %arg10[%c0_87, %c64_88] : memref<8x128xf32, #tpu.memory_space<vmem>>, vector<8x32xf32>
      tpu.vector_store %arg10[%c0_87, %c64_88], %146 {strides = array<i32>} : memref<8x128xf32, #tpu.memory_space<vmem>>, vector<8x32xf32>,
      %c0_89 = arith.constant 0 : index
      %c96_90 = arith.constant 96 : index
      %148 = vector.load %arg10[%c0_89, %c96_90] : memref<8x128xf32, #tpu.memory_space<vmem>>, vector<8x32xf32>
      %c0_91 = arith.constant 0 : index
      %c3_92 = arith.constant 3 : index
      %149 = vector.load %arg9[%c0_91, %c3_92] : memref<8x4xf32, #tpu.memory_space<vmem>>, vector<8x1xf32>
      %150 = tpu.reciprocal %149 {approx = true} : vector<8x1xf32> -> vector<8x1xf32>
      %151 = vector.broadcast %150 : vector<8x1xf32> to vector<8x32xf32>
      %152 = arith.mulf %148, %151 : vector<8x32xf32>
      %c0_93 = arith.constant 0 : index
      %c96_94 = arith.constant 96 : index
      %153 = vector.load %arg10[%c0_93, %c96_94] : memref<8x128xf32, #tpu.memory_space<vmem>>, vector<8x32xf32>
      tpu.vector_store %arg10[%c0_93, %c96_94], %152 {strides = array<i32>} : memref<8x128xf32, #tpu.memory_space<vmem>>, vector<8x32xf32>,
      %c0_95 = arith.constant 0 : index
      %c0_96 = arith.constant 0 : index
      %154 = vector.load %arg10[%c0_95, %c0_96] : memref<8x128xf32, #tpu.memory_space<vmem>>, vector<8x128xf32>
      %155 = arith.truncf %154 : vector<8x128xf32> to vector<8x128xbf16>
      %c0_97 = arith.constant 0 : index
      %c0_98 = arith.constant 0 : index
      %c0_99 = arith.constant 0 : index
      %156 = vector.load %arg7[%c0_97, %c0_98, %c0_99] : memref<1x8x128xbf16, #tpu.memory_space<vmem>>, vector<1x8x128xbf16>
      %157 = vector.shape_cast %156 : vector<1x8x128xbf16> to vector<8x128xbf16>
      %158 = vector.shape_cast %155 : vector<8x128xbf16> to vector<1x8x128xbf16>
      tpu.vector_store %arg7[%c0_97, %c0_98, %c0_99], %158 {strides = array<i32>} : memref<1x8x128xbf16, #tpu.memory_space<vmem>>, vector<1x8x128xbf16>,
    } else {
    }
    return
  }
  func.func @transform_0(%arg0: i32, %arg1: i32, %arg2: i32) -> (i32, i32, i32) {
    %c0_i32 = arith.constant 0 : i32
    %c0_i32_0 = arith.constant 0 : i32
    return %arg0, %arg1, %c0_i32 : i32, i32, i32
  }
  func.func @transform_1(%arg0: i32, %arg1: i32, %arg2: i32) -> (i32, i32, i32) {
    %c1_i32 = arith.constant 1 : i32
    %c0_i32 = arith.constant 0 : i32
    return %arg0, %arg2, %c1_i32 : i32, i32, i32
  }
  func.func @transform_2(%arg0: i32, %arg1: i32, %arg2: i32) -> (i32, i32, i32) {
    %c2_i32 = arith.constant 2 : i32
    %c0_i32 = arith.constant 0 : i32
    return %arg0, %arg2, %c2_i32 : i32, i32, i32
  }
  func.func @transform_3(%arg0: i32, %arg1: i32, %arg2: i32) -> (i32, i32, i32) {
    %c0_i32 = arith.constant 0 : i32
    %c0_i32_0 = arith.constant 0 : i32
    return %arg0, %c0_i32, %arg2 : i32, i32, i32
  }
  func.func @transform_4(%arg0: i32, %arg1: i32, %arg2: i32) -> (i32, i32, i32) {
    %c0_i32 = arith.constant 0 : i32
    %c0_i32_0 = arith.constant 0 : i32
    return %arg0, %arg1, %c0_i32 : i32, i32, i32
  }
}

module attributes {stable_mosaic.version = 11 : i64} {
  func.func @_layernorm_kernel(%arg0: i32, %arg1: memref<8x128xbf16, #tpu.memory_space<vmem>>, %arg2: memref<1x128xf32, #tpu.memory_space<vmem>>, %arg3: memref<1x128xf32, #tpu.memory_space<vmem>>, %arg4: memref<8x128xbf16, #tpu.memory_space<vmem>>) attributes {dimension_semantics = [#tpu.dimension_semantics<parallel>], iteration_bounds = array<i64: 2>, scalar_prefetch = 0 : i64, scratch_operands = 0 : i64, tpu.core_type = #tpu.core_type<tc>, window_params = [{transform_indices = @transform_0, window_bounds = array<i64: 8, 128>}, {pipeline_mode = #tpu.pipeline_mode<synchronous>, transform_indices = @transform_1, window_bounds = array<i64: 1, 128>}, {pipeline_mode = #tpu.pipeline_mode<synchronous>, transform_indices = @transform_2, window_bounds = array<i64: 1, 128>}, {transform_indices = @transform_3, window_bounds = array<i64: 8, 128>}]} {
    %c0 = arith.constant 0 : index
    %c0_0 = arith.constant 0 : index
    %0 = vector.load %arg1[%c0, %c0_0] : memref<8x128xbf16, #tpu.memory_space<vmem>>, vector<8x128xbf16>
    %1 = arith.extf %0 : vector<8x128xbf16> to vector<8x128xf32>
    %cst = arith.constant dense<0.000000e+00> : vector<8xf32>
    %2 = vector.multi_reduction <add>, %1, %cst [1] : vector<8x128xf32> to vector<8xf32>
    %3 = vector.shape_cast %2 : vector<8xf32> to vector<8x1xf32>
    %cst_1 = arith.constant 1.280000e+02 : f32
    %4 = vector.broadcast %cst_1 : f32 to vector<8x1xf32>
    %5 = arith.divf %3, %4 : vector<8x1xf32>
    %6 = vector.broadcast %5 : vector<8x1xf32> to vector<8x128xf32>
    %7 = arith.subf %1, %6 : vector<8x128xf32>
    %8 = arith.mulf %7, %7 : vector<8x128xf32>
    %cst_2 = arith.constant dense<0.000000e+00> : vector<8xf32>
    %9 = vector.multi_reduction <add>, %8, %cst_2 [1] : vector<8x128xf32> to vector<8xf32>
    %10 = vector.shape_cast %9 : vector<8xf32> to vector<8x1xf32>
    %cst_3 = arith.constant 1.280000e+02 : f32
    %11 = vector.broadcast %cst_3 : f32 to vector<8x1xf32>
    %12 = arith.divf %10, %11 : vector<8x1xf32>
    %13 = vector.broadcast %5 : vector<8x1xf32> to vector<8x128xf32>
    %14 = arith.subf %1, %13 : vector<8x128xf32>
    %cst_4 = arith.constant 9.99999974E-6 : f32
    %15 = vector.broadcast %cst_4 : f32 to vector<8x1xf32>
    %16 = arith.addf %12, %15 : vector<8x1xf32>
    %17 = math.rsqrt %16 : vector<8x1xf32>
    %18 = vector.broadcast %17 : vector<8x1xf32> to vector<8x128xf32>
    %19 = arith.mulf %14, %18 : vector<8x128xf32>
    %c0_5 = arith.constant 0 : index
    %c0_6 = arith.constant 0 : index
    %20 = vector.load %arg2[%c0_5, %c0_6] : memref<1x128xf32, #tpu.memory_space<vmem>>, vector<1x128xf32>
    %21 = vector.broadcast %20 : vector<1x128xf32> to vector<8x128xf32>
    %22 = arith.mulf %19, %21 : vector<8x128xf32>
    %c0_7 = arith.constant 0 : index
    %c0_8 = arith.constant 0 : index
    %23 = vector.load %arg3[%c0_7, %c0_8] : memref<1x128xf32, #tpu.memory_space<vmem>>, vector<1x128xf32>
    %24 = vector.broadcast %23 : vector<1x128xf32> to vector<8x128xf32>
    %25 = arith.addf %22, %24 : vector<8x128xf32>
    %26 = arith.truncf %25 : vector<8x128xf32> to vector<8x128xbf16>
    %c0_9 = arith.constant 0 : index
    %c0_10 = arith.constant 0 : index
    %27 = vector.load %arg4[%c0_9, %c0_10] : memref<8x128xbf16, #tpu.memory_space<vmem>>, vector<8x128xbf16>
    tpu.vector_store %arg4[%c0_9, %c0_10], %26 {strides = array<i32>} : memref<8x128xbf16, #tpu.memory_space<vmem>>, vector<8x128xbf16>,
    return
  }
  func.func @transform_0(%arg0: i32) -> (i32, i32) {
    %c0_i32 = arith.constant 0 : i32
    %c0_i32_0 = arith.constant 0 : i32
    return %arg0, %c0_i32 : i32, i32
  }
  func.func @transform_1(%arg0: i32) -> (i32, i32) {
    %c0_i32 = arith.constant 0 : i32
    %c0_i32_0 = arith.constant 0 : i32
    %c0_i32_1 = arith.constant 0 : i32
    return %c0_i32, %c0_i32_0 : i32, i32
  }
  func.func @transform_2(%arg0: i32) -> (i32, i32) {
    %c0_i32 = arith.constant 0 : i32
    %c0_i32_0 = arith.constant 0 : i32
    %c0_i32_1 = arith.constant 0 : i32
    return %c0_i32, %c0_i32_0 : i32, i32
  }
  func.func @transform_3(%arg0: i32) -> (i32, i32) {
    %c0_i32 = arith.constant 0 : i32
    %c0_i32_0 = arith.constant 0 : i32
    return %arg0, %c0_i32 : i32, i32
  }
}

module attributes {stable_mosaic.version = 11 : i64} {
  func.func @_linear_kernel(%arg0: i32, %arg1: i32, %arg2: i32, %arg3: memref<8x128xbf16, #tpu.memory_space<vmem>>, %arg4: memref<128x256xbf16, #tpu.memory_space<vmem>>, %arg5: memref<1x256xf32, #tpu.memory_space<vmem>>, %arg6: memref<8x256xbf16, #tpu.memory_space<vmem>>, %arg7: memref<8x256xf32, #tpu.memory_space<vmem>>) attributes {dimension_semantics = [#tpu.dimension_semantics<parallel>, #tpu.dimension_semantics<parallel>, #tpu.dimension_semantics<arbitrary>], iteration_bounds = array<i64: 2, 1, 1>, scalar_prefetch = 0 : i64, scratch_operands = 1 : i64, tpu.core_type = #tpu.core_type<tc>, window_params = [{transform_indices = @transform_0, window_bounds = array<i64: 8, 128>}, {transform_indices = @transform_1, window_bounds = array<i64: 128, 256>}, {transform_indices = @transform_2, window_bounds = array<i64: 1, 256>}, {transform_indices = @transform_3, window_bounds = array<i64: 8, 256>}]} {
    %c0_i32 = arith.constant 0 : i32
    %0 = arith.cmpi eq, %arg2, %c0_i32 : i32
    %1 = arith.extui %0 : i1 to i32
    %c0_i32_0 = arith.constant 0 : i32
    %2 = arith.cmpi ne, %1, %c0_i32_0 : i32
    scf.if %2 {
      %cst_10 = arith.constant 0.000000e+00 : f32
      %12 = vector.broadcast %cst_10 : f32 to vector<8x256xf32>
      %c0_11 = arith.constant 0 : index
      %c0_12 = arith.constant 0 : index
      %13 = vector.load %arg7[%c0_11, %c0_12] : memref<8x256xf32, #tpu.memory_space<vmem>>, vector<8x256xf32>
      tpu.vector_store %arg7[%c0_11, %c0_12], %12 {strides = array<i32>} : memref<8x256xf32, #tpu.memory_space<vmem>>, vector<8x256xf32>,
    } else {
    }
    %c0 = arith.constant 0 : index
    %c0_1 = arith.constant 0 : index
    %3 = vector.load %arg7[%c0, %c0_1] : memref<8x256xf32, #tpu.memory_space<vmem>>, vector<8x256xf32>
    %c0_2 = arith.constant 0 : index
    %c0_3 = arith.constant 0 : index
    %4 = vector.load %arg3[%c0_2, %c0_3] : memref<8x128xbf16, #tpu.memory_space<vmem>>, vector<8x128xbf16>
    %c0_4 = arith.constant 0 : index
    %c0_5 = arith.constant 0 : index
    %5 = vector.load %arg4[%c0_4, %c0_5] : memref<128x256xbf16, #tpu.memory_space<vmem>>, vector<128x256xbf16>
    %cst = arith.constant dense<0.000000e+00> : vector<8x256xf32>
    %6 = tpu.matmul %4, %5, %cst {dimension_numbers = #tpu.dot_dimension_numbers<[1], [0], [0], [1], [0, 0, 1, 1], [], []>} : vector<8x128xbf16>, vector<128x256xbf16>, vector<8x256xf32> -> vector<8x256xf32>
    %7 = arith.addf %3, %6 : vector<8x256xf32>
    %c0_6 = arith.constant 0 : index
    %c0_7 = arith.constant 0 : index
    %8 = vector.load %arg7[%c0_6, %c0_7] : memref<8x256xf32, #tpu.memory_space<vmem>>, vector<8x256xf32>
    tpu.vector_store %arg7[%c0_6, %c0_7], %7 {strides = array<i32>} : memref<8x256xf32, #tpu.memory_space<vmem>>, vector<8x256xf32>,
    %c0_i32_8 = arith.constant 0 : i32
    %9 = arith.cmpi eq, %arg2, %c0_i32_8 : i32
    %10 = arith.extui %9 : i1 to i32
    %c0_i32_9 = arith.constant 0 : i32
    %11 = arith.cmpi ne, %10, %c0_i32_9 : i32
    scf.if %11 {
      %c0_10 = arith.constant 0 : index
      %c0_11 = arith.constant 0 : index
      %12 = vector.load %arg7[%c0_10, %c0_11] : memref<8x256xf32, #tpu.memory_space<vmem>>, vector<8x256xf32>
      %c0_12 = arith.constant 0 : index
      %c0_13 = arith.constant 0 : index
      %13 = vector.load %arg5[%c0_12, %c0_13] : memref<1x256xf32, #tpu.memory_space<vmem>>, vector<1x256xf32>
      %14 = vector.broadcast %13 : vector<1x256xf32> to vector<8x256xf32>
      %15 = arith.addf %12, %14 : vector<8x256xf32>
      %16 = arith.truncf %15 : vector<8x256xf32> to vector<8x256xbf16>
      %c0_14 = arith.constant 0 : index
      %c0_15 = arith.constant 0 : index
      %17 = vector.load %arg6[%c0_14, %c0_15] : memref<8x256xbf16, #tpu.memory_space<vmem>>, vector<8x256xbf16>
      tpu.vector_store %arg6[%c0_14, %c0_15], %16 {strides = array<i32>} : memref<8x256xbf16, #tpu.memory_space<vmem>>, vector<8x256xbf16>,
    } else {
    }
    return
  }
  func.func @transform_0(%arg0: i32, %arg1: i32, %arg2: i32) -> (i32, i32) {
    %c0_i32 = arith.constant 0 : i32
    return %arg0, %arg2 : i32, i32
  }
  func.func @transform_1(%arg0: i32, %arg1: i32, %arg2: i32) -> (i32, i32) {
    %c0_i32 = arith.constant 0 : i32
    return %arg2, %arg1 : i32, i32
  }
  func.func @transform_2(%arg0: i32, %arg1: i32, %arg2: i32) -> (i32, i32) {
    %c0_i32 = arith.constant 0 : i32
    %c0_i32_0 = arith.constant 0 : i32
    return %c0_i32, %arg1 : i32, i32
  }
  func.func @transform_3(%arg0: i32, %arg1: i32, %arg2: i32) -> (i32, i32) {
    %c0_i32 = arith.constant 0 : i32
    return %arg0, %arg1 : i32, i32
  }
}

module attributes {stable_mosaic.version = 11 : i64} {
  func.func @_ffn_kernel(%arg0: i32, %arg1: memref<8x128xbf16, #tpu.memory_space<vmem>>, %arg2: memref<128x256xbf16, #tpu.memory_space<vmem>>, %arg3: memref<1x256xf32, #tpu.memory_space<vmem>>, %arg4: memref<256x128xbf16, #tpu.memory_space<vmem>>, %arg5: memref<1x128xf32, #tpu.memory_space<vmem>>, %arg6: memref<8x128xbf16, #tpu.memory_space<vmem>>) attributes {dimension_semantics = [#tpu.dimension_semantics<parallel>], iteration_bounds = array<i64: 2>, scalar_prefetch = 0 : i64, scratch_operands = 0 : i64, tpu.core_type = #tpu.core_type<tc>, window_params = [{transform_indices = @transform_0, window_bounds = array<i64: 8, 128>}, {pipeline_mode = #tpu.pipeline_mode<synchronous>, transform_indices = @transform_1, window_bounds = array<i64: 128, 256>}, {pipeline_mode = #tpu.pipeline_mode<synchronous>, transform_indices = @transform_2, window_bounds = array<i64: 1, 256>}, {pipeline_mode = #tpu.pipeline_mode<synchronous>, transform_indices = @transform_3, window_bounds = array<i64: 256, 128>}, {pipeline_mode = #tpu.pipeline_mode<synchronous>, transform_indices = @transform_4, window_bounds = array<i64: 1, 128>}, {transform_indices = @transform_5, window_bounds = array<i64: 8, 128>}]} {
    %c0 = arith.constant 0 : index
    %c0_0 = arith.constant 0 : index
    %0 = vector.load %arg1[%c0, %c0_0] : memref<8x128xbf16, #tpu.memory_space<vmem>>, vector<8x128xbf16>
    %c0_1 = arith.constant 0 : index
    %c0_2 = arith.constant 0 : index
    %1 = vector.load %arg2[%c0_1, %c0_2] : memref<128x256xbf16, #tpu.memory_space<vmem>>, vector<128x256xbf16>
    %cst = arith.constant dense<0.000000e+00> : vector<8x256xf32>
    %2 = tpu.matmul %0, %1, %cst {dimension_numbers = #tpu.dot_dimension_numbers<[1], [0], [0], [1], [0, 0, 1, 1], [], []>} : vector<8x128xbf16>, vector<128x256xbf16>, vector<8x256xf32> -> vector<8x256xf32>
    %c0_3 = arith.constant 0 : index
    %c0_4 = arith.constant 0 : index
    %3 = vector.load %arg3[%c0_3, %c0_4] : memref<1x256xf32, #tpu.memory_space<vmem>>, vector<1x256xf32>
    %4 = vector.broadcast %3 : vector<1x256xf32> to vector<8x256xf32>
    %5 = arith.addf %2, %4 : vector<8x256xf32>
    %cst_5 = arith.constant 0.000000e+00 : f32
    %6 = vector.broadcast %cst_5 : f32 to vector<8x256xf32>
    %7 = arith.maximumf %5, %6 : vector<8x256xf32>
    %8 = arith.truncf %7 : vector<8x256xf32> to vector<8x256xbf16>
    %c0_6 = arith.constant 0 : index
    %c0_7 = arith.constant 0 : index
    %9 = vector.load %arg4[%c0_6, %c0_7] : memref<256x128xbf16, #tpu.memory_space<vmem>>, vector<256x128xbf16>
    %cst_8 = arith.constant dense<0.000000e+00> : vector<8x128xf32>
    %10 = tpu.matmul %8, %9, %cst_8 {dimension_numbers = #tpu.dot_dimension_numbers<[1], [0], [0], [1], [0, 0, 1, 1], [], []>} : vector<8x256xbf16>, vector<256x128xbf16>, vector<8x128xf32> -> vector<8x128xf32>
    %c0_9 = arith.constant 0 : index
    %c0_10 = arith.constant 0 : index
    %11 = vector.load %arg5[%c0_9, %c0_10] : memref<1x128xf32, #tpu.memory_space<vmem>>, vector<1x128xf32>
    %12 = vector.broadcast %11 : vector<1x128xf32> to vector<8x128xf32>
    %13 = arith.addf %10, %12 : vector<8x128xf32>
    %14 = arith.truncf %13 : vector<8x128xf32> to vector<8x128xbf16>
    %c0_11 = arith.constant 0 : index
    %c0_12 = arith.constant 0 : index
    %15 = vector.load %arg6[%c0_11, %c0_12] : memref<8x128xbf16, #tpu.memory_space<vmem>>, vector<8x128xbf16>
    tpu.vector_store %arg6[%c0_11, %c0_12], %14 {strides = array<i32>} : memref<8x128xbf16, #tpu.memory_space<vmem>>, vector<8x128xbf16>,
    return
  }
  func.func @transform_0(%arg0: i32) -> (i32, i32) {
    %c0_i32 = arith.constant 0 : i32
    %c0_i32_0 = arith.constant 0 : i32
    return %arg0, %c0_i32 : i32, i32
  }
  func.func @transform_1(%arg0: i32) -> (i32, i32) {
    %c0_i32 = arith.constant 0 : i32
    %c0_i32_0 = arith.constant 0 : i32
    %c0_i32_1 = arith.constant 0 : i32
    return %c0_i32, %c0_i32_0 : i32, i32
  }
  func.func @transform_2(%arg0: i32) -> (i32, i32) {
    %c0_i32 = arith.constant 0 : i32
    %c0_i32_0 = arith.constant 0 : i32
    %c0_i32_1 = arith.constant 0 : i32
    return %c0_i32, %c0_i32_0 : i32, i32
  }
  func.func @transform_3(%arg0: i32) -> (i32, i32) {
    %c0_i32 = arith.constant 0 : i32
    %c0_i32_0 = arith.constant 0 : i32
    %c0_i32_1 = arith.constant 0 : i32
    return %c0_i32, %c0_i32_0 : i32, i32
  }
  func.func @transform_4(%arg0: i32) -> (i32, i32) {
    %c0_i32 = arith.constant 0 : i32
    %c0_i32_0 = arith.constant 0 : i32
    %c0_i32_1 = arith.constant 0 : i32
    return %c0_i32, %c0_i32_0 : i32, i32
  }
  func.func @transform_5(%arg0: i32) -> (i32, i32) {
    %c0_i32 = arith.constant 0 : i32
    %c0_i32_0 = arith.constant 0 : i32
    return %arg0, %c0_i32 : i32, i32
  }
}

module attributes {stable_mosaic.version = 11 : i64} {
  func.func @_attn_kernel(%arg0: i32, %arg1: i32, %arg2: i32, %arg3: memref<1x8x128xbf16, #tpu.memory_space<vmem>>, %arg4: memref<1x8x128xbf16, #tpu.memory_space<vmem>>, %arg5: memref<1x8x128xbf16, #tpu.memory_space<vmem>>, %arg6: memref<1x1x8xf32, #tpu.memory_space<vmem>>, %arg7: memref<1x8x128xbf16, #tpu.memory_space<vmem>>, %arg8: memref<8x4xf32, #tpu.memory_space<vmem>>, %arg9: memref<8x4xf32, #tpu.memory_space<vmem>>, %arg10: memref<8x128xf32, #tpu.memory_space<vmem>>) attributes {dimension_semantics = [#tpu.dimension_semantics<parallel>, #tpu.dimension_semantics<parallel>, #tpu.dimension_semantics<arbitrary>], iteration_bounds = array<i64: 2, 1, 1>, scalar_prefetch = 0 : i64, scratch_operands = 3 : i64, tpu.core_type = #tpu.core_type<tc>, window_params = [{transform_indices = @transform_0, window_bounds = array<i64: 1, 8, 128>}, {transform_indices = @transform_1, window_bounds = array<i64: 1, 8, 128>}, {transform_indices = @transform_2, window_bounds = array<i64: 1, 8, 128>}, {transform_indices = @transform_3, window_bounds = array<i64: 1, 1, 8>}, {transform_indices = @transform_4, window_bounds = array<i64: 1, 8, 128>}]} {
    %c0_i32 = arith.constant 0 : i32
    %0 = arith.cmpi eq, %arg2, %c0_i32 : i32
    %1 = arith.extui %0 : i1 to i32
    %c0_i32_0 = arith.constant 0 : i32
    %2 = arith.cmpi ne, %1, %c0_i32_0 : i32
    scf.if %2 {
      %cst_71 = arith.constant -1.000000e+30 : f32
      %130 = vector.broadcast %cst_71 : f32 to vector<8x4xf32>
      %c0_72 = arith.constant 0 : index
      %c0_73 = arith.constant 0 : index
      %131 = vector.load %arg8[%c0_72, %c0_73] : memref<8x4xf32, #tpu.memory_space<vmem>>, vector<8x4xf32>
      tpu.vector_store %arg8[%c0_72, %c0_73], %130 {strides = array<i32>} : memref<8x4xf32, #tpu.memory_space<vmem>>, vector<8x4xf32>,
      %cst_74 = arith.constant 0.000000e+00 : f32
      %132 = vector.broadcast %cst_74 : f32 to vector<8x4xf32>
      %c0_75 = arith.constant 0 : index
      %c0_76 = arith.constant 0 : index
      %133 = vector.load %arg9[%c0_75, %c0_76] : memref<8x4xf32, #tpu.memory_space<vmem>>, vector<8x4xf32>
      tpu.vector_store %arg9[%c0_75, %c0_76], %132 {strides = array<i32>} : memref<8x4xf32, #tpu.memory_space<vmem>>, vector<8x4xf32>,
      %cst_77 = arith.constant 0.000000e+00 : f32
      %134 = vector.broadcast %cst_77 : f32 to vector<8x128xf32>
      %c0_78 = arith.constant 0 : index
      %c0_79 = arith.constant 0 : index
      %135 = vector.load %arg10[%c0_78, %c0_79] : memref<8x128xf32, #tpu.memory_space<vmem>>, vector<8x128xf32>
      tpu.vector_store %arg10[%c0_78, %c0_79], %134 {strides = array<i32>} : memref<8x128xf32, #tpu.memory_space<vmem>>, vector<8x128xf32>,
    } else {
    }
    %c0 = arith.constant 0 : index
    %c0_1 = arith.constant 0 : index
    %c0_2 = arith.constant 0 : index
    %3 = vector.load %arg6[%c0, %c0_1, %c0_2] : memref<1x1x8xf32, #tpu.memory_space<vmem>>, vector<1x1x8xf32>
    %4 = vector.shape_cast %3 : vector<1x1x8xf32> to vector<1x8xf32>
    %c0_3 = arith.constant 0 : index
    %c0_4 = arith.constant 0 : index
    %c0_5 = arith.constant 0 : index
    %5 = vector.load %arg3[%c0_3, %c0_4, %c0_5] : memref<1x8x128xbf16, #tpu.memory_space<vmem>>, vector<1x8x128xbf16>
    %6 = vector.shape_cast %5 : vector<1x8x128xbf16> to vector<8x128xbf16>
    %c0_6 = arith.constant 0 : index
    %c0_7 = arith.constant 0 : index
    %c0_8 = arith.constant 0 : index
    %7 = vector.load %arg4[%c0_6, %c0_7, %c0_8] : memref<1x8x128xbf16, #tpu.memory_space<vmem>>, vector<1x8x128xbf16>
    %8 = vector.shape_cast %7 : vector<1x8x128xbf16> to vector<8x128xbf16>
    %c0_9 = arith.constant 0 : index
    %c0_10 = arith.constant 0 : index
    %c0_11 = arith.constant 0 : index
    %9 = vector.load %arg5[%c0_9, %c0_10, %c0_11] : memref<1x8x128xbf16, #tpu.memory_space<vmem>>, vector<1x8x128xbf16>
    %10 = vector.shape_cast %9 : vector<1x8x128xbf16> to vector<8x128xbf16>
    %11 = vector.extract_strided_slice %6 {offsets = [0, 0], sizes = [8, 32], strides = [1, 1]} : vector<8x128xbf16> to vector<8x32xbf16>
    %12 = vector.extract_strided_slice %8 {offsets = [0, 0], sizes = [8, 32], strides = [1, 1]} : vector<8x128xbf16> to vector<8x32xbf16>
    %cst = arith.constant dense<0.000000e+00> : vector<8x8xf32>
    %13 = tpu.matmul %11, %12, %cst {dimension_numbers = #tpu.dot_dimension_numbers<[1], [1], [0], [0], [0, 0, 1, 0], [], []>} : vector<8x32xbf16>, vector<8x32xbf16>, vector<8x8xf32> -> vector<8x8xf32>
    %14 = vector.broadcast %4 : vector<1x8xf32> to vector<8x8xf32>
    %15 = arith.addf %13, %14 : vector<8x8xf32>
    %c0_12 = arith.constant 0 : index
    %c0_13 = arith.constant 0 : index
    %16 = vector.load %arg8[%c0_12, %c0_13] : memref<8x4xf32, #tpu.memory_space<vmem>>, vector<8x1xf32>
    %cst_14 = arith.constant dense<0xFF800000> : vector<8xf32>
    %17 = vector.multi_reduction <maximumf>, %15, %cst_14 [1] : vector<8x8xf32> to vector<8xf32>
    %18 = vector.shape_cast %17 : vector<8xf32> to vector<8x1xf32>
    %19 = arith.maximumf %16, %18 : vector<8x1xf32>
    %20 = arith.subf %16, %19 : vector<8x1xf32>
    %21 = math.exp %20 : vector<8x1xf32>
    %22 = vector.broadcast %19 : vector<8x1xf32> to vector<8x8xf32>
    %23 = arith.subf %15, %22 : vector<8x8xf32>
    %24 = math.exp %23 : vector<8x8xf32>
    %c0_15 = arith.constant 0 : index
    %c0_16 = arith.constant 0 : index
    %25 = vector.load %arg9[%c0_15, %c0_16] : memref<8x4xf32, #tpu.memory_space<vmem>>, vector<8x1xf32>
    %26 = arith.mulf %21, %25 : vector<8x1xf32>
    %cst_17 = arith.constant dense<0.000000e+00> : vector<8xf32>
    %27 = vector.multi_reduction <add>, %24, %cst_17 [1] : vector<8x8xf32> to vector<8xf32>
    %28 = vector.shape_cast %27 : vector<8xf32> to vector<8x1xf32>
    %29 = arith.addf %26, %28 : vector<8x1xf32>
    %c0_18 = arith.constant 0 : index
    %c0_19 = arith.constant 0 : index
    %30 = vector.load %arg9[%c0_18, %c0_19] : memref<8x4xf32, #tpu.memory_space<vmem>>, vector<8x1xf32>
    tpu.vector_store %arg9[%c0_18, %c0_19], %29 {strides = array<i32>} : memref<8x4xf32, #tpu.memory_space<vmem>>, vector<8x1xf32>,
    %c0_20 = arith.constant 0 : index
    %c0_21 = arith.constant 0 : index
    %31 = vector.load %arg10[%c0_20, %c0_21] : memref<8x128xf32, #tpu.memory_space<vmem>>, vector<8x32xf32>
    %32 = vector.broadcast %21 : vector<8x1xf32> to vector<8x32xf32>
    %33 = arith.mulf %32, %31 : vector<8x32xf32>
    %34 = arith.truncf %24 : vector<8x8xf32> to vector<8x8xbf16>
    %35 = vector.extract_strided_slice %10 {offsets = [0, 0], sizes = [8, 32], strides = [1, 1]} : vector<8x128xbf16> to vector<8x32xbf16>
    %cst_22 = arith.constant dense<0.000000e+00> : vector<8x32xf32>
    %36 = tpu.matmul %34, %35, %cst_22 {dimension_numbers = #tpu.dot_dimension_numbers<[1], [0], [0], [1], [0, 0, 1, 1], [], []>} : vector<8x8xbf16>, vector<8x32xbf16>, vector<8x32xf32> -> vector<8x32xf32>
    %37 = arith.addf %33, %36 : vector<8x32xf32>
    %c0_23 = arith.constant 0 : index
    %c0_24 = arith.constant 0 : index
    %38 = vector.load %arg10[%c0_23, %c0_24] : memref<8x128xf32, #tpu.memory_space<vmem>>, vector<8x32xf32>
    tpu.vector_store %arg10[%c0_23, %c0_24], %37 {strides = array<i32>} : memref<8x128xf32, #tpu.memory_space<vmem>>, vector<8x32xf32>,
    %c0_25 = arith.constant 0 : index
    %c0_26 = arith.constant 0 : index
    %39 = vector.load %arg8[%c0_25, %c0_26] : memref<8x4xf32, #tpu.memory_space<vmem>>, vector<8x1xf32>
    tpu.vector_store %arg8[%c0_25, %c0_26], %19 {strides = array<i32>} : memref<8x4xf32, #tpu.memory_space<vmem>>, vector<8x1xf32>,
    %40 = vector.extract_strided_slice %6 {offsets = [0, 32], sizes = [8, 32], strides = [1, 1]} : vector<8x128xbf16> to vector<8x32xbf16>
    %41 = vector.extract_strided_slice %8 {offsets = [0, 32], sizes = [8, 32], strides = [1, 1]} : vector<8x128xbf16> to vector<8x32xbf16>
    %cst_27 = arith.constant dense<0.000000e+00> : vector<8x8xf32>
    %42 = tpu.matmul %40, %41, %cst_27 {dimension_numbers = #tpu.dot_dimension_numbers<[1], [1], [0], [0], [0, 0, 1, 0], [], []>} : vector<8x32xbf16>, vector<8x32xbf16>, vector<8x8xf32> -> vector<8x8xf32>
    %43 = vector.broadcast %4 : vector<1x8xf32> to vector<8x8xf32>
    %44 = arith.addf %42, %43 : vector<8x8xf32>
    %c0_28 = arith.constant 0 : index
    %c1 = arith.constant 1 : index
    %45 = vector.load %arg8[%c0_28, %c1] : memref<8x4xf32, #tpu.memory_space<vmem>>, vector<8x1xf32>
    %cst_29 = arith.constant dense<0xFF800000> : vector<8xf32>
    %46 = vector.multi_reduction <maximumf>, %44, %cst_29 [1] : vector<8x8xf32> to vector<8xf32>
    %47 = vector.shape_cast %46 : vector<8xf32> to vector<8x1xf32>
    %48 = arith.maximumf %45, %47 : vector<8x1xf32>
    %49 = arith.subf %45, %48 : vector<8x1xf32>
    %50 = math.exp %49 : vector<8x1xf32>
    %51 = vector.broadcast %48 : vector<8x1xf32> to vector<8x8xf32>
    %52 = arith.subf %44, %51 : vector<8x8xf32>
    %53 = math.exp %52 : vector<8x8xf32>
    %c0_30 = arith.constant 0 : index
    %c1_31 = arith.constant 1 : index
    %54 = vector.load %arg9[%c0_30, %c1_31] : memref<8x4xf32, #tpu.memory_space<vmem>>, vector<8x1xf32>
    %55 = arith.mulf %50, %54 : vector<8x1xf32>
    %cst_32 = arith.constant dense<0.000000e+00> : vector<8xf32>
    %56 = vector.multi_reduction <add>, %53, %cst_32 [1] : vector<8x8xf32> to vector<8xf32>
    %57 = vector.shape_cast %56 : vector<8xf32> to vector<8x1xf32>
    %58 = arith.addf %55, %57 : vector<8x1xf32>
    %c0_33 = arith.constant 0 : index
    %c1_34 = arith.constant 1 : index
    %59 = vector.load %arg9[%c0_33, %c1_34] : memref<8x4xf32, #tpu.memory_space<vmem>>, vector<8x1xf32>
    tpu.vector_store %arg9[%c0_33, %c1_34], %58 {strides = array<i32>} : memref<8x4xf32, #tpu.memory_space<vmem>>, vector<8x1xf32>,
    %c0_35 = arith.constant 0 : index
    %c32 = arith.constant 32 : index
    %60 = vector.load %arg10[%c0_35, %c32] : memref<8x128xf32, #tpu.memory_space<vmem>>, vector<8x32xf32>
    %61 = vector.broadcast %50 : vector<8x1xf32> to vector<8x32xf32>
    %62 = arith.mulf %61, %60 : vector<8x32xf32>
    %63 = arith.truncf %53 : vector<8x8xf32> to vector<8x8xbf16>
    %64 = vector.extract_strided_slice %10 {offsets = [0, 32], sizes = [8, 32], strides = [1, 1]} : vector<8x128xbf16> to vector<8x32xbf16>
    %cst_36 = arith.constant dense<0.000000e+00> : vector<8x32xf32>
    %65 = tpu.matmul %63, %64, %cst_36 {dimension_numbers = #tpu.dot_dimension_numbers<[1], [0], [0], [1], [0, 0, 1, 1], [], []>} : vector<8x8xbf16>, vector<8x32xbf16>, vector<8x32xf32> -> vector<8x32xf32>
    %66 = arith.addf %62, %65 : vector<8x32xf32>
    %c0_37 = arith.constant 0 : index
    %c32_38 = arith.constant 32 : index
    %67 = vector.load %arg10[%c0_37, %c32_38] : memref<8x128xf32, #tpu.memory_space<vmem>>, vector<8x32xf32>
    tpu.vector_store %arg10[%c0_37, %c32_38], %66 {strides = array<i32>} : memref<8x128xf32, #tpu.memory_space<vmem>>, vector<8x32xf32>,
    %c0_39 = arith.constant 0 : index
    %c1_40 = arith.constant 1 : index
    %68 = vector.load %arg8[%c0_39, %c1_40] : memref<8x4xf32, #tpu.memory_space<vmem>>, vector<8x1xf32>
    tpu.vector_store %arg8[%c0_39, %c1_40], %48 {strides = array<i32>} : memref<8x4xf32, #tpu.memory_space<vmem>>, vector<8x1xf32>,
    %69 = vector.extract_strided_slice %6 {offsets = [0, 64], sizes = [8, 32], strides = [1, 1]} : vector<8x128xbf16> to vector<8x32xbf16>
    %70 = vector.extract_strided_slice %8 {offsets = [0, 64], sizes = [8, 32], strides = [1, 1]} : vector<8x128xbf16> to vector<8x32xbf16>
    %cst_41 = arith.constant dense<0.000000e+00> : vector<8x8xf32>
    %71 = tpu.matmul %69, %70, %cst_41 {dimension_numbers = #tpu.dot_dimension_numbers<[1], [1], [0], [0], [0, 0, 1, 0], [], []>} : vector<8x32xbf16>, vector<8x32xbf16>, vector<8x8xf32> -> vector<8x8xf32>
    %72 = vector.broadcast %4 : vector<1x8xf32> to vector<8x8xf32>
    %73 = arith.addf %71, %72 : vector<8x8xf32>
    %c0_42 = arith.constant 0 : index
    %c2 = arith.constant 2 : index
    %74 = vector.load %arg8[%c0_42, %c2] : memref<8x4xf32, #tpu.memory_space<vmem>>, vector<8x1xf32>
    %cst_43 = arith.constant dense<0xFF800000> : vector<8xf32>
    %75 = vector.multi_reduction <maximumf>, %73, %cst_43 [1] : vector<8x8xf32> to vector<8xf32>
    %76 = vector.shape_cast %75 : vector<8xf32> to vector<8x1xf32>
    %77 = arith.maximumf %74, %76 : vector<8x1xf32>
    %78 = arith.subf %74, %77 : vector<8x1xf32>
    %79 = math.exp %78 : vector<8x1xf32>
    %80 = vector.broadcast %77 : vector<8x1xf32> to vector<8x8xf32>
    %81 = arith.subf %73, %80 : vector<8x8xf32>
    %82 = math.exp %81 : vector<8x8xf32>
    %c0_44 = arith.constant 0 : index
    %c2_45 = arith.constant 2 : index
    %83 = vector.load %arg9[%c0_44, %c2_45] : memref<8x4xf32, #tpu.memory_space<vmem>>, vector<8x1xf32>
    %84 = arith.mulf %79, %83 : vector<8x1xf32>
    %cst_46 = arith.constant dense<0.000000e+00> : vector<8xf32>
    %85 = vector.multi_reduction <add>, %82, %cst_46 [1] : vector<8x8xf32> to vector<8xf32>
    %86 = vector.shape_cast %85 : vector<8xf32> to vector<8x1xf32>
    %87 = arith.addf %84, %86 : vector<8x1xf32>
    %c0_47 = arith.constant 0 : index
    %c2_48 = arith.constant 2 : index
    %88 = vector.load %arg9[%c0_47, %c2_48] : memref<8x4xf32, #tpu.memory_space<vmem>>, vector<8x1xf32>
    tpu.vector_store %arg9[%c0_47, %c2_48], %87 {strides = array<i32>} : memref<8x4xf32, #tpu.memory_space<vmem>>, vector<8x1xf32>,
    %c0_49 = arith.constant 0 : index
    %c64 = arith.constant 64 : index
    %89 = vector.load %arg10[%c0_49, %c64] : memref<8x128xf32, #tpu.memory_space<vmem>>, vector<8x32xf32>
    %90 = vector.broadcast %79 : vector<8x1xf32> to vector<8x32xf32>
    %91 = arith.mulf %90, %89 : vector<8x32xf32>
    %92 = arith.truncf %82 : vector<8x8xf32> to vector<8x8xbf16>
    %93 = vector.extract_strided_slice %10 {offsets = [0, 64], sizes = [8, 32], strides = [1, 1]} : vector<8x128xbf16> to vector<8x32xbf16>
    %cst_50 = arith.constant dense<0.000000e+00> : vector<8x32xf32>
    %94 = tpu.matmul %92, %93, %cst_50 {dimension_numbers = #tpu.dot_dimension_numbers<[1], [0], [0], [1], [0, 0, 1, 1], [], []>} : vector<8x8xbf16>, vector<8x32xbf16>, vector<8x32xf32> -> vector<8x32xf32>
    %95 = arith.addf %91, %94 : vector<8x32xf32>
    %c0_51 = arith.constant 0 : index
    %c64_52 = arith.constant 64 : index
    %96 = vector.load %arg10[%c0_51, %c64_52] : memref<8x128xf32, #tpu.memory_space<vmem>>, vector<8x32xf32>
    tpu.vector_store %arg10[%c0_51, %c64_52], %95 {strides = array<i32>} : memref<8x128xf32, #tpu.memory_space<vmem>>, vector<8x32xf32>,
    %c0_53 = arith.constant 0 : index
    %c2_54 = arith.constant 2 : index
    %97 = vector.load %arg8[%c0_53, %c2_54] : memref<8x4xf32, #tpu.memory_space<vmem>>, vector<8x1xf32>
    tpu.vector_store %arg8[%c0_53, %c2_54], %77 {strides = array<i32>} : memref<8x4xf32, #tpu.memory_space<vmem>>, vector<8x1xf32>,
    %98 = vector.extract_strided_slice %6 {offsets = [0, 96], sizes = [8, 32], strides = [1, 1]} : vector<8x128xbf16> to vector<8x32xbf16>
    %99 = vector.extract_strided_slice %8 {offsets = [0, 96], sizes = [8, 32], strides = [1, 1]} : vector<8x128xbf16> to vector<8x32xbf16>
    %cst_55 = arith.constant dense<0.000000e+00> : vector<8x8xf32>
    %100 = tpu.matmul %98, %99, %cst_55 {dimension_numbers = #tpu.dot_dimension_numbers<[1], [1], [0], [0], [0, 0, 1, 0], [], []>} : vector<8x32xbf16>, vector<8x32xbf16>, vector<8x8xf32> -> vector<8x8xf32>
    %101 = vector.broadcast %4 : vector<1x8xf32> to vector<8x8xf32>
    %102 = arith.addf %100, %101 : vector<8x8xf32>
    %c0_56 = arith.constant 0 : index
    %c3 = arith.constant 3 : index
    %103 = vector.load %arg8[%c0_56, %c3] : memref<8x4xf32, #tpu.memory_space<vmem>>, vector<8x1xf32>
    %cst_57 = arith.constant dense<0xFF800000> : vector<8xf32>
    %104 = vector.multi_reduction <maximumf>, %102, %cst_57 [1] : vector<8x8xf32> to vector<8xf32>
    %105 = vector.shape_cast %104 : vector<8xf32> to vector<8x1xf32>
    %106 = arith.maximumf %103, %105 : vector<8x1xf32>
    %107 = arith.subf %103, %106 : vector<8x1xf32>
    %108 = math.exp %107 : vector<8x1xf32>
    %109 = vector.broadcast %106 : vector<8x1xf32> to vector<8x8xf32>
    %110 = arith.subf %102, %109 : vector<8x8xf32>
    %111 = math.exp %110 : vector<8x8xf32>
    %c0_58 = arith.constant 0 : index
    %c3_59 = arith.constant 3 : index
    %112 = vector.load %arg9[%c0_58, %c3_59] : memref<8x4xf32, #tpu.memory_space<vmem>>, vector<8x1xf32>
    %113 = arith.mulf %108, %112 : vector<8x1xf32>
    %cst_60 = arith.constant dense<0.000000e+00> : vector<8xf32>
    %114 = vector.multi_reduction <add>, %111, %cst_60 [1] : vector<8x8xf32> to vector<8xf32>
    %115 = vector.shape_cast %114 : vector<8xf32> to vector<8x1xf32>
    %116 = arith.addf %113, %115 : vector<8x1xf32>
    %c0_61 = arith.constant 0 : index
    %c3_62 = arith.constant 3 : index
    %117 = vector.load %arg9[%c0_61, %c3_62] : memref<8x4xf32, #tpu.memory_space<vmem>>, vector<8x1xf32>
    tpu.vector_store %arg9[%c0_61, %c3_62], %116 {strides = array<i32>} : memref<8x4xf32, #tpu.memory_space<vmem>>, vector<8x1xf32>,
    %c0_63 = arith.constant 0 : index
    %c96 = arith.constant 96 : index
    %118 = vector.load %arg10[%c0_63, %c96] : memref<8x128xf32, #tpu.memory_space<vmem>>, vector<8x32xf32>
    %119 = vector.broadcast %108 : vector<8x1xf32> to vector<8x32xf32>
    %120 = arith.mulf %119, %118 : vector<8x32xf32>
    %121 = arith.truncf %111 : vector<8x8xf32> to vector<8x8xbf16>
    %122 = vector.extract_strided_slice %10 {offsets = [0, 96], sizes = [8, 32], strides = [1, 1]} : vector<8x128xbf16> to vector<8x32xbf16>
    %cst_64 = arith.constant dense<0.000000e+00> : vector<8x32xf32>
    %123 = tpu.matmul %121, %122, %cst_64 {dimension_numbers = #tpu.dot_dimension_numbers<[1], [0], [0], [1], [0, 0, 1, 1], [], []>} : vector<8x8xbf16>, vector<8x32xbf16>, vector<8x32xf32> -> vector<8x32xf32>
    %124 = arith.addf %120, %123 : vector<8x32xf32>
    %c0_65 = arith.constant 0 : index
    %c96_66 = arith.constant 96 : index
    %125 = vector.load %arg10[%c0_65, %c96_66] : memref<8x128xf32, #tpu.memory_space<vmem>>, vector<8x32xf32>
    tpu.vector_store %arg10[%c0_65, %c96_66], %124 {strides = array<i32>} : memref<8x128xf32, #tpu.memory_space<vmem>>, vector<8x32xf32>,
    %c0_67 = arith.constant 0 : index
    %c3_68 = arith.constant 3 : index
    %126 = vector.load %arg8[%c0_67, %c3_68] : memref<8x4xf32, #tpu.memory_space<vmem>>, vector<8x1xf32>
    tpu.vector_store %arg8[%c0_67, %c3_68], %106 {strides = array<i32>} : memref<8x4xf32, #tpu.memory_space<vmem>>, vector<8x1xf32>,
    %c0_i32_69 = arith.constant 0 : i32
    %127 = arith.cmpi eq, %arg2, %c0_i32_69 : i32
    %128 = arith.extui %127 : i1 to i32
    %c0_i32_70 = arith.constant 0 : i32
    %129 = arith.cmpi ne, %128, %c0_i32_70 : i32
    scf.if %129 {
      %c0_71 = arith.constant 0 : index
      %c0_72 = arith.constant 0 : index
      %130 = vector.load %arg10[%c0_71, %c0_72] : memref<8x128xf32, #tpu.memory_space<vmem>>, vector<8x32xf32>
      %c0_73 = arith.constant 0 : index
      %c0_74 = arith.constant 0 : index
      %131 = vector.load %arg9[%c0_73, %c0_74] : memref<8x4xf32, #tpu.memory_space<vmem>>, vector<8x1xf32>
      %132 = tpu.reciprocal %131 {approx = true} : vector<8x1xf32> -> vector<8x1xf32>
      %133 = vector.broadcast %132 : vector<8x1xf32> to vector<8x32xf32>
      %134 = arith.mulf %130, %133 : vector<8x32xf32>
      %c0_75 = arith.constant 0 : index
      %c0_76 = arith.constant 0 : index
      %135 = vector.load %arg10[%c0_75, %c0_76] : memref<8x128xf32, #tpu.memory_space<vmem>>, vector<8x32xf32>
      tpu.vector_store %arg10[%c0_75, %c0_76], %134 {strides = array<i32>} : memref<8x128xf32, #tpu.memory_space<vmem>>, vector<8x32xf32>,
      %c0_77 = arith.constant 0 : index
      %c32_78 = arith.constant 32 : index
      %136 = vector.load %arg10[%c0_77, %c32_78] : memref<8x128xf32, #tpu.memory_space<vmem>>, vector<8x32xf32>
      %c0_79 = arith.constant 0 : index
      %c1_80 = arith.constant 1 : index
      %137 = vector.load %arg9[%c0_79, %c1_80] : memref<8x4xf32, #tpu.memory_space<vmem>>, vector<8x1xf32>
      %138 = tpu.reciprocal %137 {approx = true} : vector<8x1xf32> -> vector<8x1xf32>
      %139 = vector.broadcast %138 : vector<8x1xf32> to vector<8x32xf32>
      %140 = arith.mulf %136, %139 : vector<8x32xf32>
      %c0_81 = arith.constant 0 : index
      %c32_82 = arith.constant 32 : index
      %141 = vector.load %arg10[%c0_81, %c32_82] : memref<8x128xf32, #tpu.memory_space<vmem>>, vector<8x32xf32>
      tpu.vector_store %arg10[%c0_81, %c32_82], %140 {strides = array<i32>} : memref<8x128xf32, #tpu.memory_space<vmem>>, vector<8x32xf32>,
      %c0_83 = arith.constant 0 : index
      %c64_84 = arith.constant 64 : index
      %142 = vector.load %arg10[%c0_83, %c64_84] : memref<8x128xf32, #tpu.memory_space<vmem>>, vector<8x32xf32>
      %c0_85 = arith.constant 0 : index
      %c2_86 = arith.constant 2 : index
      %143 = vector.load %arg9[%c0_85, %c2_86] : memref<8x4xf32, #tpu.memory_space<vmem>>, vector<8x1xf32>
      %144 = tpu.reciprocal %143 {approx = true} : vector<8x1xf32> -> vector<8x1xf32>
      %145 = vector.broadcast %144 : vector<8x1xf32> to vector<8x32xf32>
      %146 = arith.mulf %142, %145 : vector<8x32xf32>
      %c0_87 = arith.constant 0 : index
      %c64_88 = arith.constant 64 : index
      %147 = vector.load %arg10[%c0_87, %c64_88] : memref<8x128xf32, #tpu.memory_space<vmem>>, vector<8x32xf32>
      tpu.vector_store %arg10[%c0_87, %c64_88], %146 {strides = array<i32>} : memref<8x128xf32, #tpu.memory_space<vmem>>, vector<8x32xf32>,
      %c0_89 = arith.constant 0 : index
      %c96_90 = arith.constant 96 : index
      %148 = vector.load %arg10[%c0_89, %c96_90] : memref<8x128xf32, #tpu.memory_space<vmem>>, vector<8x32xf32>
      %c0_91 = arith.constant 0 : index
      %c3_92 = arith.constant 3 : index
      %149 = vector.load %arg9[%c0_91, %c3_92] : memref<8x4xf32, #tpu.memory_space<vmem>>, vector<8x1xf32>
      %150 = tpu.reciprocal %149 {approx = true} : vector<8x1xf32> -> vector<8x1xf32>
      %151 = vector.broadcast %150 : vector<8x1xf32> to vector<8x32xf32>
      %152 = arith.mulf %148, %151 : vector<8x32xf32>
      %c0_93 = arith.constant 0 : index
      %c96_94 = arith.constant 96 : index
      %153 = vector.load %arg10[%c0_93, %c96_94] : memref<8x128xf32, #tpu.memory_space<vmem>>, vector<8x32xf32>
      tpu.vector_store %arg10[%c0_93, %c96_94], %152 {strides = array<i32>} : memref<8x128xf32, #tpu.memory_space<vmem>>, vector<8x32xf32>,
      %c0_95 = arith.constant 0 : index
      %c0_96 = arith.constant 0 : index
      %154 = vector.load %arg10[%c0_95, %c0_96] : memref<8x128xf32, #tpu.memory_space<vmem>>, vector<8x128xf32>
      %155 = arith.truncf %154 : vector<8x128xf32> to vector<8x128xbf16>
      %c0_97 = arith.constant 0 : index
      %c0_98 = arith.constant 0 : index
      %c0_99 = arith.constant 0 : index
      %156 = vector.load %arg7[%c0_97, %c0_98, %c0_99] : memref<1x8x128xbf16, #tpu.memory_space<vmem>>, vector<1x8x128xbf16>
      %157 = vector.shape_cast %156 : vector<1x8x128xbf16> to vector<8x128xbf16>
      %158 = vector.shape_cast %155 : vector<8x128xbf16> to vector<1x8x128xbf16>
      tpu.vector_store %arg7[%c0_97, %c0_98, %c0_99], %158 {strides = array<i32>} : memref<1x8x128xbf16, #tpu.memory_space<vmem>>, vector<1x8x128xbf16>,
    } else {
    }
    return
  }
  func.func @transform_0(%arg0: i32, %arg1: i32, %arg2: i32) -> (i32, i32, i32) {
    %c0_i32 = arith.constant 0 : i32
    %c0_i32_0 = arith.constant 0 : i32
    return %arg0, %arg1, %c0_i32 : i32, i32, i32
  }
  func.func @transform_1(%arg0: i32, %arg1: i32, %arg2: i32) -> (i32, i32, i32) {
    %c0_i32 = arith.constant 0 : i32
    %c0_i32_0 = arith.constant 0 : i32
    return %arg0, %arg2, %c0_i32 : i32, i32, i32
  }
  func.func @transform_2(%arg0: i32, %arg1: i32, %arg2: i32) -> (i32, i32, i32) {
    %c1_i32 = arith.constant 1 : i32
    %c0_i32 = arith.constant 0 : i32
    return %arg0, %arg2, %c1_i32 : i32, i32, i32
  }
  func.func @transform_3(%arg0: i32, %arg1: i32, %arg2: i32) -> (i32, i32, i32) {
    %c0_i32 = arith.constant 0 : i32
    %c0_i32_0 = arith.constant 0 : i32
    return %arg0, %c0_i32, %arg2 : i32, i32, i32
  }
  func.func @transform_4(%arg0: i32, %arg1: i32, %arg2: i32) -> (i32, i32, i32) {
    %c0_i32 = arith.constant 0 : i32
    %c0_i32_0 = arith.constant 0 : i32
    return %arg0, %arg1, %c0_i32 : i32, i32, i32
  }
}

module attributes {stable_mosaic.version = 11 : i64} {
  func.func @_linear_kernel(%arg0: i32, %arg1: i32, %arg2: i32, %arg3: memref<8x128xbf16, #tpu.memory_space<vmem>>, %arg4: memref<128x256xbf16, #tpu.memory_space<vmem>>, %arg5: memref<1x256xf32, #tpu.memory_space<vmem>>, %arg6: memref<8x256xf32, #tpu.memory_space<vmem>>, %arg7: memref<8x256xf32, #tpu.memory_space<vmem>>) attributes {dimension_semantics = [#tpu.dimension_semantics<parallel>, #tpu.dimension_semantics<parallel>, #tpu.dimension_semantics<arbitrary>], iteration_bounds = array<i64: 2, 1, 1>, scalar_prefetch = 0 : i64, scratch_operands = 1 : i64, tpu.core_type = #tpu.core_type<tc>, window_params = [{transform_indices = @transform_0, window_bounds = array<i64: 8, 128>}, {transform_indices = @transform_1, window_bounds = array<i64: 128, 256>}, {transform_indices = @transform_2, window_bounds = array<i64: 1, 256>}, {transform_indices = @transform_3, window_bounds = array<i64: 8, 256>}]} {
    %c0_i32 = arith.constant 0 : i32
    %0 = arith.cmpi eq, %arg2, %c0_i32 : i32
    %1 = arith.extui %0 : i1 to i32
    %c0_i32_0 = arith.constant 0 : i32
    %2 = arith.cmpi ne, %1, %c0_i32_0 : i32
    scf.if %2 {
      %cst_10 = arith.constant 0.000000e+00 : f32
      %12 = vector.broadcast %cst_10 : f32 to vector<8x256xf32>
      %c0_11 = arith.constant 0 : index
      %c0_12 = arith.constant 0 : index
      %13 = vector.load %arg7[%c0_11, %c0_12] : memref<8x256xf32, #tpu.memory_space<vmem>>, vector<8x256xf32>
      tpu.vector_store %arg7[%c0_11, %c0_12], %12 {strides = array<i32>} : memref<8x256xf32, #tpu.memory_space<vmem>>, vector<8x256xf32>,
    } else {
    }
    %c0 = arith.constant 0 : index
    %c0_1 = arith.constant 0 : index
    %3 = vector.load %arg7[%c0, %c0_1] : memref<8x256xf32, #tpu.memory_space<vmem>>, vector<8x256xf32>
    %c0_2 = arith.constant 0 : index
    %c0_3 = arith.constant 0 : index
    %4 = vector.load %arg3[%c0_2, %c0_3] : memref<8x128xbf16, #tpu.memory_space<vmem>>, vector<8x128xbf16>
    %c0_4 = arith.constant 0 : index
    %c0_5 = arith.constant 0 : index
    %5 = vector.load %arg4[%c0_4, %c0_5] : memref<128x256xbf16, #tpu.memory_space<vmem>>, vector<128x256xbf16>
    %cst = arith.constant dense<0.000000e+00> : vector<8x256xf32>
    %6 = tpu.matmul %4, %5, %cst {dimension_numbers = #tpu.dot_dimension_numbers<[1], [0], [0], [1], [0, 0, 1, 1], [], []>} : vector<8x128xbf16>, vector<128x256xbf16>, vector<8x256xf32> -> vector<8x256xf32>
    %7 = arith.addf %3, %6 : vector<8x256xf32>
    %c0_6 = arith.constant 0 : index
    %c0_7 = arith.constant 0 : index
    %8 = vector.load %arg7[%c0_6, %c0_7] : memref<8x256xf32, #tpu.memory_space<vmem>>, vector<8x256xf32>
    tpu.vector_store %arg7[%c0_6, %c0_7], %7 {strides = array<i32>} : memref<8x256xf32, #tpu.memory_space<vmem>>, vector<8x256xf32>,
    %c0_i32_8 = arith.constant 0 : i32
    %9 = arith.cmpi eq, %arg2, %c0_i32_8 : i32
    %10 = arith.extui %9 : i1 to i32
    %c0_i32_9 = arith.constant 0 : i32
    %11 = arith.cmpi ne, %10, %c0_i32_9 : i32
    scf.if %11 {
      %c0_10 = arith.constant 0 : index
      %c0_11 = arith.constant 0 : index
      %12 = vector.load %arg7[%c0_10, %c0_11] : memref<8x256xf32, #tpu.memory_space<vmem>>, vector<8x256xf32>
      %c0_12 = arith.constant 0 : index
      %c0_13 = arith.constant 0 : index
      %13 = vector.load %arg5[%c0_12, %c0_13] : memref<1x256xf32, #tpu.memory_space<vmem>>, vector<1x256xf32>
      %14 = vector.broadcast %13 : vector<1x256xf32> to vector<8x256xf32>
      %15 = arith.addf %12, %14 : vector<8x256xf32>
      %c0_14 = arith.constant 0 : index
      %c0_15 = arith.constant 0 : index
      %16 = vector.load %arg6[%c0_14, %c0_15] : memref<8x256xf32, #tpu.memory_space<vmem>>, vector<8x256xf32>
      tpu.vector_store %arg6[%c0_14, %c0_15], %15 {strides = array<i32>} : memref<8x256xf32, #tpu.memory_space<vmem>>, vector<8x256xf32>,
    } else {
    }
    return
  }
  func.func @transform_0(%arg0: i32, %arg1: i32, %arg2: i32) -> (i32, i32) {
    %c0_i32 = arith.constant 0 : i32
    return %arg0, %arg2 : i32, i32
  }
  func.func @transform_1(%arg0: i32, %arg1: i32, %arg2: i32) -> (i32, i32) {
    %c0_i32 = arith.constant 0 : i32
    return %arg2, %arg1 : i32, i32
  }
  func.func @transform_2(%arg0: i32, %arg1: i32, %arg2: i32) -> (i32, i32) {
    %c0_i32 = arith.constant 0 : i32
    %c0_i32_0 = arith.constant 0 : i32
    return %c0_i32, %arg1 : i32, i32
  }
  func.func @transform_3(%arg0: i32, %arg1: i32, %arg2: i32) -> (i32, i32) {
    %c0_i32 = arith.constant 0 : i32
    return %arg0, %arg1 : i32, i32
  }
}

</mosaic_0001>

<bundles_post_ra>
// kernel: baseline_transformer_forward.53
= control target key start
LH: loop header
LB: loop body
LE: loop exit
PB: predicated region body
PF: predicated region fallthrough
CT: control target
= control target key end

     0   :  { %s378_s15 = smov 0   ;;  %s409_s0 = inlined_call_operand.vmem [shape: bf16[16,128], index: 0, kind: input, shape index: {}]   ;;  %s410_s1 = inlined_call_operand.vmem [shape: bf16[16,128], index: 1, kind: input, shape index: {}]   ;;  %s411_s2 = inlined_call_operand.vmem [shape: f32[1,128], index: 2, kind: input, shape index: {}]   ;;  %s412_s3 = inlined_call_operand.vmem [shape: f32[1,128], index: 3, kind: input, shape index: {}]   ;;  %s413_s4 = inlined_call_operand.vmem [shape: bf16[16,128], index: 4, kind: output, shape index: {}]  }
   0x1 LB: > { %s319_s16 = sadd.s32 4294967295, %s350_s15   ;;  %p323_p0 = scmp.ge.s32.totalorder %s350_s15, 1  ;;  %s350_s15 = sphi %s378_s15, %s14_s15  }
   0x2   : > { %p170_p1 = scmp.lt.s32.totalorder %s350_s15, 3 }
   0x4   : > { %p171_p2 = pnand %p323_p0, %p170_p1 }
   0x5   : > { %p198_p3 = scmp.lt.s32.totalorder (!%p171_p2), %s319_s16, 1 }
   0x6   : > { %174 = sbr.rel (%p171_p2) target bundleno = 289 (0x121), region = 36 }
   0xb   : > { %s415_s16 = smov (!%p198_p3, %s319_s16), 1  ;;  %v352_v5 = vmov 128.0   ;;  %v338_v25 = vld [vmem:[%s411_s2] ss:$0 sm:$0xff] }
   0xc   : > { %s386_s17 = sshll.u32 %s415_s16, 2  ;;  %340 = vrcp.f32 %v352_v5  ;;  %v339_v27 = vld [vmem:[%s412_s3] ss:$0 sm:$0xff] }
   0xd   : > { %s201_s20 = scalar_lea.vmem %s409_s0, %s386_s17  ;;  %s205_s23 = scalar_lea.vmem %s410_s1, %s386_s17 }
   0xe   : > { %v210_v0 = vld [vmem:[%s201_s20] sm:$0xf]  ;;  %s209_s30 = scalar_lea.vmem %s413_s4, %s386_s17 }
   0xf   : > { %v212_v1 = vld [vmem:[%s205_s23] sm:$0xf]  ;;  %v211_v2 = vunpack.c.l.bf16 %v210_v0 }
  0x10   : > { %v213_v3 = vunpack.c.l.bf16 %v212_v1 }
  0x12   : > { %v214_v4 = vadd.f32 %v213_v3, %v211_v2  ;;  %v341_v6 = vpop.eup %340 }
  0x13   : > { %v218_v7 = vmul.f32 128.0, %v341_v6  ;;  %vm222_vm0 = vweird.f32 %v341_v6 }
  0x14   : > { %215 = vadd.xlane.f32.xlu0 %v214_v4 }
  0x15   : > { %v219_v8 = vsub.f32 1.0, %v218_v7 }
  0x17   : > { %v220_v9 = vmul.f32 %v341_v6, %v219_v8 }
  0x19   : > { %v221_v10 = vadd.f32 %v341_v6, %v220_v9 }
  0x1b   : > { %v223_v11 = vsel %vm222_vm0, %v341_v6, %v221_v10 }
  0x87   : > { %v216_v12 = vpop.xlane.xlu0 %215 }
  0x88   : > { %v224_v13 = vmul.f32 %v223_v11, %v216_v12 }
  0x8a   : > { %v225_v14 = vsub.f32 %v214_v4, %v224_v13 }
  0x8c   : > { %v226_v15 = vmul.f32 %v225_v14, %v225_v14 }
  0x8e   : > { %227 = vadd.xlane.f32.xlu0 %v226_v15 }
 0x101   : > { %v228_v16 = vpop.xlane.xlu0 %227 }
 0x102   : > { %v229_v17 = vmul.f32 %v228_v16, %v223_v11 }
 0x104   : > { %v230_v18 = vadd.f32 1e-05, %v229_v17 }
 0x106   : > { %342 = vrsqrt.f32 %v230_v18  ;;  %vm237_vm2 = vweird.f32 %v230_v18 }
 0x10c   : > { %v343_v19 = vpop.eup %342 }
 0x10d   : > { %v232_v20 = vmul.f32 %v343_v19, %v230_v18  ;;  %vm238_vm1 = vweird.f32 %v343_v19 }
 0x10e   : > { %vm239_vm3 = vmor %vm237_vm2, %vm238_vm1 }
 0x10f   : > { %v233_v21 = vmul.f32 %v343_v19, %v232_v20 }
 0x111   : > { %v234_v22 = vmul.f32 0.5, %v233_v21 }
 0x113   : > { %v235_v23 = vsub.f32 1.5, %v234_v22 }
 0x115   : > { %v236_v24 = vmul.f32 %v343_v19, %v235_v23 }
 0x117   : > { %v240_v26 = vsel %vm239_vm3, %v343_v19, %v236_v24 }
 0x118   : > { %v241_v28 = vmul.f32 %v240_v26, %v225_v14 }
 0x11a   : > { %v246_v29 = vmul.f32 %v338_v25, %v241_v28 }
 0x11c   : > { %v251_v30 = vadd.f32 %v339_v27, %v246_v29 }
 0x11e   : > { %v252_v31 = vpack.c.bf16 %v251_v30, %v251_v30 }
 0x120   : > { %253 = vst [vmem:[%s209_s30] sm:$0xf] %v252_v31 }
 0x121 PF: > { %s14_s15 = sadd.s32 1, %s350_s15  }
 0x122   : > { %p11_p4 = scmp.ge.s32.totalorder %s14_s15, 4  }
 0x124   :  { %13 = sbr.rel (!%p11_p4) target bundleno = 1 (0x1), region = 69 }

// kernel: baseline_transformer_forward.52
= control target key start
LH: loop header
LB: loop body
LE: loop exit
PB: predicated region body
PF: predicated region fallthrough
CT: control target
= control target key end

     0   :  { %s576_s12 = smov 0   ;;  %s578_s13 = smov 0   ;;  %s636_s0 = inlined_call_operand.vmem [shape: bf16[16,128], index: 0, kind: input, shape index: {}]   ;;  %s637_s1 = inlined_call_operand.vmem [shape: bf16[128,128], index: 1, kind: input, shape index: {}]   ;;  %s638_s2 = inlined_call_operand.vmem [shape: f32[1,128], index: 2, kind: input, shape index: {}]   ;;  %s639_s3 = inlined_call_operand.vmem [shape: bf16[16,128], index: 3, kind: output, shape index: {}]  }
   0x1   :  { %s580_s14 = smov 0  }
   0x2 LB: > { %s32_s15 = sadd.s32 1, %s550_s13  ;;  %p462_p0 = scmp.ge.s32.totalorder %s554_s14, 1  ;;  %s554_s14 = sphi %s580_s14, %s13_s14   ;;  %s550_s13 = sphi %s578_s13, %s641_s13   ;;  %s546_s12 = sphi %s576_s12, %s640_s12  }
   0x3   : > { %p34_p1 = scmp.ge.s32.totalorder %s32_s15, 2  ;;  %p186_p2 = scmp.lt.s32.totalorder %s554_s14, 3 }
   0x5   : > { %s643_s15 = smov (%p34_p1, %s32_s15), 0  ;;  %p187_p3 = pnand %p462_p0, %p186_p2 }
   0x6   : > { %p225_p4 = scmp.lt.s32.totalorder (!%p187_p3), %s546_s12, 1 }
   0x7   : > { %190 = sbr.rel (%p187_p3) target bundleno = 178 (0xb2), region = 32 }
   0xc   : > { %v506_v0 = vld [vmem:[%s637_s1 + $0x38] sm:$0xff]  ;;  %v505_v1 = vld [vmem:[%s637_s1 + $0x30] sm:$0xff]  ;;  %v504_v2 = vld [vmem:[%s637_s1 + $0x28] sm:$0xff]  ;;  %s645_s12 = smov (!%p225_p4, %s546_s12), 1 }
   0xd   : > { %322 = vmatpush.bf16.msra.mxu0 %v506_v0  ;;  %v503_v3 = vld [vmem:[%s637_s1 + $0x20] sm:$0xff]  ;;  %v502_v4 = vld [vmem:[%s637_s1 + $0x18] sm:$0xff]  ;;  %v501_v5 = vld [vmem:[%s637_s1 + $0x10] sm:$0xff]  ;;  %s463_s30 = sshll.u32 %s645_s12, 2 }
   0xe   : > { %v500_v6 = vld [vmem:[%s637_s1 + $0x8] sm:$0xff]  ;;  %v499_v7 = vld [vmem:[%s637_s1] sm:$0xff]  ;;  %s231_s8 = scalar_lea.vmem %s636_s0, %s463_s30  ;;  %s250_s16 = scalar_lea.vmem %s639_s3, %s463_s30 }
   0xf   : > { %v257_v8 = vld [vmem:[%s231_s8] sm:$0xf] }
  0x10   : > { %v531_v9 = vld [vmem:[%s638_s2] ss:$0 sm:$0xff] }
  0x11   : > { %323 = vmatpush.bf16.msra.mxu0 %v505_v1 }
  0x15   : > { %324 = vmatpush.bf16.msra.mxu0 %v504_v2 }
  0x19   : > { %325 = vmatpush.bf16.msra.mxu0 %v503_v3 }
  0x1d   : > { %326 = vmatpush.bf16.msra.mxu0 %v502_v4 }
  0x21   : > { %327 = vmatpush.bf16.msra.mxu0 %v501_v5 }
  0x25   : > { %328 = vmatpush.bf16.msra.mxu0 %v500_v6 }
  0x29   : > { %329 = vmatpush.bf16.msra.mxu0 %v499_v7 }
  0x2c   : > { %330 = vmatmul.bf16.vlgmr.msra.gmra.mxu0 %v257_v8 }
  0xa9   : > { %v331_v10 = vpop.f32.mrf.mxu0 }
  0xaa   : > { %v345_v11 = vadd.f32 %v531_v9, %v331_v10 }
  0xac   : > { %v346_v12 = vpack.c.bf16 %v345_v11, %v345_v11 }
  0xae   : > { %347 = vst [vmem:[%s250_s16] sm:$0xf] %v346_v12 }
  0xb1   : > { %v333_v13 = vpop.f32.mrf.mxu0 }
  0xb2 PF: > { %s13_s14 = sadd.s32 1, %s554_s14   ;;  %s640_s12 = smov %s550_s13 }
  0xb3   : > { %p10_p5 = scmp.ge.s32.totalorder %s13_s14, 4   ;;  %s641_s13 = smov %s643_s15 }
  0xb5   :  { %12 = sbr.rel (!%p10_p5) target bundleno = 2 (0x2), region = 76 }

// kernel: baseline_transformer_forward.50
= control target key start
LH: loop header
LB: loop body
LE: loop exit
PB: predicated region body
PF: predicated region fallthrough
CT: control target
= control target key end

     0   :  { %8 = vsyncpa [#allocation4], 0  ;;  %s864_s12 = smov 0   ;;  %s866_s13 = smov 0   ;;  %s912_s0 = inlined_call_operand.vmem [shape: bf16[16,128], index: 0, kind: input, shape index: {}]   ;;  %s913_s1 = inlined_call_operand.hbm [shape: bf16[128,384], index: 1, kind: input, shape index: {}]   ;;  %s914_s2 = inlined_call_operand.vmem [shape: f32[1,384], index: 2, kind: input, shape index: {}]   ;;  %s915_s3 = inlined_call_operand.vmem [shape: bf16[16,384], index: 3, kind: output, shape index: {}]  }
   0x1   :  { %s868_s14 = smov 0  }
   0x2 LB: > { %s613_s15 = sadd.s32 4294967295, %s839_s14   ;;  %s33_s16 = sadd.s32 1, %s835_s13  ;;  %s839_s14 = sphi %s868_s14, %s14_s14   ;;  %s835_s13 = sphi %s866_s13, %s917_s13   ;;  %s831_s12 = sphi %s864_s12, %s916_s12  }
   0x3   : > { %p35_p0 = scmp.ge.s32.totalorder %s33_s16, 2  ;;  %p615_p1 = scmp.ge.s32.totalorder %s839_s14, 1 }
   0x4   : > { %p148_p2 = scmp.lt.s32.totalorder %s839_s14, 3  ;;  %p754_p4 = scmp.eq.s32.totalorder %s613_s15, 0 }
   0x5   : > { %s919_s16 = smov (%p35_p0, %s33_s16), 0  ;;  %s165_s19 = sshll.u32 %s913_s1, 4  ;;  %s166_s19 = int_to_ptr.hbm [resolvable:$true] %s165_s19 }
   0x6   : > { %p149_p3 = pnand %p615_p1, %p148_p2  ;;  %s841_s20 = smov [#allocation3]  }
   0x7   : > { %s167_s21 = sshll.u32 %s841_s20, 4  ;;  %s842_s22 = smov 192   ;;  %s168_s21 = int_to_ptr.vmem [resolvable:$true] %s167_s21 }
   0x8   : > { %p750_p5 = pneg %p149_p3  ;;  %s843_s23 = smov 12  }
   0x9   : > { %201 = sbr.rel (%p149_p3) target bundleno = 191 (0xbf), region = 32 }
   0xa   : > { %p751_p6 = pnand %p754_p4, %p750_p5 }
   0xc   : > { %753 = dma.hbm_to_vmem [thread:$0]  (!%p751_p6), %s166_s19, 3072, %s168_s21, [#allocation4], %s842_s22, %s842_s22, %s843_s23  }
   0xe   : > { %826 = dma.done.wait (%p754_p4), [#allocation4], 3072  }
   0xf   : > { %828 = vsyncadd (%p754_p4), [#allocation4], 4294964224  ;;  %v709_v0 = vld [vmem:[#allocation3 + $0xa8] sm:$0xf]  ;;  %v743_v1 = vld [vmem:[#allocation3 + $0xb0] sm:$0xf0] }
  0x10   : > { %v742_v2 = vld [vmem:[#allocation3 + $0xac] sm:$0xf]  ;;  %v710_v3 = vor.u32 %v743_v1, %v709_v0  ;;  %v711_v4 = vld [vmem:[#allocation3 + $0xb4] sm:$0xf0]  ;;  %v717_v5 = vld [vmem:[#allocation3 + $0xb0] sm:$0xf] }
  0x11   : > { %v744_v6 = vld [vmem:[#allocation3 + $0xb8] sm:$0xf0]  ;;  %v714_v7 = vor.u32 %v742_v2, %v711_v4  ;;  %v697_v9 = vld [vmem:[#allocation3 + $0x90] sm:$0xf]  ;;  %v739_v11 = vld [vmem:[#allocation3 + $0x94] sm:$0xf] }
  0x12   : > { %v718_v8 = vor.u32 %v744_v6, %v717_v5  ;;  %v740_v10 = vld [vmem:[#allocation3 + $0x98] sm:$0xf0]  ;;  %431 = vmatpush.bf16.msra.mxu0 %v710_v3  ;;  %v699_v13 = vld [vmem:[#allocation3 + $0x9c] sm:$0xf0]  ;;  %v705_v14 = vld [vmem:[#allocation3 + $0x98] sm:$0xf] }
  0x13   : > { %v698_v12 = vor.u32 %v740_v10, %v697_v9  ;;  %v741_v15 = vld [vmem:[#allocation3 + $0xa0] sm:$0xf0]  ;;  %444 = vmatpush.bf16.msra.mxu1 %v714_v7  ;;  %v702_v16 = vor.u32 %v739_v11, %v699_v13  ;;  %v685_v18 = vld [vmem:[#allocation3 + $0x78] sm:$0xf]  ;;  %v736_v20 = vld [vmem:[#allocation3 + $0x7c] sm:$0xf] }
  0x14   : > { %457 = vmatpush.bf16.msra.mxu2 %v718_v8  ;;  %v706_v17 = vor.u32 %v741_v15, %v705_v14  ;;  %v737_v19 = vld [vmem:[#allocation3 + $0x80] sm:$0xf0]  ;;  %v687_v21 = vld [vmem:[#allocation3 + $0x84] sm:$0xf0]  ;;  %v693_v22 = vld [vmem:[#allocation3 + $0x80] sm:$0xf] }
  0x15   : > { %v738_v23 = vld [vmem:[#allocation3 + $0x88] sm:$0xf0]  ;;  %v686_v24 = vor.u32 %v737_v19, %v685_v18  ;;  %v690_v25 = vor.u32 %v736_v20, %v687_v21  ;;  %v673_v27 = vld [vmem:[#allocation3 + $0x60] sm:$0xf]  ;;  %v733_v29 = vld [vmem:[#allocation3 + $0x64] sm:$0xf] }
  0x16   : > { %432 = vmatpush.bf16.msra.mxu0 %v698_v12  ;;  %v694_v26 = vor.u32 %v738_v23, %v693_v22  ;;  %v734_v28 = vld [vmem:[#allocation3 + $0x68] sm:$0xf0]  ;;  %v675_v30 = vld [vmem:[#allocation3 + $0x6c] sm:$0xf0]  ;;  %v681_v31 = vld [vmem:[#allocation3 + $0x68] sm:$0xf] }
  0x17   : > { %445 = vmatpush.bf16.msra.mxu1 %v702_v16  ;;  %v735_v32 = vld [vmem:[#allocation3 + $0x70] sm:$0xf0]  ;;  %v674_v33 = vor.u32 %v734_v28, %v673_v27  ;;  %v678_v34 = vor.u32 %v733_v29, %v675_v30  ;;  %v661_v36 = vld [vmem:[#allocation3 + $0x48] sm:$0xf]  ;;  %v730_v38 = vld [vmem:[#allocation3 + $0x4c] sm:$0xf] }
  0x18   : > { %458 = vmatpush.bf16.msra.mxu2 %v706_v17  ;;  %v682_v35 = vor.u32 %v735_v32, %v681_v31  ;;  %v731_v37 = vld [vmem:[#allocation3 + $0x50] sm:$0xf0]  ;;  %v663_v39 = vld [vmem:[#allocation3 + $0x54] sm:$0xf0]  ;;  %v669_v40 = vld [vmem:[#allocation3 + $0x50] sm:$0xf] }
  0x19   : > { %v732_v41 = vld [vmem:[#allocation3 + $0x58] sm:$0xf0]  ;;  %v662_v42 = vor.u32 %v731_v37, %v661_v36  ;;  %p236_p7 = scmp.lt.s32.totalorder %s831_s12, 1  ;;  %v666_v43 = vor.u32 %v730_v38, %v663_v39  ;;  %v649_v45 = vld [vmem:[#allocation3 + $0x30] sm:$0xf] }
  0x1a   : > { %433 = vmatpush.bf16.msra.mxu0 %v686_v24  ;;  %v670_v44 = vor.u32 %v732_v41, %v669_v40  ;;  %v728_v46 = vld [vmem:[#allocation3 + $0x38] sm:$0xf0]  ;;  %v727_v47 = vld [vmem:[#allocation3 + $0x34] sm:$0xf]  ;;  %v651_v48 = vld [vmem:[#allocation3 + $0x3c] sm:$0xf0] }
  0x1b   : > { %446 = vmatpush.bf16.msra.mxu1 %v690_v25  ;;  %v657_v49 = vld [vmem:[#allocation3 + $0x38] sm:$0xf]  ;;  %v729_v50 = vld [vmem:[#allocation3 + $0x40] sm:$0xf0]  ;;  %v650_v51 = vor.u32 %v728_v46, %v649_v45  ;;  %s921_s12 = smov (!%p236_p7, %s831_s12), 1  ;;  %v654_v52 = vor.u32 %v727_v47, %v651_v48 }
  0x1c   : > { %459 = vmatpush.bf16.msra.mxu2 %v694_v26  ;;  %v658_v53 = vor.u32 %v729_v50, %v657_v49  ;;  %v637_v54 = vld [vmem:[#allocation3 + $0x18] sm:$0xf]  ;;  %v725_v55 = vld [vmem:[#allocation3 + $0x20] sm:$0xf0]  ;;  %v724_v56 = vld [vmem:[#allocation3 + $0x1c] sm:$0xf] }
  0x1d   : > { %v639_v57 = vld [vmem:[#allocation3 + $0x24] sm:$0xf0]  ;;  %v645_v58 = vld [vmem:[#allocation3 + $0x20] sm:$0xf]  ;;  %v726_v59 = vld [vmem:[#allocation3 + $0x28] sm:$0xf0]  ;;  %v638_v60 = vor.u32 %v725_v55, %v637_v54 }
  0x1e   : > { %434 = vmatpush.bf16.msra.mxu0 %v674_v33  ;;  %s621_s24 = sshll.u32 %s921_s12, 2  ;;  %v642_v61 = vor.u32 %v724_v56, %v639_v57  ;;  %v646_v62 = vor.u32 %v726_v59, %v645_v58  ;;  %v625_v63 = vld [vmem:[#allocation3] sm:$0xf]  ;;  %v722_v0 = vld [vmem:[#allocation3 + $0x8] sm:$0xf0]  ;;  %s745_s30 = smul.u32 12, %s921_s12 }
  0x1f   : > { %447 = vmatpush.bf16.msra.mxu1 %v678_v34  ;;  %v721_v1 = vld [vmem:[#allocation3 + $0x4] sm:$0xf]  ;;  %v627_v2 = vld [vmem:[#allocation3 + $0xc] sm:$0xf0]  ;;  %v633_v3 = vld [vmem:[#allocation3 + $0x8] sm:$0xf]  ;;  %v626_v5 = vor.u32 %v722_v0, %v625_v63  ;;  %s242_s27 = scalar_lea.vmem %s912_s0, %s621_s24 }
  0x20   : > { %460 = vmatpush.bf16.msra.mxu2 %v682_v35  ;;  %v723_v4 = vld [vmem:[#allocation3 + $0x10] sm:$0xf0]  ;;  %v630_v6 = vor.u32 %v721_v1, %v627_v2  ;;  %v270_v8 = vld [vmem:[%s242_s27] sm:$0xf]  ;;  %s258_s6 = scalar_lea.vmem %s915_s3, %s745_s30 }
  0x21   : > { %v634_v7 = vor.u32 %v723_v4, %v633_v3  ;;  %v482_v9 = vld [vmem:[%s914_s2] sm:$0x7] }
  0x22   : > { %435 = vmatpush.bf16.msra.mxu0 %v662_v42  ;;  %v484_v10 = vperm.slane %v482_v9, 0  ;;  %v485_v11 = vperm.slane %v482_v9, 1  ;;  %v486_v17 = vperm.slane %v482_v9, 2 }
  0x23   : > { %448 = vmatpush.bf16.msra.mxu1 %v666_v43 }
  0x24   : > { %461 = vmatpush.bf16.msra.mxu2 %v670_v44 }
  0x26   : > { %436 = vmatpush.bf16.msra.mxu0 %v650_v51 }
  0x27   : > { %449 = vmatpush.bf16.msra.mxu1 %v654_v52 }
  0x28   : > { %462 = vmatpush.bf16.msra.mxu2 %v658_v53 }
  0x2a   : > { %437 = vmatpush.bf16.msra.mxu0 %v638_v60 }
  0x2b   : > { %450 = vmatpush.bf16.msra.mxu1 %v642_v61 }
  0x2c   : > { %463 = vmatpush.bf16.msra.mxu2 %v646_v62 }
  0x2e   : > { %438 = vmatpush.bf16.msra.mxu0 %v626_v5 }
  0x2f   : > { %451 = vmatpush.bf16.msra.mxu1 %v630_v6 }
  0x30   : > { %464 = vmatpush.bf16.msra.mxu2 %v634_v7 }
  0x31   : > { %439 = vmatmul.bf16.vlgmr.msra.gmra.mxu0 %v270_v8 }
  0x32   : > { %452 = vmatmul.bf16.vlgmr.msra.gmra.mxu1 %v270_v8 }
  0x33   : > { %465 = vmatmul.bf16.vlgmr.msra.gmra.mxu2 %v270_v8 }
  0xae   : > { %v440_v12 = vpop.f32.mrf.mxu0 }
  0xaf   : > { %v490_v13 = vadd.f32 %v484_v10, %v440_v12  ;;  %v453_v14 = vpop.f32.mrf.mxu1 }
  0xb0   : > { %v491_v15 = vadd.f32 %v485_v11, %v453_v14 }
  0xb2   : > { %v493_v16 = vpack.c.bf16 %v491_v15, %v490_v13 }
  0xb4   : > { %495 = vst [vmem:[%s258_s6] sm:$0xff] %v493_v16 }
  0xb6   : > { %v466_v18 = vpop.f32.mrf.mxu2  ;;  %v442_v20 = vpop.f32.mrf.mxu0 }
  0xb7   : > { %v492_v19 = vadd.f32 %v486_v17, %v466_v18  ;;  %v455_v21 = vpop.f32.mrf.mxu1 }
  0xb9   : > { %v494_v22 = vpack.c.bf16 %v492_v19, %v492_v19 }
  0xbb   : > { %496 = vst [vmem:[%s258_s6 + $0x8] sm:$0xf] %v494_v22 }
  0xbe   : > { %v468_v23 = vpop.f32.mrf.mxu2 }
  0xbf PF: > { %s14_s14 = sadd.s32 1, %s839_s14   ;;  %s916_s12 = smov %s835_s13 }
  0xc0   : > { %p11_p8 = scmp.ge.s32.totalorder %s14_s14, 4   ;;  %s917_s13 = smov %s919_s16 }
  0xc2   :  { %13 = sbr.rel (!%p11_p8) target bundleno = 2 (0x2), region = 79 }
  0xc7   :  { %527 = vsyncpa [#allocation4], 1 }
  0xc8   :  { %529 = vsyncpa [#allocation4 + $0x1], 1 }

// kernel: baseline_transformer_forward.51
= control target key start
LH: loop header
LB: loop body
LE: loop exit
PB: predicated region body
PF: predicated region fallthrough
CT: control target
= control target key end

     0   :  { %s1035_s15 = smov 0   ;;  %s1037_s16 = smov 0   ;;  %s1213_s0 = inlined_call_operand.vmem [shape: bf16[2,8,384], index: 0, kind: input, shape index: {}, may-alias: {0,1,2}]   ;;  %s1214_s1 = inlined_call_operand.vmem [shape: bf16[2,8,384], index: 1, kind: input, shape index: {}, may-alias: {0,1,2}]   ;;  %s1215_s2 = inlined_call_operand.vmem [shape: bf16[2,8,384], index: 2, kind: input, shape index: {}, may-alias: {0,1,2}]   ;;  %s1216_s3 = inlined_call_operand.vmem [shape: f32[2,1,8], index: 3, kind: input, shape index: {}]   ;;  %s1217_s4 = inlined_call_operand.vmem [shape: bf16[2,8,128], index: 4, kind: output, shape index: {}]  }
   0x1   :  { %s1039_s17 = smov 0  }
   0x2 LB: > { %s33_s18 = sadd.s32 1, %s995_s16  ;;  %p895_p0 = scmp.ge.s32.totalorder %s999_s17, 1  ;;  %s999_s17 = sphi %s1039_s17, %s14_s17   ;;  %s995_s16 = sphi %s1037_s16, %s1219_s16   ;;  %s991_s15 = sphi %s1035_s15, %s1218_s15  }
   0x3   : > { %p35_p1 = scmp.ge.s32.totalorder %s33_s18, 2  ;;  %p236_p2 = scmp.lt.s32.totalorder %s999_s17, 3 }
   0x5   : > { %s1221_s18 = smov (%p35_p1, %s33_s18), 0  ;;  %p237_p3 = pnand %p895_p0, %p236_p2 }
   0x6   : > { %p294_p4 = scmp.lt.s32.totalorder (!%p237_p3), %s991_s15, 1  ;;  %s1002_s29 = smov (!%p237_p3), 64  }
   0x7   : > { %240 = sbr.rel (%p237_p3) target bundleno = 1103 (0x44f), region = 36  ;;  %s1003_s30 = smov (!%p237_p3), 96  }
   0x8   : > { %s1004_s5 = smov (!%p237_p3), 32  }
   0xc   : > { %s1223_s15 = smov (!%p294_p4, %s991_s15), 1  ;;  %vm365_vm0 = vcmask 261120   ;;  %vm341_vm1 = vcmask 31744   ;;  %v1001_v3 = vmov -1e+30   ;;  %v347_v4 = vlaneseq }
   0xd   : > { %s1056_s19 = smul.u32 12, %s1223_s15  ;;  %s328_s22 = scalar_lea.vmem %s1216_s3, %s1223_s15  ;;  %342 = vst.msk [vmem:[#allocation2] sm:$0xff] %vm341_vm1, %v1001_v3  ;;  %vm386_vm3 = vcmask 64512   ;;  %v1005_v18 = vmov 0   ;;  %v1006_v19 = vmov 0.0   ;;  %vm408_vm4 = vcmask 7168  }
   0xe   : > { %v348_v5 = vshrl.u32 %v347_v4, 7  ;;  %v353_v6 = vand.u32 127, %v347_v4  ;;  %v958_v7 = vld [vmem:[%s328_s22] ss:$0 sm:$0xff]  ;;  %946 = vset.pattern.permute.xlu1 %v1005_v18  ;;  %344 = vst [vmem:[#allocation4] sm:$0xff] %v1006_v19  ;;  %vm421_vm5 = vcmask 1043456  }
   0xf   : > { %s823_s25 = scalar_lea.vmem %s1214_s1, %s1056_s19  ;;  %s302_s28 = scalar_lea.vmem %s1213_s0, %s1056_s19  ;;  %343 = vst.msk [vmem:[#allocation3] sm:$0xff] %vm341_vm1, %v1006_v19  ;;  %v1007_v56 = vmov 1   ;;  %v1008_v57 = vmov 2   ;;  %v1009_v58 = vmov 3   ;;  %vm492_vm6 = vcmask 15368  }
  0x10   : > { %v900_v0 = vld [vmem:[%s823_s25 + $0x4] sm:$0xf]  ;;  %v362_v2 = vld [vmem:[%s302_s28] sm:$0xf]  ;;  %vm356_vm2 = vcmp.le.s32.totalorder %v353_v6, %v348_v5  ;;  %s829_s8 = scalar_lea.vmem %s1215_s2, %s1056_s19  ;;  %947 = vset.pattern.permute.xlu2 %v1007_v56  ;;  %948 = vset.pattern.permute.xlu0 %v1008_v57  ;;  %vm579_vm7 = vcmask 23568   ;;  %vm663_vm8 = vcmask 31768  }
  0x11   : > { %v370_v1 = vsel %vm365_vm0, %v900_v0, 0  ;;  %v357_v8 = vsel %vm356_vm2, 0.0, %v1001_v3  ;;  %v447_v13 = vunpack.c.l.b16 %v900_v0  ;;  %v442_v16 = vunpack.c.l.b16 %v362_v2  ;;  %v901_v26 = vld [vmem:[%s829_s8 + $0x8] sm:$0xf]  ;;  %s899_s9 = sshll.u32 %s1223_s15, 2 }
  0x12   : > { %379 = vmatpush.bf16.xpose.msra.mxu0 %v370_v1  ;;  %v1073_v9 = vadd.f32 %v958_v7, %v357_v8  ;;  %v423_v27 = vsel %vm421_vm5, %v901_v26, 0  ;;  %v503_v53 = vunpack.c.l.b16 %v901_v26  ;;  %vm531_vm9 = vcmask 523520   ;;  %s335_s12 = scalar_lea.vmem %s1217_s4, %s899_s9 }
  0x13   : > { %v448_v15 = vpack.c.b16 %v447_v13, %v447_v13  ;;  %v443_v17 = vpack.c.b16 %v442_v16, %v442_v16  ;;  %432 = vmatpush.bf16.msra.mxu1 %v423_v27  ;;  %vm615_vm10 = vcmask 785920   ;;  %vm699_vm11 = vcmask 1048320  }
  0x14   : > { %v1083_v20 = vld [vmem:[#allocation2] sm:$0xff]  ;;  %v504_v55 = vpack.c.b16 %v503_v53, %v503_v53 }
  0x15   : > { %536 = vrot.lane.b32.xlu2 %v448_v15, %s1002_s29 }
  0x19   : > { %902 = vmatmul.msk.bf16.vlgmr.msra.gmra.mxu0 %vm365_vm0, %v362_v2 }
  0x1d   : > { %534 = vrot.lane.b32.xlu2 %v443_v17, %s1002_s29 }
  0x25   : > { %618 = vrot.lane.b32.xlu2 %v443_v17, %s1004_s5 }
  0x6f   : > { %v537_v28 = vpop.permute.xlu2 %536 }
  0x70   : > { %v542_v29 = vsel %vm365_vm0, %v537_v28, 0 }
  0x71   : > { %551 = vmatpush.bf16.xpose.msrb.mxu1 %v542_v29 }
  0x77   : > { %v535_v36 = vpop.permute.xlu2 %534 }
  0x7f   : > { %v619_v39 = vpop.permute.xlu2 %618 }
  0x96   : > { %v381_v10 = vpop.f32.mrf.mxu0 }
  0x97   : > { %v382_v11 = vadd.f32 %v381_v10, %v1073_v9 }
  0x99   : > { %v387_v12 = vsel %vm386_vm3, %v382_v11, -inf }
  0x9a   : > { %388 = vmax.xlane.f32.xlu0 %v387_v12 }
  0x9e   : > { %v383_v14 = vpop.f32.mrf.mxu0 }
  0xae   : > { %449 = vrot.lane.b32.xlu0 %v448_v15, %s1003_s30 }
 0x10d   : > { %v389_v21 = vpop.xlane.xlu0 %388 }
 0x10e   : > { %v1086_v22 = vmax.f32 %v1083_v20, %v389_v21 }
 0x110   : > { %v391_v23 = vsub.f32 %v1083_v20, %v1086_v22  ;;  %440 = vst.msk [vmem:[#allocation2] sm:$0xff] %vm408_vm4, %v1086_v22  ;;  %396 = vperm.xlu1 %946, %v1086_v22  }
 0x112   : > { %v392_v1 = vmul.f32 1.442695, %v391_v23 }
 0x117   : > { %v470_v59 = vld [vmem:[#allocation2] sm:$0xff] }
 0x118   : > { %444 = vrot.lane.b32.xlu1 %v443_v17, %s1003_s30 }
 0x119   : > { %949 = vset.pattern.permute.xlu1 %v1009_v58 }
 0x120   : > { %620 = vrot.lane.b32.xlu1 %v448_v15, %s1004_s5  ;;  %v450_v24 = vpop.permute.xlu0 %449 }
 0x121   : > { %v455_v25 = vsel %vm365_vm0, %v450_v24, 0 }
 0x122   : > { %464 = vmatpush.bf16.xpose.msra.mxu2 %v455_v25 }
 0x182   : > { %v397_v30 = vpop.permute.xlu1 %396 }
 0x183   : > { %v399_v31 = vsub.f32 %v382_v11, %v397_v30 }
 0x185   : > { %v400_v32 = vmul.f32 1.442695, %v399_v31 }
 0x187   : > { %959 = vpow2.f32 %v400_v32 }
 0x188   : > { %961 = vpow2.f32 %v392_v1 }
 0x18a   : > { %v445_v33 = vpop.permute.xlu1 %444 }
 0x18b   : > { %904 = vmatmul.msk.bf16.vlgmr.msra.gmra.mxu2 %vm365_vm0, %v445_v33 }
 0x18d   : > { %v1103_v34 = vpop.eup %959 }
 0x18e   : > { %v417_v35 = vpack.c.bf16 %v1103_v34, %v1103_v34  ;;  %v962_v6 = vpop.eup %961 }
 0x190   : > { %903 = vmatmul.msk.bf16.vlgmr.msra.gmra.mxu1 %vm386_vm3, %v417_v35 }
 0x192   : > { %v621_v37 = vpop.permute.xlu1 %620 }
 0x193   : > { %v626_v38 = vsel %vm365_vm0, %v621_v37, 0 }
 0x194   : > { %635 = vmatpush.bf16.xpose.msrb.mxu0 %v626_v38 }
 0x19b   : > { %908 = vmatmul.msk.bf16.vlgmr.msrb.gmra.mxu0 %vm365_vm0, %v619_v39 }
 0x1a0   : > { %906 = vmatmul.msk.bf16.vlgmr.msrb.gmra.mxu1 %vm365_vm0, %v535_v36 }
 0x20d   : > { %v1111_v40 = vpop.f32.mrf.mxu1 }
 0x20e   : > { %v466_v41 = vpop.f32.mrf.mxu2 }
 0x20f   : > { %v1114_v42 = vadd.f32 %v466_v41, %v1073_v9 }
 0x211   : > { %v471_v43 = vsel %vm386_vm3, %v1114_v42, -inf }
 0x212   : > { %472 = vmax.xlane.f32.xlu1 %v471_v43 }
 0x215   : > { %v436_v44 = vpop.f32.mrf.mxu1 }
 0x216   : > { %v468_v45 = vpop.f32.mrf.mxu2 }
 0x218   : > { %v637_v46 = vpop.f32.mrf.mxu0 }
 0x219   : > { %v1119_v47 = vadd.f32 %v637_v46, %v1073_v9 }
 0x21b   : > { %v642_v48 = vsel %vm386_vm3, %v1119_v47, -inf }
 0x21c   : > { %643 = vmax.xlane.f32.xlu0 %v642_v48 }
 0x21d   : > { %v553_v49 = vpop.f32.mrf.mxu1 }
 0x21e   : > { %v1124_v50 = vadd.f32 %v553_v49, %v1073_v9  ;;  %v404_v9 = vsel %vm386_vm3, %v1103_v34, 0.0 }
 0x220   : > { %v558_v51 = vsel %vm386_vm3, %v1124_v50, -inf  ;;  %v639_v52 = vpop.f32.mrf.mxu0 }
 0x221   : > { %559 = vmax.xlane.f32.xlu2 %v558_v51 }
 0x225   : > { %v555_v54 = vpop.f32.mrf.mxu1 }
 0x22b   : > { %505 = vrot.lane.b32.xlu1 %v504_v55, %s1003_s30 }
 0x285   : > { %v473_v60 = vpop.xlane.xlu1 %472 }
 0x286   : > { %v474_v61 = vmax.f32 %v470_v59, %v473_v60 }
 0x288   : > { %v475_v62 = vsub.f32 %v470_v59, %v474_v61  ;;  %533 = vst.msk [vmem:[#allocation2] sm:$0xff] %vm492_vm6, %v474_v61  ;;  %480 = vperm.xlu2 %947, %v474_v61  }
 0x28a   : > { %v476_v12 = vmul.f32 1.442695, %v475_v62 }
 0x28c   : > { %963 = vpow2.f32 %v476_v12 }
 0x28f   : > { %v1134_v0 = vld [vmem:[#allocation2] sm:$0xff]  ;;  %v644_v4 = vpop.xlane.xlu0 %643 }
 0x290   : > { %589 = vrot.lane.b32.xlu2 %v504_v55, %s1002_s29 }
 0x291   : > { %950 = vset.pattern.permute.xlu2 %v1005_v18 }
 0x292   : > { %v964_v14 = vpop.eup %963 }
 0x294   : > { %v560_v63 = vpop.xlane.xlu2 %559 }
 0x295   : > { %v1140_v2 = vmax.f32 %v1134_v0, %v560_v63 }
 0x297   : > { %v562_v3 = vsub.f32 %v1134_v0, %v1140_v2  ;;  %617 = vst.msk [vmem:[#allocation2] sm:$0xff] %vm579_vm7, %v1140_v2  ;;  %567 = vperm.xlu0 %948, %v1140_v2  }
 0x298   : > { %673 = vrot.lane.b32.xlu2 %v504_v55, %s1004_s5 }
 0x29d   : > { %v506_v10 = vpop.permute.xlu1 %505 }
 0x29e   : > { %v1148_v5 = vld [vmem:[#allocation2] sm:$0xff]  ;;  %v511_v11 = vsel %vm421_vm5, %v506_v10, 0 }
 0x29f   : > { %v1151_v7 = vmax.f32 %v1148_v5, %v644_v4  ;;  %520 = vmatpush.bf16.msra.mxu3 %v511_v11 }
 0x2a0   : > { %413 = vperm.xlu2 %950, %v962_v6  }
 0x2a1   : > { %v646_v8 = vsub.f32 %v1148_v5, %v1151_v7  ;;  %701 = vst.msk [vmem:[#allocation2] sm:$0xff] %vm663_vm8, %v1151_v7  ;;  %651 = vperm.xlu1 %949, %v1151_v7  }
 0x2a8   : > { %955 = vset.pattern.permute.xlu2 %v1008_v57 }
 0x2a9   : > { %951 = vset.pattern.permute.xlu1 %v1007_v56 }
 0x2cb   : > { %405 = vadd.xlane.f32.xlu1 %v404_v9 }
 0x2e2   : > { %v481_v13 = vpop.permute.xlu2 %480 }
 0x2e3   : > { %v483_v15 = vsub.f32 %v1114_v42, %v481_v13  ;;  %v402_v42 = vld [vmem:[#allocation3] sm:$0xff] }
 0x2e4   : > { %497 = vperm.xlu1 %951, %v964_v14   ;;  %v403_v43 = vmul.f32 %v962_v6, %v402_v42 }
 0x2e5   : > { %v484_v16 = vmul.f32 1.442695, %v483_v15 }
 0x2e7   : > { %965 = vpow2.f32 %v484_v16 }
 0x2ea   : > { %v590_v17 = vpop.permute.xlu2 %589 }
 0x2eb   : > { %v595_v19 = vsel %vm421_vm5, %v590_v17, 0 }
 0x2ec   : > { %604 = vmatpush.bf16.msrb.mxu3 %v595_v19  ;;  %952 = vset.pattern.permute.xlu1 %v1009_v58 }
 0x2ed   : > { %v966_v20 = vpop.eup %965 }
 0x2ee   : > { %v488_v21 = vsel %vm386_vm3, %v966_v20, 0.0  ;;  %v501_v22 = vpack.c.bf16 %v966_v20, %v966_v20 }
 0x2ef   : > { %489 = vadd.xlane.f32.xlu0 %v488_v21 }
 0x2f0   : > { %905 = vmatmul.msk.bf16.vlgmr.msra.gmra.mxu3 %vm386_vm3, %v501_v22 }
 0x2f2   : > { %v674_v23 = vpop.permute.xlu2 %673 }
 0x2f3   : > { %v679_v24 = vsel %vm421_vm5, %v674_v23, 0 }
 0x2f4   : > { %688 = vmatpush.bf16.msrb.mxu2 %v679_v24 }
 0x2fa   : > { %v414_v25 = vpop.permute.xlu2 %413 }
 0x2fb   : > { %v416_v26 = vmul.f32 0.0, %v414_v25 }
 0x2fd   : > { %v438_v27 = vadd.f32 %v1111_v40, %v416_v26  ;;  %v563_v40 = vmul.f32 1.442695, %v562_v3 }
 0x2ff   : > { %439 = vst.msk [vmem:[#allocation4] sm:$0xff] %vm365_vm0, %v438_v27 }
 0x306   : > { %v494_v6 = vld [vmem:[#allocation4] sm:$0xff] }
 0x309   : > { %v568_v28 = vpop.permute.xlu0 %567 }
 0x30a   : > { %v570_v29 = vsub.f32 %v1124_v50, %v568_v28 }
 0x30c   : > { %v571_v30 = vmul.f32 1.442695, %v570_v29 }
 0x30e   : > { %967 = vpow2.f32 %v571_v30 }
 0x313   : > { %v652_v31 = vpop.permute.xlu1 %651 }
 0x314   : > { %v968_v32 = vpop.eup %967  ;;  %v654_v33 = vsub.f32 %v1119_v47, %v652_v31 }
 0x315   : > { %v575_v34 = vsel %vm386_vm3, %v968_v32, 0.0  ;;  %v588_v35 = vpack.c.bf16 %v968_v32, %v968_v32 }
 0x316   : > { %v655_v36 = vmul.f32 1.442695, %v654_v33  ;;  %576 = vadd.xlane.f32.xlu2 %v575_v34 }
 0x317   : > { %907 = vmatmul.msk.bf16.vlgmr.msrb.gmra.mxu3 %vm386_vm3, %v588_v35 }
 0x318   : > { %969 = vpow2.f32 %v655_v36 }
 0x319   : > { %971 = vpow2.f32 %v563_v40 }
 0x31e   : > { %v970_v37 = vpop.eup %969 }
 0x31f   : > { %v659_v38 = vsel %vm386_vm3, %v970_v37, 0.0  ;;  %v672_v39 = vpack.c.bf16 %v970_v37, %v970_v37  ;;  %v972_v41 = vpop.eup %971 }
 0x320   : > { %660 = vadd.xlane.f32.xlu0 %v659_v38 }
 0x321   : > { %909 = vmatmul.msk.bf16.vlgmr.msrb.gmra.mxu2 %vm386_vm3, %v672_v39 }
 0x334   : > { %584 = vperm.xlu0 %948, %v972_v41  }
 0x33c   : > { %953 = vset.pattern.permute.xlu0 %v1005_v18  ;;  %v647_v18 = vmul.f32 1.442695, %v646_v8 }
 0x33e   : > { %v406_v44 = vpop.xlane.xlu1 %405  ;;  %973 = vpow2.f32 %v647_v18 }
 0x33f   : > { %v407_v45 = vadd.f32 %v406_v44, %v403_v43 }
 0x341   : > { %409 = vst.msk [vmem:[#allocation3] sm:$0xff] %vm408_vm4, %v407_v45 }
 0x344   : > { %v974_v57 = vpop.eup %973 }
 0x348   : > { %v486_v46 = vld [vmem:[#allocation3] sm:$0xff] }
 0x349   : > { %v487_v47 = vmul.f32 %v964_v14, %v486_v46 }
 0x356   : > { %v498_v5 = vpop.permute.xlu1 %497 }
 0x357   : > { %v500_v7 = vmul.f32 %v498_v5, %v494_v6 }
 0x362   : > { %v490_v48 = vpop.xlane.xlu0 %489 }
 0x363   : > { %v491_v49 = vadd.f32 %v490_v48, %v487_v47 }
 0x365   : > { %493 = vst.msk [vmem:[#allocation3] sm:$0xff] %vm492_vm6, %v491_v49 }
 0x36c   : > { %v573_v52 = vld [vmem:[#allocation3] sm:$0xff] }
 0x36d   : > { %v574_v53 = vmul.f32 %v972_v41, %v573_v52 }
 0x373   : > { %v522_v50 = vpop.f32.mrf.mxu3 }
 0x374   : > { %527 = vrot.lane.b32.xlu2 %v522_v50, %s1004_s5 }
 0x37b   : > { %v524_v51 = vpop.f32.mrf.mxu3 }
 0x389   : > { %v577_v54 = vpop.xlane.xlu2 %576 }
 0x38a   : > { %v578_v55 = vadd.f32 %v577_v54, %v574_v53 }
 0x38c   : > { %580 = vst.msk [vmem:[#allocation3] sm:$0xff] %vm579_vm7, %v578_v55 }
 0x393   : > { %v657_v59 = vld [vmem:[#allocation3] sm:$0xff]  ;;  %v661_v61 = vpop.xlane.xlu0 %660 }
 0x394   : > { %v658_v60 = vmul.f32 %v974_v57, %v657_v59 }
 0x396   : > { %v662_v62 = vadd.f32 %v661_v61, %v658_v60 }
 0x398   : > { %664 = vst.msk [vmem:[#allocation3] sm:$0xff] %vm663_vm8, %v662_v62 }
 0x39a   : > { %v606_v63 = vpop.f32.mrf.mxu3 }
 0x39b   : > { %611 = vrot.lane.b32.xlu1 %v606_v63, %s1002_s29 }
 0x39f   : > { %v706_v0 = vld [vmem:[#allocation3] sm:$0xff] }
 0x3a0   : > { %975 = vrcp.f32 %v706_v0 }
 0x3a2   : > { %v608_v1 = vpop.f32.mrf.mxu3 }
 0x3a3   : > { %668 = vperm.xlu1 %952, %v974_v57  }
 0x3a4   : > { %v690_v2 = vpop.f32.mrf.mxu2 }
 0x3a5   : > { %695 = vrot.lane.b32.xlu2 %v690_v2, %s1003_s30 }
 0x3a6   : > { %v976_v3 = vpop.eup %975  ;;  %v585_v11 = vpop.permute.xlu0 %584 }
 0x3a7   : > { %710 = vperm.xlu0 %953, %v976_v3  }
 0x3ab   : > { %954 = vset.pattern.permute.xlu1 %v1007_v56 }
 0x3ac   : > { %v692_v4 = vpop.f32.mrf.mxu2  ;;  %720 = vperm.xlu1 %954, %v976_v3  }
 0x3ad   : > { %730 = vperm.xlu2 %955, %v976_v3  }
 0x3af   : > { %957 = vset.pattern.permute.xlu0 %v1009_v58 }
 0x3b4   : > { %956 = vset.pattern.permute.xlu1 %v1009_v58 }
 0x3b5   : > { %740 = vperm.xlu1 %956, %v976_v3  }
 0x3ce   : > { %v528_v8 = vpop.permute.xlu2 %527 }
 0x3cf   : > { %v530_v9 = vadd.f32 %v528_v8, %v500_v7 }
 0x3d1   : > { %532 = vst.msk [vmem:[#allocation4] sm:$0xff] %vm531_vm9, %v530_v9 }
 0x3d8   : > { %v581_v10 = vld [vmem:[#allocation4] sm:$0xff] }
 0x3d9   : > { %v587_v12 = vmul.f32 %v585_v11, %v581_v10 }
 0x3ff   : > { %v696_v16 = vpop.permute.xlu2 %695 }
 0x407   : > { %v731_v25 = vpop.permute.xlu2 %730 }
 0x40d   : > { %v612_v56 = vpop.permute.xlu1 %611 }
 0x40e   : > { %v614_v13 = vadd.f32 %v612_v56, %v587_v12 }
 0x410   : > { %616 = vst.msk [vmem:[#allocation4] sm:$0xff] %vm615_vm10, %v614_v13 }
 0x415   : > { %v669_v14 = vpop.permute.xlu1 %668 }
 0x417   : > { %v665_v15 = vld [vmem:[#allocation4] sm:$0xff] }
 0x418   : > { %v671_v58 = vmul.f32 %v669_v14, %v665_v15 }
 0x419   : > { %v711_v20 = vpop.permute.xlu0 %710 }
 0x41a   : > { %v698_v17 = vadd.f32 %v696_v16, %v671_v58 }
 0x41c   : > { %700 = vst.msk [vmem:[#allocation4] sm:$0xff] %vm699_vm11, %v698_v17 }
 0x41e   : > { %v721_v22 = vpop.permute.xlu1 %720 }
 0x423   : > { %v705_v19 = vld [vmem:[#allocation4] sm:$0xff] }
 0x424   : > { %v713_v21 = vmul.f32 %v711_v20, %v705_v19 }
 0x426   : > { %714 = vst.msk [vmem:[#allocation4] sm:$0xff] %vm365_vm0, %v713_v21 }
 0x427   : > { %v741_v28 = vpop.permute.xlu1 %740 }
 0x42d   : > { %v715_v23 = vld [vmem:[#allocation4] sm:$0xff] }
 0x42e   : > { %v723_v24 = vmul.f32 %v721_v22, %v715_v23 }
 0x430   : > { %724 = vst.msk [vmem:[#allocation4] sm:$0xff] %vm531_vm9, %v723_v24 }
 0x437   : > { %v725_v26 = vld [vmem:[#allocation4] sm:$0xff] }
 0x438   : > { %v733_v27 = vmul.f32 %v731_v25, %v725_v26 }
 0x43a   : > { %734 = vst.msk [vmem:[#allocation4] sm:$0xff] %vm615_vm10, %v733_v27 }
 0x441   : > { %v735_v29 = vld [vmem:[#allocation4] sm:$0xff] }
 0x442   : > { %v743_v30 = vmul.f32 %v741_v28, %v735_v29 }
 0x444   : > { %744 = vst.msk [vmem:[#allocation4] sm:$0xff] %vm699_vm11, %v743_v30 }
 0x44b   : > { %v745_v31 = vld [vmem:[#allocation4] sm:$0xff] }
 0x44c   : > { %v746_v32 = vpack.c.bf16 %v745_v31, %v745_v31 }
 0x44e   : > { %747 = vst [vmem:[%s335_s12] sm:$0xf] %v746_v32 }
 0x44f PF: > { %s14_s17 = sadd.s32 1, %s999_s17   ;;  %s1218_s15 = smov %s995_s16 }
 0x450   : > { %p11_p5 = scmp.ge.s32.totalorder %s14_s17, 4   ;;  %s1219_s16 = smov %s1221_s18 }
 0x452   :  { %13 = sbr.rel (!%p11_p5) target bundleno = 2 (0x2), region = 83 }

// kernel: baseline_transformer_forward.54
= control target key start
LH: loop header
LB: loop body
LE: loop exit
PB: predicated region body
PF: predicated region fallthrough
CT: control target
= control target key end

     0   :  { %8 = vsyncpa [#allocation4], 0  ;;  %s621_s12 = smov 0   ;;  %s623_s13 = smov 0   ;;  %s665_s0 = inlined_call_operand.vmem [shape: bf16[16,128], index: 0, kind: input, shape index: {}]   ;;  %s666_s1 = inlined_call_operand.hbm [shape: bf16[128,128], index: 1, kind: input, shape index: {}]   ;;  %s667_s2 = inlined_call_operand.vmem [shape: f32[1,128], index: 2, kind: input, shape index: {}]   ;;  %s668_s3 = inlined_call_operand.vmem [shape: bf16[16,128], index: 3, kind: output, shape index: {}]  }
   0x1   :  { %s625_s14 = smov 0  }
   0x2 LB: > { %s450_s15 = sadd.s32 4294967295, %s596_s14   ;;  %s33_s16 = sadd.s32 1, %s592_s13  ;;  %s596_s14 = sphi %s625_s14, %s14_s14   ;;  %s592_s13 = sphi %s623_s13, %s670_s13   ;;  %s588_s12 = sphi %s621_s12, %s669_s12  }
   0x3   : > { %p35_p0 = scmp.ge.s32.totalorder %s33_s16, 2  ;;  %p452_p1 = scmp.ge.s32.totalorder %s596_s14, 1 }
   0x4   : > { %p148_p2 = scmp.lt.s32.totalorder %s596_s14, 3  ;;  %p510_p4 = scmp.eq.s32.totalorder %s450_s15, 0 }
   0x5   : > { %s672_s16 = smov (%p35_p0, %s33_s16), 0  ;;  %s163_s19 = sshll.u32 %s666_s1, 4  ;;  %s164_s19 = int_to_ptr.hbm [resolvable:$true] %s163_s19 }
   0x6   : > { %p149_p3 = pnand %p452_p1, %p148_p2  ;;  %s598_s20 = smov [#allocation3]  }
   0x7   : > { %s165_s21 = sshll.u32 %s598_s20, 4  ;;  %s599_s22 = smov 64   ;;  %s166_s21 = int_to_ptr.vmem [resolvable:$true] %s165_s21 }
   0x8   : > { %p506_p5 = pneg %p149_p3  ;;  %s600_s23 = smov 4  }
   0x9   : > { %197 = sbr.rel (%p149_p3) target bundleno = 181 (0xb5), region = 32 }
   0xa   : > { %p507_p6 = pnand %p510_p4, %p506_p5 }
   0xc   : > { %509 = dma.hbm_to_vmem [thread:$0]  (!%p507_p6), %s164_s19, 1024, %s166_s21, [#allocation4], %s599_s22, %s599_s22, %s600_s23  }
   0xe   : > { %583 = dma.done.wait (%p510_p4), [#allocation4], 1024  }
   0xf   : > { %585 = vsyncadd (%p510_p4), [#allocation4], 4294966272  ;;  %v501_v0 = vld [vmem:[#allocation3 + $0x38] sm:$0xff]  ;;  %v500_v1 = vld [vmem:[#allocation3 + $0x30] sm:$0xff]  ;;  %p229_p7 = scmp.lt.s32.totalorder %s588_s12, 1 }
  0x10   : > { %318 = vmatpush.bf16.msra.mxu0 %v501_v0  ;;  %v499_v2 = vld [vmem:[#allocation3 + $0x28] sm:$0xff]  ;;  %v498_v3 = vld [vmem:[#allocation3 + $0x20] sm:$0xff]  ;;  %v497_v4 = vld [vmem:[#allocation3 + $0x18] sm:$0xff] }
  0x11   : > { %v496_v5 = vld [vmem:[#allocation3 + $0x10] sm:$0xff]  ;;  %s674_s12 = smov (!%p229_p7, %s588_s12), 1  ;;  %v495_v6 = vld [vmem:[#allocation3 + $0x8] sm:$0xff]  ;;  %v494_v7 = vld [vmem:[#allocation3] sm:$0xff] }
  0x12   : > { %s458_s24 = sshll.u32 %s674_s12, 2  ;;  %v539_v9 = vld [vmem:[%s667_s2] ss:$0 sm:$0xff] }
  0x13   : > { %s235_s27 = scalar_lea.vmem %s665_s0, %s458_s24  ;;  %s246_s5 = scalar_lea.vmem %s668_s3, %s458_s24 }
  0x14   : > { %319 = vmatpush.bf16.msra.mxu0 %v500_v1  ;;  %v253_v8 = vld [vmem:[%s235_s27] sm:$0xf] }
  0x18   : > { %320 = vmatpush.bf16.msra.mxu0 %v499_v2 }
  0x1c   : > { %321 = vmatpush.bf16.msra.mxu0 %v498_v3 }
  0x20   : > { %322 = vmatpush.bf16.msra.mxu0 %v497_v4 }
  0x24   : > { %323 = vmatpush.bf16.msra.mxu0 %v496_v5 }
  0x28   : > { %324 = vmatpush.bf16.msra.mxu0 %v495_v6 }
  0x2c   : > { %325 = vmatpush.bf16.msra.mxu0 %v494_v7 }
  0x2f   : > { %326 = vmatmul.bf16.vlgmr.msra.gmra.mxu0 %v253_v8 }
  0xac   : > { %v327_v10 = vpop.f32.mrf.mxu0 }
  0xad   : > { %v341_v11 = vadd.f32 %v539_v9, %v327_v10 }
  0xaf   : > { %v342_v12 = vpack.c.bf16 %v341_v11, %v341_v11 }
  0xb1   : > { %343 = vst [vmem:[%s246_s5] sm:$0xf] %v342_v12 }
  0xb4   : > { %v329_v13 = vpop.f32.mrf.mxu0 }
  0xb5 PF: > { %s14_s14 = sadd.s32 1, %s596_s14   ;;  %s669_s12 = smov %s592_s13 }
  0xb6   : > { %p11_p8 = scmp.ge.s32.totalorder %s14_s14, 4   ;;  %s670_s13 = smov %s672_s16 }
  0xb8   :  { %13 = sbr.rel (!%p11_p8) target bundleno = 2 (0x2), region = 79 }
  0xbd   :  { %369 = vsyncpa [#allocation4], 1 }
  0xbe   :  { %371 = vsyncpa [#allocation4 + $0x1], 1 }

// kernel: baseline_transformer_forward.41
= control target key start
LH: loop header
LB: loop body
LE: loop exit
PB: predicated region body
PF: predicated region fallthrough
CT: control target
= control target key end

     0   :  { %s782_s18 = smov 0   ;;  %s960_s0 = inlined_call_operand.vmem [shape: bf16[16,128], index: 0, kind: input, shape index: {}]   ;;  %s961_s1 = inlined_call_operand.vmem [shape: bf16[128,256], index: 1, kind: input, shape index: {}]   ;;  %s962_s2 = inlined_call_operand.vmem [shape: f32[1,256], index: 2, kind: input, shape index: {}]   ;;  %s963_s3 = inlined_call_operand.vmem [shape: bf16[256,128], index: 3, kind: input, shape index: {}]   ;;  %s964_s4 = inlined_call_operand.vmem [shape: f32[1,128], index: 4, kind: input, shape index: {}]   ;;  %s965_s5 = inlined_call_operand.vmem [shape: bf16[16,128], index: 5, kind: output, shape index: {}]  }
   0x1 LB: > { %s566_s19 = sadd.s32 4294967295, %s750_s18   ;;  %p570_p0 = scmp.ge.s32.totalorder %s750_s18, 1  ;;  %s750_s18 = sphi %s782_s18, %s15_s18  }
   0x2   : > { %p186_p1 = scmp.lt.s32.totalorder %s750_s18, 3 }
   0x4   : > { %p187_p2 = pnand %p570_p0, %p186_p1 }
   0x5   : > { %p212_p3 = scmp.lt.s32.totalorder (!%p187_p2), %s566_s19, 1 }
   0x6   : > { %190 = sbr.rel (%p187_p2) target bundleno = 318 (0x13e), region = 40 }
   0xb   : > { %v631_v0 = vld [vmem:[%s961_s1 + $0x70] sm:$0xf]  ;;  %v718_v1 = vld [vmem:[%s961_s1 + $0x74] sm:$0xf0]  ;;  %v717_v2 = vld [vmem:[%s961_s1 + $0x74] sm:$0xf] }
   0xc   : > { %v632_v3 = vor.u32 %v718_v1, %v631_v0  ;;  %v633_v4 = vld [vmem:[%s961_s1 + $0x78] sm:$0xf0]  ;;  %v623_v5 = vld [vmem:[%s961_s1 + $0x60] sm:$0xf]  ;;  %v716_v6 = vld [vmem:[%s961_s1 + $0x64] sm:$0xf0] }
   0xd   : > { %v636_v7 = vor.u32 %v717_v2, %v633_v4  ;;  %v715_v8 = vld [vmem:[%s961_s1 + $0x64] sm:$0xf]  ;;  %v625_v9 = vld [vmem:[%s961_s1 + $0x68] sm:$0xf0]  ;;  %v624_v10 = vor.u32 %v716_v6, %v623_v5  ;;  %v615_v12 = vld [vmem:[%s961_s1 + $0x50] sm:$0xf] }
   0xe   : > { %323 = vmatpush.bf16.msra.mxu0 %v632_v3  ;;  %v628_v11 = vor.u32 %v715_v8, %v625_v9  ;;  %v714_v13 = vld [vmem:[%s961_s1 + $0x54] sm:$0xf0]  ;;  %v713_v14 = vld [vmem:[%s961_s1 + $0x54] sm:$0xf]  ;;  %v617_v15 = vld [vmem:[%s961_s1 + $0x58] sm:$0xf0] }
   0xf   : > { %336 = vmatpush.bf16.msra.mxu1 %v636_v7  ;;  %v616_v16 = vor.u32 %v714_v13, %v615_v12  ;;  %v620_v17 = vor.u32 %v713_v14, %v617_v15  ;;  %v607_v18 = vld [vmem:[%s961_s1 + $0x40] sm:$0xf]  ;;  %v712_v19 = vld [vmem:[%s961_s1 + $0x44] sm:$0xf0]  ;;  %v711_v20 = vld [vmem:[%s961_s1 + $0x44] sm:$0xf] }
  0x10   : > { %v609_v21 = vld [vmem:[%s961_s1 + $0x48] sm:$0xf0]  ;;  %v726_v22 = vld [vmem:[%s963_s3 + $0x38] sm:$0xff]  ;;  %v608_v23 = vor.u32 %v712_v19, %v607_v18  ;;  %v599_v26 = vld [vmem:[%s961_s1 + $0x30] sm:$0xf]  ;;  %s967_s19 = smov (!%p212_p3, %s566_s19), 1 }
  0x11   : > { %v734_v24 = vld [vmem:[%s963_s3 + $0x78] sm:$0xff]  ;;  %v612_v25 = vor.u32 %v711_v20, %v609_v21  ;;  %485 = vmatpush.bf16.msra.mxu2 %v726_v22  ;;  %v725_v28 = vld [vmem:[%s963_s3 + $0x30] sm:$0xff]  ;;  %v591_v34 = vld [vmem:[%s961_s1 + $0x20] sm:$0xf]  ;;  %s571_s8 = sshll.u32 %s967_s19, 2 }
  0x12   : > { %324 = vmatpush.bf16.msra.mxu0 %v624_v10  ;;  %v710_v27 = vld [vmem:[%s961_s1 + $0x34] sm:$0xf0]  ;;  %v709_v29 = vld [vmem:[%s961_s1 + $0x34] sm:$0xf]  ;;  %v601_v30 = vld [vmem:[%s961_s1 + $0x38] sm:$0xf0]  ;;  %498 = vmatpush.bf16.msra.mxu3 %v734_v24  ;;  %s215_s13 = scalar_lea.vmem %s960_s0, %s571_s8  ;;  %s219_s10 = scalar_lea.vmem %s965_s5, %s571_s8 }
  0x13   : > { %337 = vmatpush.bf16.msra.mxu1 %v628_v11  ;;  %v733_v31 = vld [vmem:[%s963_s3 + $0x70] sm:$0xff]  ;;  %v600_v32 = vor.u32 %v710_v27, %v599_v26  ;;  %v604_v33 = vor.u32 %v709_v29, %v601_v30  ;;  %v708_v35 = vld [vmem:[%s961_s1 + $0x24] sm:$0xf0]  ;;  %v707_v37 = vld [vmem:[%s961_s1 + $0x24] sm:$0xf] }
  0x14   : > { %v724_v36 = vld [vmem:[%s963_s3 + $0x28] sm:$0xff]  ;;  %v592_v40 = vor.u32 %v708_v35, %v591_v34  ;;  %v583_v42 = vld [vmem:[%s961_s1 + $0x10] sm:$0xf]  ;;  %v706_v43 = vld [vmem:[%s961_s1 + $0x14] sm:$0xf0] }
  0x15   : > { %486 = vmatpush.bf16.msra.mxu2 %v725_v28  ;;  %v593_v38 = vld [vmem:[%s961_s1 + $0x28] sm:$0xf0]  ;;  %v723_v44 = vld [vmem:[%s963_s3 + $0x20] sm:$0xff]  ;;  %v705_v45 = vld [vmem:[%s961_s1 + $0x14] sm:$0xf]  ;;  %v584_v48 = vor.u32 %v706_v43, %v583_v42 }
  0x16   : > { %325 = vmatpush.bf16.msra.mxu0 %v616_v16  ;;  %499 = vmatpush.bf16.msra.mxu3 %v733_v31  ;;  %v732_v39 = vld [vmem:[%s963_s3 + $0x68] sm:$0xff]  ;;  %v596_v41 = vor.u32 %v707_v37, %v593_v38  ;;  %v585_v46 = vld [vmem:[%s961_s1 + $0x18] sm:$0xf0]  ;;  %v731_v47 = vld [vmem:[%s963_s3 + $0x60] sm:$0xff] }
  0x17   : > { %338 = vmatpush.bf16.msra.mxu1 %v620_v17  ;;  %v588_v49 = vor.u32 %v705_v45, %v585_v46  ;;  %v575_v50 = vld [vmem:[%s961_s1] sm:$0xf]  ;;  %v704_v51 = vld [vmem:[%s961_s1 + $0x4] sm:$0xf0]  ;;  %v722_v52 = vld [vmem:[%s963_s3 + $0x18] sm:$0xff] }
  0x18   : > { %v703_v53 = vld [vmem:[%s961_s1 + $0x4] sm:$0xf]  ;;  %v577_v54 = vld [vmem:[%s961_s1 + $0x8] sm:$0xf0]  ;;  %v730_v55 = vld [vmem:[%s963_s3 + $0x58] sm:$0xff]  ;;  %v576_v56 = vor.u32 %v704_v51, %v575_v50 }
  0x19   : > { %487 = vmatpush.bf16.msra.mxu2 %v724_v36  ;;  %v580_v57 = vor.u32 %v703_v53, %v577_v54  ;;  %v721_v58 = vld [vmem:[%s963_s3 + $0x10] sm:$0xff]  ;;  %v220_v60 = vld [vmem:[%s215_s13] sm:$0xf]  ;;  %v720_v61 = vld [vmem:[%s963_s3 + $0x8] sm:$0xff] }
  0x1a   : > { %326 = vmatpush.bf16.msra.mxu0 %v608_v23  ;;  %500 = vmatpush.bf16.msra.mxu3 %v732_v39  ;;  %v729_v59 = vld [vmem:[%s963_s3 + $0x50] sm:$0xff]  ;;  %v728_v62 = vld [vmem:[%s963_s3 + $0x48] sm:$0xff]  ;;  %v719_v63 = vld [vmem:[%s963_s3] sm:$0xff] }
  0x1b   : > { %339 = vmatpush.bf16.msra.mxu1 %v612_v25  ;;  %v727_v0 = vld [vmem:[%s963_s3 + $0x40] sm:$0xff] }
  0x1c   : > { %v237_v1 = vld [vmem:[%s962_s2] sm:$0x3] }
  0x1d   : > { %488 = vmatpush.bf16.msra.mxu2 %v723_v44  ;;  %v239_v2 = vperm.slane %v237_v1, 0  ;;  %v240_v3 = vperm.slane %v237_v1, 1  ;;  %v743_v14 = vld [vmem:[%s964_s4] ss:$0 sm:$0xff] }
  0x1e   : > { %327 = vmatpush.bf16.msra.mxu0 %v600_v32  ;;  %501 = vmatpush.bf16.msra.mxu3 %v731_v47 }
  0x1f   : > { %340 = vmatpush.bf16.msra.mxu1 %v604_v33 }
  0x21   : > { %489 = vmatpush.bf16.msra.mxu2 %v722_v52 }
  0x22   : > { %328 = vmatpush.bf16.msra.mxu0 %v592_v40  ;;  %502 = vmatpush.bf16.msra.mxu3 %v730_v55 }
  0x23   : > { %341 = vmatpush.bf16.msra.mxu1 %v596_v41 }
  0x25   : > { %490 = vmatpush.bf16.msra.mxu2 %v721_v58 }
  0x26   : > { %329 = vmatpush.bf16.msra.mxu0 %v584_v48  ;;  %503 = vmatpush.bf16.msra.mxu3 %v729_v59 }
  0x27   : > { %342 = vmatpush.bf16.msra.mxu1 %v588_v49 }
  0x29   : > { %491 = vmatpush.bf16.msra.mxu2 %v720_v61 }
  0x2a   : > { %330 = vmatpush.bf16.msra.mxu0 %v576_v56  ;;  %504 = vmatpush.bf16.msra.mxu3 %v728_v62 }
  0x2b   : > { %343 = vmatpush.bf16.msra.mxu1 %v580_v57 }
  0x2d   : > { %331 = vmatmul.bf16.vlgmr.msra.gmra.mxu0 %v220_v60  ;;  %492 = vmatpush.bf16.msra.mxu2 %v719_v63 }
  0x2e   : > { %344 = vmatmul.bf16.vlgmr.msra.gmra.mxu1 %v220_v60  ;;  %505 = vmatpush.bf16.msra.mxu3 %v727_v0 }
  0xaa   : > { %v332_v4 = vpop.f32.mrf.mxu0 }
  0xab   : > { %v333_v5 = vadd.f32 %v332_v4, %v239_v2  ;;  %v345_v6 = vpop.f32.mrf.mxu1 }
  0xac   : > { %v346_v7 = vadd.f32 %v345_v6, %v240_v3 }
  0xad   : > { %v349_v8 = vmax.f32 %v333_v5, 0.0 }
  0xae   : > { %v350_v9 = vmax.f32 %v346_v7, 0.0 }
  0xaf   : > { %v351_v10 = vpack.c.bf16 %v349_v8, %v349_v8 }
  0xb0   : > { %v352_v11 = vpack.c.bf16 %v350_v9, %v350_v9 }
  0xb1   : > { %493 = vmatmul.bf16.vlgmr.msra.gmra.mxu2 %v351_v10 }
  0xb2   : > { %506 = vmatmul.bf16.vlgmr.msra.gmra.mxu3 %v352_v11  ;;  %v334_v12 = vpop.f32.mrf.mxu0 }
  0xb3   : > { %v347_v13 = vpop.f32.mrf.mxu1 }
 0x134   : > { %v494_v15 = vpop.f32.mrf.mxu2 }
 0x135   : > { %v495_v16 = vadd.f32 %v743_v14, %v494_v15  ;;  %v507_v17 = vpop.f32.mrf.mxu3 }
 0x137   : > { %v508_v18 = vadd.f32 %v507_v17, %v495_v16 }
 0x139   : > { %v511_v19 = vpack.c.bf16 %v508_v18, %v508_v18 }
 0x13b   : > { %512 = vst [vmem:[%s219_s10] sm:$0xf] %v511_v19 }
 0x13c   : > { %v496_v20 = vpop.f32.mrf.mxu2 }
 0x13d   : > { %v509_v21 = vpop.f32.mrf.mxu3 }
 0x13e PF: > { %s15_s18 = sadd.s32 1, %s750_s18  }
 0x13f   : > { %p12_p4 = scmp.ge.s32.totalorder %s15_s18, 4  }
 0x141   :  { %14 = sbr.rel (!%p12_p4) target bundleno = 1 (0x1), region = 70 }

// kernel: baseline_transformer_forward.38
= control target key start
LH: loop header
LB: loop body
LE: loop exit
PB: predicated region body
PF: predicated region fallthrough
CT: control target
= control target key end

     0   :  { %s1022_s15 = smov 0   ;;  %s1024_s16 = smov 0   ;;  %s1200_s0 = inlined_call_operand.vmem [shape: bf16[2,8,384], index: 0, kind: input, shape index: {}, may-alias: {0,1,2}]   ;;  %s1201_s1 = inlined_call_operand.vmem [shape: bf16[2,8,384], index: 1, kind: input, shape index: {}, may-alias: {0,1,2}]   ;;  %s1202_s2 = inlined_call_operand.vmem [shape: bf16[2,8,384], index: 2, kind: input, shape index: {}, may-alias: {0,1,2}]   ;;  %s1203_s3 = inlined_call_operand.vmem [shape: f32[2,1,8], index: 3, kind: input, shape index: {}]   ;;  %s1204_s4 = inlined_call_operand.vmem [shape: bf16[2,8,128], index: 4, kind: output, shape index: {}]  }
   0x1   :  { %s1026_s17 = smov 0  }
   0x2 LB: > { %s33_s18 = sadd.s32 1, %s982_s16  ;;  %p882_p0 = scmp.ge.s32.totalorder %s986_s17, 1  ;;  %s986_s17 = sphi %s1026_s17, %s14_s17   ;;  %s982_s16 = sphi %s1024_s16, %s1206_s16   ;;  %s978_s15 = sphi %s1022_s15, %s1205_s15  }
   0x3   : > { %p35_p1 = scmp.ge.s32.totalorder %s33_s18, 2  ;;  %p236_p2 = scmp.lt.s32.totalorder %s986_s17, 3 }
   0x5   : > { %s1208_s18 = smov (%p35_p1, %s33_s18), 0  ;;  %p237_p3 = pnand %p882_p0, %p236_p2 }
   0x6   : > { %p294_p4 = scmp.lt.s32.totalorder (!%p237_p3), %s978_s15, 1  ;;  %s989_s29 = smov (!%p237_p3), 64  }
   0x7   : > { %240 = sbr.rel (%p237_p3) target bundleno = 1103 (0x44f), region = 36  ;;  %s990_s30 = smov (!%p237_p3), 96  }
   0x8   : > { %s991_s5 = smov (!%p237_p3), 32  }
   0xc   : > { %s1210_s15 = smov (!%p294_p4, %s978_s15), 1  ;;  %vm352_vm0 = vcmask 261120   ;;  %vm341_vm1 = vcmask 31744   ;;  %v988_v3 = vmov -1e+30   ;;  %vm373_vm2 = vcmask 64512  }
   0xd   : > { %s1043_s19 = smul.u32 12, %s1210_s15  ;;  %s328_s22 = scalar_lea.vmem %s1203_s3, %s1210_s15  ;;  %342 = vst.msk [vmem:[#allocation2] sm:$0xff] %vm341_vm1, %v988_v3  ;;  %v992_v13 = vmov 0   ;;  %v993_v14 = vmov 0.0   ;;  %vm395_vm3 = vcmask 7168   ;;  %vm408_vm4 = vcmask 1043456  }
   0xe   : > { %v1060_v4 = vld [vmem:[%s328_s22] ss:$0 sm:$0xff]  ;;  %933 = vset.pattern.permute.xlu1 %v992_v13  ;;  %344 = vst [vmem:[#allocation4] sm:$0xff] %v993_v14  ;;  %v994_v51 = vmov 1   ;;  %v995_v52 = vmov 2   ;;  %v996_v53 = vmov 3  }
   0xf   : > { %s810_s25 = scalar_lea.vmem %s1201_s1, %s1043_s19  ;;  %s302_s28 = scalar_lea.vmem %s1200_s0, %s1043_s19  ;;  %343 = vst.msk [vmem:[#allocation3] sm:$0xff] %vm341_vm1, %v993_v14  ;;  %934 = vset.pattern.permute.xlu2 %v994_v51  ;;  %935 = vset.pattern.permute.xlu0 %v995_v52  ;;  %vm479_vm5 = vcmask 15368   ;;  %vm566_vm6 = vcmask 23568   ;;  %vm650_vm7 = vcmask 31768   ;;  %vm518_vm8 = vcmask 523520  }
  0x10   : > { %v887_v0 = vld [vmem:[%s810_s25 + $0x4] sm:$0xf]  ;;  %v346_v2 = vld [vmem:[%s302_s28] sm:$0xf]  ;;  %s816_s8 = scalar_lea.vmem %s1202_s2, %s1043_s19  ;;  %vm602_vm9 = vcmask 785920   ;;  %vm686_vm10 = vcmask 1048320  }
  0x11   : > { %v357_v1 = vsel %vm352_vm0, %v887_v0, 0  ;;  %v434_v8 = vunpack.c.l.b16 %v887_v0  ;;  %v429_v11 = vunpack.c.l.b16 %v346_v2  ;;  %v888_v21 = vld [vmem:[%s816_s8 + $0x8] sm:$0xf]  ;;  %s886_s9 = sshll.u32 %s1210_s15, 2 }
  0x12   : > { %366 = vmatpush.bf16.xpose.msra.mxu0 %v357_v1  ;;  %v410_v22 = vsel %vm408_vm4, %v888_v21, 0  ;;  %v490_v48 = vunpack.c.l.b16 %v888_v21  ;;  %s335_s12 = scalar_lea.vmem %s1204_s4, %s886_s9 }
  0x13   : > { %v435_v10 = vpack.c.b16 %v434_v8, %v434_v8  ;;  %v430_v12 = vpack.c.b16 %v429_v11, %v429_v11  ;;  %419 = vmatpush.bf16.msra.mxu1 %v410_v22 }
  0x14   : > { %v1070_v15 = vld [vmem:[#allocation2] sm:$0xff]  ;;  %v491_v50 = vpack.c.b16 %v490_v48, %v490_v48 }
  0x15   : > { %523 = vrot.lane.b32.xlu2 %v435_v10, %s989_s29 }
  0x19   : > { %889 = vmatmul.msk.bf16.vlgmr.msra.gmra.mxu0 %vm352_vm0, %v346_v2 }
  0x1d   : > { %521 = vrot.lane.b32.xlu2 %v430_v12, %s989_s29 }
  0x25   : > { %605 = vrot.lane.b32.xlu2 %v430_v12, %s991_s5 }
  0x6f   : > { %v524_v23 = vpop.permute.xlu2 %523 }
  0x70   : > { %v529_v24 = vsel %vm352_vm0, %v524_v23, 0 }
  0x71   : > { %538 = vmatpush.bf16.xpose.msrb.mxu1 %v529_v24 }
  0x77   : > { %v522_v31 = vpop.permute.xlu2 %521 }
  0x7f   : > { %v606_v34 = vpop.permute.xlu2 %605 }
  0x96   : > { %v368_v5 = vpop.f32.mrf.mxu0 }
  0x97   : > { %v369_v6 = vadd.f32 %v1060_v4, %v368_v5 }
  0x99   : > { %v374_v7 = vsel %vm373_vm2, %v369_v6, -inf }
  0x9a   : > { %375 = vmax.xlane.f32.xlu0 %v374_v7 }
  0x9e   : > { %v370_v9 = vpop.f32.mrf.mxu0 }
  0xae   : > { %436 = vrot.lane.b32.xlu0 %v435_v10, %s990_s30 }
 0x10d   : > { %v376_v16 = vpop.xlane.xlu0 %375 }
 0x10e   : > { %v1073_v17 = vmax.f32 %v1070_v15, %v376_v16 }
 0x110   : > { %v378_v18 = vsub.f32 %v1070_v15, %v1073_v17  ;;  %427 = vst.msk [vmem:[#allocation2] sm:$0xff] %vm395_vm3, %v1073_v17  ;;  %383 = vperm.xlu1 %933, %v1073_v17  }
 0x112   : > { %v379_v60 = vmul.f32 1.442695, %v378_v18 }
 0x117   : > { %v457_v54 = vld [vmem:[#allocation2] sm:$0xff] }
 0x118   : > { %431 = vrot.lane.b32.xlu1 %v430_v12, %s990_s30 }
 0x119   : > { %936 = vset.pattern.permute.xlu1 %v996_v53 }
 0x120   : > { %607 = vrot.lane.b32.xlu1 %v435_v10, %s991_s5  ;;  %v437_v19 = vpop.permute.xlu0 %436 }
 0x121   : > { %v442_v20 = vsel %vm352_vm0, %v437_v19, 0 }
 0x122   : > { %451 = vmatpush.bf16.xpose.msra.mxu2 %v442_v20 }
 0x182   : > { %v384_v25 = vpop.permute.xlu1 %383 }
 0x183   : > { %v386_v26 = vsub.f32 %v369_v6, %v384_v25 }
 0x185   : > { %v387_v27 = vmul.f32 1.442695, %v386_v26 }
 0x187   : > { %946 = vpow2.f32 %v387_v27 }
 0x188   : > { %948 = vpow2.f32 %v379_v60 }
 0x18a   : > { %v432_v28 = vpop.permute.xlu1 %431 }
 0x18b   : > { %891 = vmatmul.msk.bf16.vlgmr.msra.gmra.mxu2 %vm352_vm0, %v432_v28 }
 0x18d   : > { %v1090_v29 = vpop.eup %946 }
 0x18e   : > { %v404_v30 = vpack.c.bf16 %v1090_v29, %v1090_v29  ;;  %v949_v1 = vpop.eup %948 }
 0x190   : > { %890 = vmatmul.msk.bf16.vlgmr.msra.gmra.mxu1 %vm373_vm2, %v404_v30 }
 0x192   : > { %v608_v32 = vpop.permute.xlu1 %607 }
 0x193   : > { %v613_v33 = vsel %vm352_vm0, %v608_v32, 0 }
 0x194   : > { %622 = vmatpush.bf16.xpose.msrb.mxu0 %v613_v33 }
 0x19b   : > { %895 = vmatmul.msk.bf16.vlgmr.msrb.gmra.mxu0 %vm352_vm0, %v606_v34 }
 0x1a0   : > { %893 = vmatmul.msk.bf16.vlgmr.msrb.gmra.mxu1 %vm352_vm0, %v522_v31 }
 0x20d   : > { %v1098_v35 = vpop.f32.mrf.mxu1 }
 0x20e   : > { %v453_v36 = vpop.f32.mrf.mxu2 }
 0x20f   : > { %v1101_v37 = vadd.f32 %v1060_v4, %v453_v36 }
 0x211   : > { %v458_v38 = vsel %vm373_vm2, %v1101_v37, -inf }
 0x212   : > { %459 = vmax.xlane.f32.xlu1 %v458_v38 }
 0x215   : > { %v423_v39 = vpop.f32.mrf.mxu1 }
 0x216   : > { %v455_v40 = vpop.f32.mrf.mxu2 }
 0x218   : > { %v624_v41 = vpop.f32.mrf.mxu0 }
 0x219   : > { %v1106_v42 = vadd.f32 %v1060_v4, %v624_v41 }
 0x21b   : > { %v629_v43 = vsel %vm373_vm2, %v1106_v42, -inf }
 0x21c   : > { %630 = vmax.xlane.f32.xlu0 %v629_v43 }
 0x21d   : > { %v540_v44 = vpop.f32.mrf.mxu1 }
 0x21e   : > { %v1111_v45 = vadd.f32 %v1060_v4, %v540_v44  ;;  %v391_v4 = vsel %vm373_vm2, %v1090_v29, 0.0 }
 0x220   : > { %v545_v46 = vsel %vm373_vm2, %v1111_v45, -inf  ;;  %v626_v47 = vpop.f32.mrf.mxu0 }
 0x221   : > { %546 = vmax.xlane.f32.xlu2 %v545_v46 }
 0x225   : > { %v542_v49 = vpop.f32.mrf.mxu1 }
 0x22b   : > { %492 = vrot.lane.b32.xlu1 %v491_v50, %s990_s30 }
 0x285   : > { %v460_v55 = vpop.xlane.xlu1 %459 }
 0x286   : > { %v461_v56 = vmax.f32 %v457_v54, %v460_v55 }
 0x288   : > { %v462_v57 = vsub.f32 %v457_v54, %v461_v56  ;;  %520 = vst.msk [vmem:[#allocation2] sm:$0xff] %vm479_vm5, %v461_v56  ;;  %467 = vperm.xlu2 %934, %v461_v56  }
 0x28a   : > { %v463_v7 = vmul.f32 1.442695, %v462_v57 }
 0x28c   : > { %950 = vpow2.f32 %v463_v7 }
 0x28f   : > { %v1121_v59 = vld [vmem:[#allocation2] sm:$0xff]  ;;  %v631_v63 = vpop.xlane.xlu0 %630 }
 0x290   : > { %576 = vrot.lane.b32.xlu2 %v491_v50, %s989_s29 }
 0x291   : > { %937 = vset.pattern.permute.xlu2 %v992_v13 }
 0x292   : > { %v951_v9 = vpop.eup %950 }
 0x294   : > { %v547_v58 = vpop.xlane.xlu2 %546 }
 0x295   : > { %v1127_v61 = vmax.f32 %v1121_v59, %v547_v58 }
 0x297   : > { %v549_v62 = vsub.f32 %v1121_v59, %v1127_v61  ;;  %604 = vst.msk [vmem:[#allocation2] sm:$0xff] %vm566_vm6, %v1127_v61  ;;  %554 = vperm.xlu0 %935, %v1127_v61  }
 0x298   : > { %660 = vrot.lane.b32.xlu2 %v491_v50, %s991_s5 }
 0x29d   : > { %v493_v5 = vpop.permute.xlu1 %492 }
 0x29e   : > { %v1135_v0 = vld [vmem:[#allocation2] sm:$0xff]  ;;  %v498_v6 = vsel %vm408_vm4, %v493_v5, 0 }
 0x29f   : > { %v1138_v2 = vmax.f32 %v1135_v0, %v631_v63  ;;  %507 = vmatpush.bf16.msra.mxu3 %v498_v6 }
 0x2a0   : > { %400 = vperm.xlu2 %937, %v949_v1  }
 0x2a1   : > { %v633_v3 = vsub.f32 %v1135_v0, %v1138_v2  ;;  %688 = vst.msk [vmem:[#allocation2] sm:$0xff] %vm650_vm7, %v1138_v2  ;;  %638 = vperm.xlu1 %936, %v1138_v2  }
 0x2a8   : > { %942 = vset.pattern.permute.xlu2 %v995_v52 }
 0x2a9   : > { %938 = vset.pattern.permute.xlu1 %v994_v51 }
 0x2cb   : > { %392 = vadd.xlane.f32.xlu1 %v391_v4 }
 0x2e2   : > { %v468_v8 = vpop.permute.xlu2 %467 }
 0x2e3   : > { %v470_v10 = vsub.f32 %v1101_v37, %v468_v8  ;;  %v389_v37 = vld [vmem:[#allocation3] sm:$0xff] }
 0x2e4   : > { %484 = vperm.xlu1 %938, %v951_v9   ;;  %v390_v38 = vmul.f32 %v949_v1, %v389_v37 }
 0x2e5   : > { %v471_v11 = vmul.f32 1.442695, %v470_v10 }
 0x2e7   : > { %952 = vpow2.f32 %v471_v11 }
 0x2ea   : > { %v577_v12 = vpop.permute.xlu2 %576 }
 0x2eb   : > { %v582_v14 = vsel %vm408_vm4, %v577_v12, 0 }
 0x2ec   : > { %591 = vmatpush.bf16.msrb.mxu3 %v582_v14  ;;  %939 = vset.pattern.permute.xlu1 %v996_v53 }
 0x2ed   : > { %v953_v15 = vpop.eup %952 }
 0x2ee   : > { %v475_v16 = vsel %vm373_vm2, %v953_v15, 0.0  ;;  %v488_v17 = vpack.c.bf16 %v953_v15, %v953_v15 }
 0x2ef   : > { %476 = vadd.xlane.f32.xlu0 %v475_v16 }
 0x2f0   : > { %892 = vmatmul.msk.bf16.vlgmr.msra.gmra.mxu3 %vm373_vm2, %v488_v17 }
 0x2f2   : > { %v661_v18 = vpop.permute.xlu2 %660 }
 0x2f3   : > { %v666_v19 = vsel %vm408_vm4, %v661_v18, 0 }
 0x2f4   : > { %675 = vmatpush.bf16.msrb.mxu2 %v666_v19 }
 0x2fa   : > { %v401_v20 = vpop.permute.xlu2 %400 }
 0x2fb   : > { %v403_v21 = vmul.f32 0.0, %v401_v20 }
 0x2fd   : > { %v425_v22 = vadd.f32 %v1098_v35, %v403_v21  ;;  %v550_v35 = vmul.f32 1.442695, %v549_v62 }
 0x2ff   : > { %426 = vst.msk [vmem:[#allocation4] sm:$0xff] %vm352_vm0, %v425_v22 }
 0x306   : > { %v481_v1 = vld [vmem:[#allocation4] sm:$0xff] }
 0x309   : > { %v555_v23 = vpop.permute.xlu0 %554 }
 0x30a   : > { %v557_v24 = vsub.f32 %v1111_v45, %v555_v23 }
 0x30c   : > { %v558_v25 = vmul.f32 1.442695, %v557_v24 }
 0x30e   : > { %954 = vpow2.f32 %v558_v25 }
 0x313   : > { %v639_v26 = vpop.permute.xlu1 %638 }
 0x314   : > { %v955_v27 = vpop.eup %954  ;;  %v641_v28 = vsub.f32 %v1106_v42, %v639_v26 }
 0x315   : > { %v562_v29 = vsel %vm373_vm2, %v955_v27, 0.0  ;;  %v575_v30 = vpack.c.bf16 %v955_v27, %v955_v27 }
 0x316   : > { %v642_v31 = vmul.f32 1.442695, %v641_v28  ;;  %563 = vadd.xlane.f32.xlu2 %v562_v29 }
 0x317   : > { %894 = vmatmul.msk.bf16.vlgmr.msrb.gmra.mxu3 %vm373_vm2, %v575_v30 }
 0x318   : > { %956 = vpow2.f32 %v642_v31 }
 0x319   : > { %958 = vpow2.f32 %v550_v35 }
 0x31e   : > { %v957_v32 = vpop.eup %956 }
 0x31f   : > { %v646_v33 = vsel %vm373_vm2, %v957_v32, 0.0  ;;  %v659_v34 = vpack.c.bf16 %v957_v32, %v957_v32  ;;  %v959_v36 = vpop.eup %958 }
 0x320   : > { %647 = vadd.xlane.f32.xlu0 %v646_v33 }
 0x321   : > { %896 = vmatmul.msk.bf16.vlgmr.msrb.gmra.mxu2 %vm373_vm2, %v659_v34 }
 0x334   : > { %571 = vperm.xlu0 %935, %v959_v36  }
 0x33c   : > { %940 = vset.pattern.permute.xlu0 %v992_v13  ;;  %v634_v13 = vmul.f32 1.442695, %v633_v3 }
 0x33e   : > { %v393_v39 = vpop.xlane.xlu1 %392  ;;  %960 = vpow2.f32 %v634_v13 }
 0x33f   : > { %v394_v40 = vadd.f32 %v393_v39, %v390_v38 }
 0x341   : > { %396 = vst.msk [vmem:[#allocation3] sm:$0xff] %vm395_vm3, %v394_v40 }
 0x344   : > { %v961_v52 = vpop.eup %960 }
 0x348   : > { %v473_v41 = vld [vmem:[#allocation3] sm:$0xff] }
 0x349   : > { %v474_v42 = vmul.f32 %v951_v9, %v473_v41 }
 0x356   : > { %v485_v0 = vpop.permute.xlu1 %484 }
 0x357   : > { %v487_v2 = vmul.f32 %v485_v0, %v481_v1 }
 0x362   : > { %v477_v43 = vpop.xlane.xlu0 %476 }
 0x363   : > { %v478_v44 = vadd.f32 %v477_v43, %v474_v42 }
 0x365   : > { %480 = vst.msk [vmem:[#allocation3] sm:$0xff] %vm479_vm5, %v478_v44 }
 0x36c   : > { %v560_v47 = vld [vmem:[#allocation3] sm:$0xff] }
 0x36d   : > { %v561_v48 = vmul.f32 %v959_v36, %v560_v47 }
 0x373   : > { %v509_v45 = vpop.f32.mrf.mxu3 }
 0x374   : > { %514 = vrot.lane.b32.xlu2 %v509_v45, %s991_s5 }
 0x37b   : > { %v511_v46 = vpop.f32.mrf.mxu3 }
 0x389   : > { %v564_v49 = vpop.xlane.xlu2 %563 }
 0x38a   : > { %v565_v50 = vadd.f32 %v564_v49, %v561_v48 }
 0x38c   : > { %567 = vst.msk [vmem:[#allocation3] sm:$0xff] %vm566_vm6, %v565_v50 }
 0x393   : > { %v644_v54 = vld [vmem:[#allocation3] sm:$0xff]  ;;  %v648_v56 = vpop.xlane.xlu0 %647 }
 0x394   : > { %v645_v55 = vmul.f32 %v961_v52, %v644_v54 }
 0x396   : > { %v649_v57 = vadd.f32 %v648_v56, %v645_v55 }
 0x398   : > { %651 = vst.msk [vmem:[#allocation3] sm:$0xff] %vm650_vm7, %v649_v57 }
 0x39a   : > { %v593_v58 = vpop.f32.mrf.mxu3 }
 0x39b   : > { %598 = vrot.lane.b32.xlu1 %v593_v58, %s989_s29 }
 0x39f   : > { %v693_v59 = vld [vmem:[#allocation3] sm:$0xff] }
 0x3a0   : > { %962 = vrcp.f32 %v693_v59 }
 0x3a2   : > { %v595_v60 = vpop.f32.mrf.mxu3 }
 0x3a3   : > { %655 = vperm.xlu1 %939, %v961_v52  }
 0x3a4   : > { %v677_v61 = vpop.f32.mrf.mxu2 }
 0x3a5   : > { %682 = vrot.lane.b32.xlu2 %v677_v61, %s990_s30 }
 0x3a6   : > { %v963_v62 = vpop.eup %962  ;;  %v572_v6 = vpop.permute.xlu0 %571 }
 0x3a7   : > { %697 = vperm.xlu0 %940, %v963_v62  }
 0x3ab   : > { %941 = vset.pattern.permute.xlu1 %v994_v51 }
 0x3ac   : > { %v679_v63 = vpop.f32.mrf.mxu2  ;;  %707 = vperm.xlu1 %941, %v963_v62  }
 0x3ad   : > { %717 = vperm.xlu2 %942, %v963_v62  }
 0x3af   : > { %944 = vset.pattern.permute.xlu0 %v996_v53 }
 0x3b4   : > { %943 = vset.pattern.permute.xlu1 %v996_v53 }
 0x3b5   : > { %727 = vperm.xlu1 %943, %v963_v62  }
 0x3ce   : > { %v515_v3 = vpop.permute.xlu2 %514 }
 0x3cf   : > { %v517_v4 = vadd.f32 %v515_v3, %v487_v2 }
 0x3d1   : > { %519 = vst.msk [vmem:[#allocation4] sm:$0xff] %vm518_vm8, %v517_v4 }
 0x3d8   : > { %v568_v5 = vld [vmem:[#allocation4] sm:$0xff] }
 0x3d9   : > { %v574_v7 = vmul.f32 %v572_v6, %v568_v5 }
 0x3ff   : > { %v683_v11 = vpop.permute.xlu2 %682 }
 0x407   : > { %v718_v20 = vpop.permute.xlu2 %717 }
 0x40d   : > { %v599_v51 = vpop.permute.xlu1 %598 }
 0x40e   : > { %v601_v8 = vadd.f32 %v599_v51, %v574_v7 }
 0x410   : > { %603 = vst.msk [vmem:[#allocation4] sm:$0xff] %vm602_vm9, %v601_v8 }
 0x415   : > { %v656_v9 = vpop.permute.xlu1 %655 }
 0x417   : > { %v652_v10 = vld [vmem:[#allocation4] sm:$0xff] }
 0x418   : > { %v658_v53 = vmul.f32 %v656_v9, %v652_v10 }
 0x419   : > { %v698_v15 = vpop.permute.xlu0 %697 }
 0x41a   : > { %v685_v12 = vadd.f32 %v683_v11, %v658_v53 }
 0x41c   : > { %687 = vst.msk [vmem:[#allocation4] sm:$0xff] %vm686_vm10, %v685_v12 }
 0x41e   : > { %v708_v17 = vpop.permute.xlu1 %707 }
 0x423   : > { %v692_v14 = vld [vmem:[#allocation4] sm:$0xff] }
 0x424   : > { %v700_v16 = vmul.f32 %v698_v15, %v692_v14 }
 0x426   : > { %701 = vst.msk [vmem:[#allocation4] sm:$0xff] %vm352_vm0, %v700_v16 }
 0x427   : > { %v728_v23 = vpop.permute.xlu1 %727 }
 0x42d   : > { %v702_v18 = vld [vmem:[#allocation4] sm:$0xff] }
 0x42e   : > { %v710_v19 = vmul.f32 %v708_v17, %v702_v18 }
 0x430   : > { %711 = vst.msk [vmem:[#allocation4] sm:$0xff] %vm518_vm8, %v710_v19 }
 0x437   : > { %v712_v21 = vld [vmem:[#allocation4] sm:$0xff] }
 0x438   : > { %v720_v22 = vmul.f32 %v718_v20, %v712_v21 }
 0x43a   : > { %721 = vst.msk [vmem:[#allocation4] sm:$0xff] %vm602_vm9, %v720_v22 }
 0x441   : > { %v722_v24 = vld [vmem:[#allocation4] sm:$0xff] }
 0x442   : > { %v730_v25 = vmul.f32 %v728_v23, %v722_v24 }
 0x444   : > { %731 = vst.msk [vmem:[#allocation4] sm:$0xff] %vm686_vm10, %v730_v25 }
 0x44b   : > { %v732_v26 = vld [vmem:[#allocation4] sm:$0xff] }
 0x44c   : > { %v733_v27 = vpack.c.bf16 %v732_v26, %v732_v26 }
 0x44e   : > { %734 = vst [vmem:[%s335_s12] sm:$0xf] %v733_v27 }
 0x44f PF: > { %s14_s17 = sadd.s32 1, %s986_s17   ;;  %s1205_s15 = smov %s982_s16 }
 0x450   : > { %p11_p5 = scmp.ge.s32.totalorder %s14_s17, 4   ;;  %s1206_s16 = smov %s1208_s18 }
 0x452   :  { %13 = sbr.rel (!%p11_p5) target bundleno = 2 (0x2), region = 83 }

// kernel: baseline_transformer_forward.49
= control target key start
LH: loop header
LB: loop body
LE: loop exit
PB: predicated region body
PF: predicated region fallthrough
CT: control target
= control target key end

     0   :  { %s313_s12 = smov 0   ;;  %s343_s0 = inlined_call_operand.vmem [shape: bf16[16,128], index: 0, kind: input, shape index: {}]   ;;  %s344_s1 = inlined_call_operand.vmem [shape: f32[1,128], index: 1, kind: input, shape index: {}]   ;;  %s345_s2 = inlined_call_operand.vmem [shape: f32[1,128], index: 2, kind: input, shape index: {}]   ;;  %s346_s3 = inlined_call_operand.vmem [shape: bf16[16,128], index: 3, kind: output, shape index: {}]  }
   0x1 LB: > { %s260_s13 = sadd.s32 4294967295, %s290_s12   ;;  %p264_p0 = scmp.ge.s32.totalorder %s290_s12, 1  ;;  %s290_s12 = sphi %s313_s12, %s13_s12  }
   0x2   : > { %p136_p1 = scmp.lt.s32.totalorder %s290_s12, 3 }
   0x4   : > { %p137_p2 = pnand %p264_p0, %p136_p1 }
   0x5   : > { %p158_p3 = scmp.lt.s32.totalorder (!%p137_p2), %s260_s13, 1 }
   0x6   : > { %140 = sbr.rel (%p137_p2) target bundleno = 286 (0x11e), region = 32 }
   0xb   : > { %s348_s13 = smov (!%p158_p3, %s260_s13), 1  ;;  %v292_v2 = vmov 128.0   ;;  %v278_v22 = vld [vmem:[%s344_s1] ss:$0 sm:$0xff] }
   0xc   : > { %s265_s14 = sshll.u32 %s348_s13, 2  ;;  %280 = vrcp.f32 %v292_v2  ;;  %v279_v24 = vld [vmem:[%s345_s2] ss:$0 sm:$0xff] }
   0xd   : > { %s161_s17 = scalar_lea.vmem %s343_s0, %s265_s14  ;;  %s165_s24 = scalar_lea.vmem %s346_s3, %s265_s14 }
   0xe   : > { %v166_v0 = vld [vmem:[%s161_s17] sm:$0xf] }
   0xf   : > { %v167_v1 = vunpack.c.l.bf16 %v166_v0 }
  0x11   : > { %168 = vadd.xlane.f32.xlu0 %v167_v1 }
  0x12   : > { %v281_v3 = vpop.eup %280 }
  0x13   : > { %v171_v4 = vmul.f32 128.0, %v281_v3  ;;  %vm175_vm0 = vweird.f32 %v281_v3 }
  0x15   : > { %v172_v5 = vsub.f32 1.0, %v171_v4 }
  0x17   : > { %v173_v6 = vmul.f32 %v281_v3, %v172_v5 }
  0x19   : > { %v174_v7 = vadd.f32 %v281_v3, %v173_v6 }
  0x1b   : > { %v176_v8 = vsel %vm175_vm0, %v281_v3, %v174_v7 }
  0x84   : > { %v169_v9 = vpop.xlane.xlu0 %168 }
  0x85   : > { %v177_v10 = vmul.f32 %v176_v8, %v169_v9 }
  0x87   : > { %v178_v11 = vsub.f32 %v167_v1, %v177_v10 }
  0x89   : > { %v179_v12 = vmul.f32 %v178_v11, %v178_v11 }
  0x8b   : > { %180 = vadd.xlane.f32.xlu0 %v179_v12 }
  0xfe   : > { %v181_v13 = vpop.xlane.xlu0 %180 }
  0xff   : > { %v182_v14 = vmul.f32 %v181_v13, %v176_v8 }
 0x101   : > { %v183_v15 = vadd.f32 1e-05, %v182_v14 }
 0x103   : > { %282 = vrsqrt.f32 %v183_v15  ;;  %vm190_vm2 = vweird.f32 %v183_v15 }
 0x109   : > { %v283_v16 = vpop.eup %282 }
 0x10a   : > { %v185_v17 = vmul.f32 %v283_v16, %v183_v15  ;;  %vm191_vm1 = vweird.f32 %v283_v16 }
 0x10b   : > { %vm192_vm3 = vmor %vm190_vm2, %vm191_vm1 }
 0x10c   : > { %v186_v18 = vmul.f32 %v283_v16, %v185_v17 }
 0x10e   : > { %v187_v19 = vmul.f32 0.5, %v186_v18 }
 0x110   : > { %v188_v20 = vsub.f32 1.5, %v187_v19 }
 0x112   : > { %v189_v21 = vmul.f32 %v283_v16, %v188_v20 }
 0x114   : > { %v193_v23 = vsel %vm192_vm3, %v283_v16, %v189_v21 }
 0x115   : > { %v194_v25 = vmul.f32 %v193_v23, %v178_v11 }
 0x117   : > { %v199_v26 = vmul.f32 %v278_v22, %v194_v25 }
 0x119   : > { %v204_v27 = vadd.f32 %v279_v24, %v199_v26 }
 0x11b   : > { %v205_v28 = vpack.c.bf16 %v204_v27, %v204_v27 }
 0x11d   : > { %206 = vst [vmem:[%s165_s24] sm:$0xf] %v205_v28 }
 0x11e PF: > { %s13_s12 = sadd.s32 1, %s290_s12  }
 0x11f   : > { %p10_p4 = scmp.ge.s32.totalorder %s13_s12, 4  }
 0x121   :  { %12 = sbr.rel (!%p10_p4) target bundleno = 1 (0x1), region = 62 }

// kernel: baseline_transformer_forward.55
= control target key start
LH: loop header
LB: loop body
LE: loop exit
PB: predicated region body
PF: predicated region fallthrough
CT: control target
= control target key end

     0   :  { %8 = vsyncpa [#allocation4], 0  ;;  %s738_s12 = smov 0   ;;  %s740_s13 = smov 0   ;;  %s786_s0 = inlined_call_operand.vmem [shape: bf16[16,128], index: 0, kind: input, shape index: {}]   ;;  %s787_s1 = inlined_call_operand.hbm [shape: bf16[128,256], index: 1, kind: input, shape index: {}]   ;;  %s788_s2 = inlined_call_operand.vmem [shape: f32[1,256], index: 2, kind: input, shape index: {}]   ;;  %s789_s3 = inlined_call_operand.vmem [shape: bf16[16,256], index: 3, kind: output, shape index: {}]  }
   0x1   :  { %s742_s14 = smov 0  }
   0x2 LB: > { %s526_s15 = sadd.s32 4294967295, %s713_s14   ;;  %s33_s16 = sadd.s32 1, %s709_s13  ;;  %s713_s14 = sphi %s742_s14, %s14_s14   ;;  %s709_s13 = sphi %s740_s13, %s791_s13   ;;  %s705_s12 = sphi %s738_s12, %s790_s12  }
   0x3   : > { %p35_p0 = scmp.ge.s32.totalorder %s33_s16, 2  ;;  %p528_p1 = scmp.ge.s32.totalorder %s713_s14, 1 }
   0x4   : > { %p148_p2 = scmp.lt.s32.totalorder %s713_s14, 3  ;;  %p628_p4 = scmp.eq.s32.totalorder %s526_s15, 0 }
   0x5   : > { %s793_s16 = smov (%p35_p0, %s33_s16), 0  ;;  %s165_s19 = sshll.u32 %s787_s1, 4  ;;  %s166_s19 = int_to_ptr.hbm [resolvable:$true] %s165_s19 }
   0x6   : > { %p149_p3 = pnand %p528_p1, %p148_p2  ;;  %s715_s20 = smov [#allocation3]  }
   0x7   : > { %s167_s21 = sshll.u32 %s715_s20, 4  ;;  %s716_s22 = smov 128   ;;  %s168_s21 = int_to_ptr.vmem [resolvable:$true] %s167_s21 }
   0x8   : > { %p624_p5 = pneg %p149_p3  ;;  %s717_s23 = smov 8  }
   0x9   : > { %201 = sbr.rel (%p149_p3) target bundleno = 184 (0xb8), region = 32 }
   0xa   : > { %p625_p6 = pnand %p628_p4, %p624_p5 }
   0xc   : > { %627 = dma.hbm_to_vmem [thread:$0]  (!%p625_p6), %s166_s19, 2048, %s168_s21, [#allocation4], %s716_s22, %s716_s22, %s717_s23  }
   0xe   : > { %700 = dma.done.wait (%p628_p4), [#allocation4], 2048  }
   0xf   : > { %702 = vsyncadd (%p628_p4), [#allocation4], 4294965248  ;;  %v595_v0 = vld [vmem:[#allocation3 + $0x70] sm:$0xf]  ;;  %v619_v1 = vld [vmem:[#allocation3 + $0x74] sm:$0xf0] }
  0x10   : > { %v618_v2 = vld [vmem:[#allocation3 + $0x74] sm:$0xf]  ;;  %v596_v3 = vor.u32 %v619_v1, %v595_v0  ;;  %v597_v4 = vld [vmem:[#allocation3 + $0x78] sm:$0xf0]  ;;  %v587_v5 = vld [vmem:[#allocation3 + $0x60] sm:$0xf] }
  0x11   : > { %v617_v6 = vld [vmem:[#allocation3 + $0x64] sm:$0xf0]  ;;  %v600_v7 = vor.u32 %v618_v2, %v597_v4  ;;  %v616_v8 = vld [vmem:[#allocation3 + $0x64] sm:$0xf]  ;;  %v589_v9 = vld [vmem:[#allocation3 + $0x68] sm:$0xf0] }
  0x12   : > { %365 = vmatpush.bf16.msra.mxu0 %v596_v3  ;;  %v588_v10 = vor.u32 %v617_v6, %v587_v5  ;;  %v592_v11 = vor.u32 %v616_v8, %v589_v9  ;;  %v579_v12 = vld [vmem:[#allocation3 + $0x50] sm:$0xf]  ;;  %v615_v13 = vld [vmem:[#allocation3 + $0x54] sm:$0xf0]  ;;  %v614_v14 = vld [vmem:[#allocation3 + $0x54] sm:$0xf] }
  0x13   : > { %378 = vmatpush.bf16.msra.mxu1 %v600_v7  ;;  %v581_v15 = vld [vmem:[#allocation3 + $0x58] sm:$0xf0]  ;;  %v580_v16 = vor.u32 %v615_v13, %v579_v12  ;;  %v571_v18 = vld [vmem:[#allocation3 + $0x40] sm:$0xf]  ;;  %v613_v19 = vld [vmem:[#allocation3 + $0x44] sm:$0xf0] }
  0x14   : > { %v584_v17 = vor.u32 %v614_v14, %v581_v15  ;;  %v612_v20 = vld [vmem:[#allocation3 + $0x44] sm:$0xf]  ;;  %v573_v21 = vld [vmem:[#allocation3 + $0x48] sm:$0xf0]  ;;  %v572_v22 = vor.u32 %v613_v19, %v571_v18  ;;  %v563_v24 = vld [vmem:[#allocation3 + $0x30] sm:$0xf] }
  0x15   : > { %v576_v23 = vor.u32 %v612_v20, %v573_v21  ;;  %v611_v25 = vld [vmem:[#allocation3 + $0x34] sm:$0xf0]  ;;  %v610_v26 = vld [vmem:[#allocation3 + $0x34] sm:$0xf]  ;;  %v565_v27 = vld [vmem:[#allocation3 + $0x38] sm:$0xf0] }
  0x16   : > { %366 = vmatpush.bf16.msra.mxu0 %v588_v10  ;;  %v564_v28 = vor.u32 %v611_v25, %v563_v24  ;;  %v568_v29 = vor.u32 %v610_v26, %v565_v27  ;;  %v555_v30 = vld [vmem:[#allocation3 + $0x20] sm:$0xf]  ;;  %v609_v31 = vld [vmem:[#allocation3 + $0x24] sm:$0xf0]  ;;  %v608_v32 = vld [vmem:[#allocation3 + $0x24] sm:$0xf] }
  0x17   : > { %379 = vmatpush.bf16.msra.mxu1 %v592_v11  ;;  %v557_v33 = vld [vmem:[#allocation3 + $0x28] sm:$0xf0]  ;;  %p236_p7 = scmp.lt.s32.totalorder %s705_s12, 1  ;;  %v556_v34 = vor.u32 %v609_v31, %v555_v30  ;;  %v547_v36 = vld [vmem:[#allocation3 + $0x10] sm:$0xf] }
  0x18   : > { %v560_v35 = vor.u32 %v608_v32, %v557_v33  ;;  %v607_v37 = vld [vmem:[#allocation3 + $0x14] sm:$0xf0]  ;;  %v606_v38 = vld [vmem:[#allocation3 + $0x14] sm:$0xf]  ;;  %v549_v39 = vld [vmem:[#allocation3 + $0x18] sm:$0xf0] }
  0x19   : > { %s795_s12 = smov (!%p236_p7, %s705_s12), 1  ;;  %v548_v40 = vor.u32 %v607_v37, %v547_v36  ;;  %v552_v41 = vor.u32 %v606_v38, %v549_v39  ;;  %v539_v42 = vld [vmem:[#allocation3] sm:$0xf]  ;;  %v605_v43 = vld [vmem:[#allocation3 + $0x4] sm:$0xf0] }
  0x1a   : > { %367 = vmatpush.bf16.msra.mxu0 %v580_v16  ;;  %v604_v44 = vld [vmem:[#allocation3 + $0x4] sm:$0xf]  ;;  %v541_v45 = vld [vmem:[#allocation3 + $0x8] sm:$0xf0]  ;;  %s534_s24 = sshll.u32 %s795_s12, 2  ;;  %v540_v46 = vor.u32 %v605_v43, %v539_v42  ;;  %s603_s30 = sshll.u32 %s795_s12, 3 }
  0x1b   : > { %380 = vmatpush.bf16.msra.mxu1 %v584_v17  ;;  %v544_v47 = vor.u32 %v604_v44, %v541_v45  ;;  %s242_s27 = scalar_lea.vmem %s786_s0, %s534_s24  ;;  %v400_v49 = vld [vmem:[%s788_s2] sm:$0x3]  ;;  %s258_s6 = scalar_lea.vmem %s789_s3, %s603_s30 }
  0x1c   : > { %v268_v48 = vld [vmem:[%s242_s27] sm:$0xf]  ;;  %v402_v50 = vperm.slane %v400_v49, 0  ;;  %v403_v51 = vperm.slane %v400_v49, 1 }
  0x1e   : > { %368 = vmatpush.bf16.msra.mxu0 %v572_v22 }
  0x1f   : > { %381 = vmatpush.bf16.msra.mxu1 %v576_v23 }
  0x22   : > { %369 = vmatpush.bf16.msra.mxu0 %v564_v28 }
  0x23   : > { %382 = vmatpush.bf16.msra.mxu1 %v568_v29 }
  0x26   : > { %370 = vmatpush.bf16.msra.mxu0 %v556_v34 }
  0x27   : > { %383 = vmatpush.bf16.msra.mxu1 %v560_v35 }
  0x2a   : > { %371 = vmatpush.bf16.msra.mxu0 %v548_v40 }
  0x2b   : > { %384 = vmatpush.bf16.msra.mxu1 %v552_v41 }
  0x2e   : > { %372 = vmatpush.bf16.msra.mxu0 %v540_v46 }
  0x2f   : > { %385 = vmatpush.bf16.msra.mxu1 %v544_v47 }
  0x31   : > { %373 = vmatmul.bf16.vlgmr.msra.gmra.mxu0 %v268_v48 }
  0x32   : > { %386 = vmatmul.bf16.vlgmr.msra.gmra.mxu1 %v268_v48 }
  0xae   : > { %v374_v52 = vpop.f32.mrf.mxu0 }
  0xaf   : > { %v406_v53 = vadd.f32 %v402_v50, %v374_v52  ;;  %v387_v54 = vpop.f32.mrf.mxu1 }
  0xb0   : > { %v407_v55 = vadd.f32 %v403_v51, %v387_v54 }
  0xb2   : > { %v408_v56 = vpack.c.bf16 %v407_v55, %v406_v53 }
  0xb4   : > { %409 = vst [vmem:[%s258_s6] sm:$0xff] %v408_v56 }
  0xb6   : > { %v376_v57 = vpop.f32.mrf.mxu0 }
  0xb7   : > { %v389_v58 = vpop.f32.mrf.mxu1 }
  0xb8 PF: > { %s14_s14 = sadd.s32 1, %s713_s14   ;;  %s790_s12 = smov %s709_s13 }
  0xb9   : > { %p11_p8 = scmp.ge.s32.totalorder %s14_s14, 4   ;;  %s791_s13 = smov %s793_s16 }
  0xbb   :  { %13 = sbr.rel (!%p11_p8) target bundleno = 2 (0x2), region = 79 }
  0xc0   :  { %440 = vsyncpa [#allocation4], 1 }
  0xc1   :  { %442 = vsyncpa [#allocation4 + $0x1], 1 }

// kernel: baseline_transformer_forward.47
= control target key start
LH: loop header
LB: loop body
LE: loop exit
PB: predicated region body
PF: predicated region fallthrough
CT: control target
= control target key end

     0   :  { %10 = vsyncpa [#allocation3], 0  ;;  %s1000_s0 = inlined_call_operand.vmem [shape: bf16[16,128], index: 0, kind: input, shape index: {}]   ;;  %s1001_s1 = inlined_call_operand.hbm [shape: bf16[128,256], index: 1, kind: input, shape index: {}]   ;;  %s1002_s2 = inlined_call_operand.vmem [shape: f32[1,256], index: 2, kind: input, shape index: {}]   ;;  %s1003_s3 = inlined_call_operand.hbm [shape: bf16[256,128], index: 3, kind: input, shape index: {}]   ;;  %s1004_s4 = inlined_call_operand.vmem [shape: f32[1,128], index: 4, kind: input, shape index: {}]   ;;  %s1005_s5 = inlined_call_operand.vmem [shape: bf16[16,128], index: 5, kind: output, shape index: {}]  }
   0x1   :  { %11 = vsyncpa [#allocation5], 0  ;;  %s941_s18 = smov 0  }
   0x2 LB: > { %s169_s21 = sshll.u32 %s1001_s1, 4  ;;  %s950_s22 = sadd.s32 4294967295, %s903_s18   ;;  %s903_s18 = sphi %s941_s18, %s17_s18   ;;  %s170_s21 = int_to_ptr.hbm [resolvable:$true] %s169_s21 }
   0x3   : > { %p624_p0 = scmp.ge.s32.totalorder %s903_s18, 1  ;;  %p158_p1 = scmp.lt.s32.totalorder %s903_s18, 3 }
   0x4   : > { %p810_p2 = scmp.eq.s32.totalorder %s950_s22, 0  ;;  %s905_s24 = smov [#allocation2]  }
   0x5   : > { %p955_p3 = pnand %p624_p0, %p158_p1  ;;  %s171_s25 = sshll.u32 %s905_s24, 4  ;;  %s172_s25 = int_to_ptr.vmem [resolvable:$true] %s171_s25 }
   0x6   : > { %s186_s28 = sshll.u32 %s1003_s3, 4  ;;  %s906_s29 = smov [#allocation4]   ;;  %s187_s28 = int_to_ptr.hbm [resolvable:$true] %s186_s28 }
   0x7   : > { %p803_p4 = pneg %p955_p3  ;;  %s188_s30 = sshll.u32 %s906_s29, 4  ;;  %s189_s30 = int_to_ptr.vmem [resolvable:$true] %s188_s30 }
   0x8   : > { %s907_s6 = smov 128   ;;  %s908_s7 = smov 8  }
   0x9   : > { %p804_p5 = pnand %p810_p2, %p803_p4  ;;  %s909_s8 = smov 64  }
   0xa   : > { %s910_s9 = smov 4   ;;  %214 = sbr.rel (%p955_p3) target bundleno = 325 (0x145), region = 40 }
   0xb   : > { %806 = dma.hbm_to_vmem [thread:$0]  (!%p804_p5), %s170_s21, 2048, %s172_s25, [#allocation3], %s907_s6, %s907_s6, %s908_s7  }
   0xc   : > { %809 = dma.hbm_to_vmem [thread:$0]  (!%p804_p5), %s187_s28, 2048, %s189_s30, [#allocation5], %s909_s8, %s909_s8, %s910_s9  }
   0xf   : > { %894 = dma.done.wait (%p810_p2), [#allocation3], 2048  }
  0x10   : > { %896 = vsyncadd (%p810_p2), [#allocation3], 4294965248 }
  0x11   : > { %898 = dma.done.wait (%p810_p2), [#allocation5], 2048  }
  0x12   : > { %900 = vsyncadd (%p810_p2), [#allocation5], 4294965248  ;;  %v691_v0 = vld [vmem:[#allocation2 + $0x70] sm:$0xf]  ;;  %v778_v1 = vld [vmem:[#allocation2 + $0x74] sm:$0xf0] }
  0x13   : > { %v777_v2 = vld [vmem:[#allocation2 + $0x74] sm:$0xf]  ;;  %v692_v3 = vor.u32 %v778_v1, %v691_v0  ;;  %v693_v4 = vld [vmem:[#allocation2 + $0x78] sm:$0xf0]  ;;  %v683_v5 = vld [vmem:[#allocation2 + $0x60] sm:$0xf] }
  0x14   : > { %v776_v6 = vld [vmem:[#allocation2 + $0x64] sm:$0xf0]  ;;  %v696_v7 = vor.u32 %v777_v2, %v693_v4  ;;  %v775_v8 = vld [vmem:[#allocation2 + $0x64] sm:$0xf]  ;;  %v685_v9 = vld [vmem:[#allocation2 + $0x68] sm:$0xf0] }
  0x15   : > { %357 = vmatpush.bf16.msra.mxu0 %v692_v3  ;;  %v684_v10 = vor.u32 %v776_v6, %v683_v5  ;;  %v688_v11 = vor.u32 %v775_v8, %v685_v9  ;;  %v675_v12 = vld [vmem:[#allocation2 + $0x50] sm:$0xf]  ;;  %v774_v13 = vld [vmem:[#allocation2 + $0x54] sm:$0xf0]  ;;  %v773_v14 = vld [vmem:[#allocation2 + $0x54] sm:$0xf] }
  0x16   : > { %370 = vmatpush.bf16.msra.mxu1 %v696_v7  ;;  %v677_v15 = vld [vmem:[#allocation2 + $0x58] sm:$0xf0]  ;;  %v676_v16 = vor.u32 %v774_v13, %v675_v12  ;;  %v667_v18 = vld [vmem:[#allocation2 + $0x40] sm:$0xf]  ;;  %v772_v19 = vld [vmem:[#allocation2 + $0x44] sm:$0xf0] }
  0x17   : > { %v680_v17 = vor.u32 %v773_v14, %v677_v15  ;;  %v771_v20 = vld [vmem:[#allocation2 + $0x44] sm:$0xf]  ;;  %v669_v21 = vld [vmem:[#allocation2 + $0x48] sm:$0xf0]  ;;  %v668_v22 = vor.u32 %v772_v19, %v667_v18  ;;  %v786_v23 = vld [vmem:[#allocation4 + $0x38] sm:$0xff]  ;;  %p246_p6 = scmp.lt.s32.totalorder %s950_s22, 1 }
  0x18   : > { %v794_v24 = vld [vmem:[#allocation4 + $0x78] sm:$0xff]  ;;  %v672_v25 = vor.u32 %v771_v20, %v669_v21  ;;  %v659_v26 = vld [vmem:[#allocation2 + $0x30] sm:$0xf]  ;;  %v769_v28 = vld [vmem:[#allocation2 + $0x34] sm:$0xf]  ;;  %519 = vmatpush.bf16.msra.mxu2 %v786_v23 }
  0x19   : > { %358 = vmatpush.bf16.msra.mxu0 %v684_v10  ;;  %v770_v27 = vld [vmem:[#allocation2 + $0x34] sm:$0xf0]  ;;  %v661_v29 = vld [vmem:[#allocation2 + $0x38] sm:$0xf0]  ;;  %532 = vmatpush.bf16.msra.mxu3 %v794_v24  ;;  %v785_v30 = vld [vmem:[#allocation4 + $0x30] sm:$0xff]  ;;  %s1008_s22 = smov (!%p246_p6, %s950_s22), 1 }
  0x1a   : > { %371 = vmatpush.bf16.msra.mxu1 %v688_v11  ;;  %v793_v31 = vld [vmem:[#allocation4 + $0x70] sm:$0xff]  ;;  %v660_v32 = vor.u32 %v770_v27, %v659_v26  ;;  %v664_v33 = vor.u32 %v769_v28, %v661_v29  ;;  %v651_v34 = vld [vmem:[#allocation2 + $0x20] sm:$0xf]  ;;  %v768_v35 = vld [vmem:[#allocation2 + $0x24] sm:$0xf0]  ;;  %s631_s10 = sshll.u32 %s1008_s22, 2 }
  0x1b   : > { %v767_v36 = vld [vmem:[#allocation2 + $0x24] sm:$0xf]  ;;  %v653_v37 = vld [vmem:[#allocation2 + $0x28] sm:$0xf0]  ;;  %v652_v40 = vor.u32 %v768_v35, %v651_v34  ;;  %v643_v42 = vld [vmem:[#allocation2 + $0x10] sm:$0xf]  ;;  %s249_s13 = scalar_lea.vmem %s1000_s0, %s631_s10  ;;  %s253_s21 = scalar_lea.vmem %s1005_s5, %s631_s10 }
  0x1c   : > { %520 = vmatpush.bf16.msra.mxu2 %v785_v30  ;;  %v784_v38 = vld [vmem:[#allocation4 + $0x28] sm:$0xff]  ;;  %v656_v41 = vor.u32 %v767_v36, %v653_v37  ;;  %v766_v43 = vld [vmem:[#allocation2 + $0x14] sm:$0xf0]  ;;  %v765_v44 = vld [vmem:[#allocation2 + $0x14] sm:$0xf] }
  0x1d   : > { %359 = vmatpush.bf16.msra.mxu0 %v676_v16  ;;  %533 = vmatpush.bf16.msra.mxu3 %v793_v31  ;;  %v792_v39 = vld [vmem:[#allocation4 + $0x68] sm:$0xff]  ;;  %v645_v45 = vld [vmem:[#allocation2 + $0x18] sm:$0xf0]  ;;  %v783_v46 = vld [vmem:[#allocation4 + $0x20] sm:$0xff]  ;;  %v644_v48 = vor.u32 %v766_v43, %v643_v42 }
  0x1e   : > { %372 = vmatpush.bf16.msra.mxu1 %v680_v17  ;;  %v791_v47 = vld [vmem:[#allocation4 + $0x60] sm:$0xff]  ;;  %v648_v49 = vor.u32 %v765_v44, %v645_v45  ;;  %v764_v51 = vld [vmem:[#allocation2 + $0x4] sm:$0xf0]  ;;  %v637_v53 = vld [vmem:[#allocation2 + $0x8] sm:$0xf0] }
  0x1f   : > { %v635_v50 = vld [vmem:[#allocation2] sm:$0xf]  ;;  %v763_v52 = vld [vmem:[#allocation2 + $0x4] sm:$0xf]  ;;  %v782_v54 = vld [vmem:[#allocation4 + $0x18] sm:$0xff] }
  0x20   : > { %521 = vmatpush.bf16.msra.mxu2 %v784_v38  ;;  %v790_v55 = vld [vmem:[#allocation4 + $0x58] sm:$0xff]  ;;  %v636_v56 = vor.u32 %v764_v51, %v635_v50  ;;  %v640_v57 = vor.u32 %v763_v52, %v637_v53  ;;  %v781_v58 = vld [vmem:[#allocation4 + $0x10] sm:$0xff]  ;;  %v254_v60 = vld [vmem:[%s249_s13] sm:$0xf] }
  0x21   : > { %360 = vmatpush.bf16.msra.mxu0 %v668_v22  ;;  %534 = vmatpush.bf16.msra.mxu3 %v792_v39  ;;  %v789_v59 = vld [vmem:[#allocation4 + $0x50] sm:$0xff]  ;;  %v780_v61 = vld [vmem:[#allocation4 + $0x8] sm:$0xff]  ;;  %v779_v63 = vld [vmem:[#allocation4] sm:$0xff] }
  0x22   : > { %373 = vmatpush.bf16.msra.mxu1 %v672_v25  ;;  %v788_v62 = vld [vmem:[#allocation4 + $0x48] sm:$0xff]  ;;  %v787_v0 = vld [vmem:[#allocation4 + $0x40] sm:$0xff] }
  0x23   : > { %v271_v1 = vld [vmem:[%s1002_s2] sm:$0x3] }
  0x24   : > { %522 = vmatpush.bf16.msra.mxu2 %v783_v46  ;;  %v273_v2 = vperm.slane %v271_v1, 0  ;;  %v274_v3 = vperm.slane %v271_v1, 1  ;;  %v828_v14 = vld [vmem:[%s1004_s4] ss:$0 sm:$0xff] }
  0x25   : > { %361 = vmatpush.bf16.msra.mxu0 %v660_v32  ;;  %535 = vmatpush.bf16.msra.mxu3 %v791_v47 }
  0x26   : > { %374 = vmatpush.bf16.msra.mxu1 %v664_v33 }
  0x28   : > { %523 = vmatpush.bf16.msra.mxu2 %v782_v54 }
  0x29   : > { %362 = vmatpush.bf16.msra.mxu0 %v652_v40  ;;  %536 = vmatpush.bf16.msra.mxu3 %v790_v55 }
  0x2a   : > { %375 = vmatpush.bf16.msra.mxu1 %v656_v41 }
  0x2c   : > { %524 = vmatpush.bf16.msra.mxu2 %v781_v58 }
  0x2d   : > { %363 = vmatpush.bf16.msra.mxu0 %v644_v48  ;;  %537 = vmatpush.bf16.msra.mxu3 %v789_v59 }
  0x2e   : > { %376 = vmatpush.bf16.msra.mxu1 %v648_v49 }
  0x30   : > { %525 = vmatpush.bf16.msra.mxu2 %v780_v61 }
  0x31   : > { %364 = vmatpush.bf16.msra.mxu0 %v636_v56  ;;  %538 = vmatpush.bf16.msra.mxu3 %v788_v62 }
  0x32   : > { %377 = vmatpush.bf16.msra.mxu1 %v640_v57 }
  0x34   : > { %365 = vmatmul.bf16.vlgmr.msra.gmra.mxu0 %v254_v60  ;;  %526 = vmatpush.bf16.msra.mxu2 %v779_v63 }
  0x35   : > { %378 = vmatmul.bf16.vlgmr.msra.gmra.mxu1 %v254_v60  ;;  %539 = vmatpush.bf16.msra.mxu3 %v787_v0 }
  0xb1   : > { %v366_v4 = vpop.f32.mrf.mxu0 }
  0xb2   : > { %v367_v5 = vadd.f32 %v366_v4, %v273_v2  ;;  %v379_v6 = vpop.f32.mrf.mxu1 }
  0xb3   : > { %v380_v7 = vadd.f32 %v379_v6, %v274_v3 }
  0xb4   : > { %v383_v8 = vmax.f32 %v367_v5, 0.0 }
  0xb5   : > { %v384_v9 = vmax.f32 %v380_v7, 0.0 }
  0xb6   : > { %v385_v10 = vpack.c.bf16 %v383_v8, %v383_v8 }
  0xb7   : > { %v386_v11 = vpack.c.bf16 %v384_v9, %v384_v9 }
  0xb8   : > { %527 = vmatmul.bf16.vlgmr.msra.gmra.mxu2 %v385_v10 }
  0xb9   : > { %540 = vmatmul.bf16.vlgmr.msra.gmra.mxu3 %v386_v11  ;;  %v368_v12 = vpop.f32.mrf.mxu0 }
  0xba   : > { %v381_v13 = vpop.f32.mrf.mxu1 }
 0x13b   : > { %v528_v15 = vpop.f32.mrf.mxu2 }
 0x13c   : > { %v529_v16 = vadd.f32 %v828_v14, %v528_v15  ;;  %v541_v17 = vpop.f32.mrf.mxu3 }
 0x13e   : > { %v542_v18 = vadd.f32 %v541_v17, %v529_v16 }
 0x140   : > { %v545_v19 = vpack.c.bf16 %v542_v18, %v542_v18 }
 0x142   : > { %546 = vst [vmem:[%s253_s21] sm:$0xf] %v545_v19 }
 0x143   : > { %v530_v20 = vpop.f32.mrf.mxu2 }
 0x144   : > { %v543_v21 = vpop.f32.mrf.mxu3 }
 0x145 PF: > { %s17_s18 = sadd.s32 1, %s903_s18  }
 0x146   : > { %p14_p7 = scmp.ge.s32.totalorder %s17_s18, 4  }
 0x148   :  { %16 = sbr.rel (!%p14_p7) target bundleno = 2 (0x2), region = 79 }
 0x14d   :  { %566 = vsyncpa [#allocation3], 1 }
 0x14e   :  { %568 = vsyncpa [#allocation3 + $0x1], 1 }
 0x14f   :  { %569 = vsyncpa [#allocation5], 1 }

// kernel: baseline_transformer_forward.73
= control target key start
LH: loop header
LB: loop body
LE: loop exit
PB: predicated region body
PF: predicated region fallthrough
CT: control target
= control target key end

     0   :  { %8 = vsyncpa [#allocation4], 0  ;;  %s928_s0 = inlined_call_operand.vmem [shape: bf16[16,128], index: 0, kind: input, shape index: {}]   ;;  %s929_s1 = inlined_call_operand.hbm [shape: bf16[128,256], index: 1, kind: input, shape index: {}]   ;;  %s930_s2 = inlined_call_operand.vmem [shape: f32[1,256], index: 2, kind: input, shape index: {}]   ;;  %s931_s3 = inlined_call_operand.hbm [shape: f32[16,256], index: 3, kind: output, shape index: {}]  }
   0x1   :  { %9 = vsyncpa [#allocation5], 0 }
   0x2   :  { %11 = vsyncpa [#allocation5 + $0x1], 0  ;;  %s825_s12 = smov 0   ;;  %s827_s13 = smov 0  }
   0x3   :  { %s829_s14 = smov 0   ;;  %s831_s15 = smov 0  }
   0x4   :  { %s833_s16 = smov 0   ;;  %s835_s17 = smov 0  }
   0x5 LB: > { %s524_s18 = sadd.s32 4294967295, %s800_s17   ;;  %s525_s19 = sadd.s32 4294967294, %s800_s17   ;;  %s800_s17 = sphi %s835_s17, %s17_s17   ;;  %s796_s16 = sphi %s833_s16, %s938_s16   ;;  %s792_s15 = sphi %s831_s15, %s937_s15   ;;  %s788_s14 = sphi %s829_s14, %s936_s14   ;;  %s784_s13 = sphi %s827_s13, %s935_s13   ;;  %s780_s12 = sphi %s825_s12, %s934_s12  }
   0x6   : > { %s36_s20 = sadd.s32 1, %s796_s16  ;;  %s127_s21 = sadd.s32 1, %s788_s14 }
   0x7   : > { %p38_p0 = scmp.ge.s32.totalorder %s36_s20, 2  ;;  %p137_p1 = scmp.ne.s32.totalorder %s788_s14, %s784_s13 }
   0x8   : > { %p138_p2 = scmp.eq.s32.totalorder %s524_s18, 1  ;;  %p143_p3 = scmp.ne.s32.totalorder %s784_s13, %s780_s12 }
   0x9   : > { %s940_s20 = smov (%p38_p0, %s36_s20), 0  ;;  %p144_p5 = scmp.eq.s32.totalorder %s525_s19, 1 }
   0xa   : > { %p865_p4 = por %p138_p2, %p137_p1  ;;  %s122_s23 = ssub.s32 %s796_s16, %s940_s20 }
   0xb   : > { %p526_p6 = scmp.ge.s32.totalorder %s800_s17, 1  ;;  %p125_p7 = scmp.eq.s32.totalorder %s122_s23, 0 }
   0xc   : > { %p872_p8 = por %p144_p5, %p143_p3  ;;  %p151_p9 = scmp.lt.s32.totalorder %s800_s17, 3 }
   0xd   : > { %s878_s25 = scalar_select %p125_p7, %s788_s14, %s127_s21  }
   0xe   : > { %p152_p10 = pnand %p526_p6, %p151_p9  ;;  %p634_p11 = scmp.eq.s32.totalorder %s524_s18, 0 }
   0xf   : > { %s168_s28 = sshll.u32 %s929_s1, 4  ;;  %s802_s29 = smov [#allocation3]   ;;  %s169_s28 = int_to_ptr.hbm [resolvable:$true] %s168_s28 }
  0x10   : > { %p626_p12 = pneg %p152_p10  ;;  %s170_s30 = sshll.u32 %s802_s29, 4  ;;  %s171_s30 = int_to_ptr.vmem [resolvable:$true] %s170_s30 }
  0x11   : > { %s803_s4 = smov 128   ;;  %s804_s5 = smov 8  }
  0x12   : > { %p627_p13 = pnand %p634_p11, %p626_p12  ;;  %204 = sbr.rel (%p152_p10) target bundleno = 193 (0xc1), region = 32 }
  0x14   : > { %629 = dma.hbm_to_vmem [thread:$0]  (!%p627_p13), %s169_s28, 2048, %s171_s30, [#allocation4], %s803_s4, %s803_s4, %s804_s5  }
  0x17   : > { %771 = dma.done.wait (%p634_p11), [#allocation4], 2048  }
  0x18   : > { %773 = vsyncadd (%p634_p11), [#allocation4], 4294965248  ;;  %v592_v0 = vld [vmem:[#allocation3 + $0x70] sm:$0xf]  ;;  %v618_v1 = vld [vmem:[#allocation3 + $0x74] sm:$0xf0] }
  0x19   : > { %v617_v2 = vld [vmem:[#allocation3 + $0x74] sm:$0xf]  ;;  %v593_v3 = vor.u32 %v618_v1, %v592_v0  ;;  %v594_v4 = vld [vmem:[#allocation3 + $0x78] sm:$0xf0]  ;;  %v584_v5 = vld [vmem:[#allocation3 + $0x60] sm:$0xf] }
  0x1a   : > { %v616_v6 = vld [vmem:[#allocation3 + $0x64] sm:$0xf0]  ;;  %v597_v7 = vor.u32 %v617_v2, %v594_v4  ;;  %v615_v8 = vld [vmem:[#allocation3 + $0x64] sm:$0xf]  ;;  %v586_v9 = vld [vmem:[#allocation3 + $0x68] sm:$0xf0] }
  0x1b   : > { %355 = vmatpush.bf16.msra.mxu0 %v593_v3  ;;  %v585_v10 = vor.u32 %v616_v6, %v584_v5  ;;  %v589_v11 = vor.u32 %v615_v8, %v586_v9  ;;  %v576_v12 = vld [vmem:[#allocation3 + $0x50] sm:$0xf]  ;;  %v614_v13 = vld [vmem:[#allocation3 + $0x54] sm:$0xf0]  ;;  %v613_v14 = vld [vmem:[#allocation3 + $0x54] sm:$0xf] }
  0x1c   : > { %368 = vmatpush.bf16.msra.mxu1 %v597_v7  ;;  %v578_v15 = vld [vmem:[#allocation3 + $0x58] sm:$0xf0]  ;;  %v577_v16 = vor.u32 %v614_v13, %v576_v12  ;;  %v568_v18 = vld [vmem:[#allocation3 + $0x40] sm:$0xf]  ;;  %v612_v19 = vld [vmem:[#allocation3 + $0x44] sm:$0xf0] }
  0x1d   : > { %v581_v17 = vor.u32 %v613_v14, %v578_v15  ;;  %v611_v20 = vld [vmem:[#allocation3 + $0x44] sm:$0xf]  ;;  %v570_v21 = vld [vmem:[#allocation3 + $0x48] sm:$0xf0]  ;;  %v569_v22 = vor.u32 %v612_v19, %v568_v18  ;;  %v560_v24 = vld [vmem:[#allocation3 + $0x30] sm:$0xf] }
  0x1e   : > { %v573_v23 = vor.u32 %v611_v20, %v570_v21  ;;  %v610_v25 = vld [vmem:[#allocation3 + $0x34] sm:$0xf0]  ;;  %v609_v26 = vld [vmem:[#allocation3 + $0x34] sm:$0xf]  ;;  %v562_v27 = vld [vmem:[#allocation3 + $0x38] sm:$0xf0] }
  0x1f   : > { %356 = vmatpush.bf16.msra.mxu0 %v585_v10  ;;  %v561_v28 = vor.u32 %v610_v25, %v560_v24  ;;  %v565_v29 = vor.u32 %v609_v26, %v562_v27  ;;  %v552_v30 = vld [vmem:[#allocation3 + $0x20] sm:$0xf]  ;;  %v608_v31 = vld [vmem:[#allocation3 + $0x24] sm:$0xf0]  ;;  %v607_v32 = vld [vmem:[#allocation3 + $0x24] sm:$0xf] }
  0x20   : > { %369 = vmatpush.bf16.msra.mxu1 %v589_v11  ;;  %v554_v33 = vld [vmem:[#allocation3 + $0x28] sm:$0xf0]  ;;  %p235_p0 = scmp.lt.s32.totalorder %s792_s15, 1  ;;  %v553_v34 = vor.u32 %v608_v31, %v552_v30  ;;  %v544_v36 = vld [vmem:[#allocation3 + $0x10] sm:$0xf]  ;;  %s232_s11 = sand.u32 1, %s784_s13  }
  0x21   : > { %v557_v35 = vor.u32 %v607_v32, %v554_v33  ;;  %v606_v37 = vld [vmem:[#allocation3 + $0x14] sm:$0xf0]  ;;  %v605_v38 = vld [vmem:[#allocation3 + $0x14] sm:$0xf]  ;;  %v546_v39 = vld [vmem:[#allocation3 + $0x18] sm:$0xf0] }
  0x22   : > { %s236_s6 = scalar_select %p235_p0, %s792_s15, 1  ;;  %v545_v40 = vor.u32 %v606_v37, %v544_v36  ;;  %v549_v41 = vor.u32 %v605_v38, %v546_v39  ;;  %v536_v42 = vld [vmem:[#allocation3] sm:$0xf]  ;;  %v604_v43 = vld [vmem:[#allocation3 + $0x4] sm:$0xf0] }
  0x23   : > { %357 = vmatpush.bf16.msra.mxu0 %v577_v16  ;;  %v603_v44 = vld [vmem:[#allocation3 + $0x4] sm:$0xf]  ;;  %v538_v45 = vld [vmem:[#allocation3 + $0x8] sm:$0xf0]  ;;  %v537_v46 = vor.u32 %v604_v43, %v536_v42  ;;  %s619_s18 = sshll.u32 %s792_s15, 4  ;;  %s532_s23 = sshll.u32 %s232_s11, 4 }
  0x24   : > { %370 = vmatpush.bf16.msra.mxu1 %v581_v17  ;;  %s533_s7 = sshll.u32 %s236_s6, 2  ;;  %v541_v47 = vor.u32 %v603_v44, %v538_v45  ;;  %v390_v49 = vld [vmem:[%s930_s2] sm:$0x3]  ;;  %s414_s28 = scalar_lea.hbm %s931_s3, %s619_s18 }
  0x25   : > { %s241_s10 = scalar_lea.vmem %s928_s0, %s533_s7  ;;  %v392_v50 = vperm.slane %v390_v49, 0  ;;  %v393_v51 = vperm.slane %v390_v49, 1  ;;  %s234_s29 = scalar_lea.vmem [#allocation6], %s532_s23 }
  0x26   : > { %v258_v48 = vld [vmem:[%s241_s10] sm:$0xf]  ;;  %s416_s30 = sshll.u32 %s234_s29, 4  ;;  %s418_s4 = sshll.u32 %s414_s28, 4  ;;  %s417_s30 = int_to_ptr.vmem [resolvable:$true] %s416_s30  ;;  %s419_s4 = int_to_ptr.hbm [resolvable:$true] %s418_s4 }
  0x27   : > { %358 = vmatpush.bf16.msra.mxu0 %v569_v22  ;;  %s401_s15 = scalar_lea.sflag [#allocation5], %s232_s11  ;;  %s732_s5 = sshra.s32 %s419_s4, 4  ;;  %s733_s5 = int_to_ptr.hbm [resolvable:$true] %s732_s5 }
  0x28   : > { %371 = vmatpush.bf16.msra.mxu1 %v573_v23  ;;  %s734_s6 = scalar_lea.hbm %s733_s5, 16  ;;  %s738_s9 = scalar_lea.hbm %s931_s3, 32 }
  0x29   : > { %p735_p1 = scmp.ne.s32.totalorder %s733_s5, %s734_s6  ;;  %p739_p5 = scmp.lt.s32.totalorder %s733_s5, %s931_s3 }
  0x2a   : > { %p740_p6 = scmp.lt.s32.totalorder %s738_s9, %s734_s6 }
  0x2b   : > { %359 = vmatpush.bf16.msra.mxu0 %v561_v28  ;;  %p736_p2 = pnand %p735_p1, %p865_p4 }
  0x2c   : > { %372 = vmatpush.bf16.msra.mxu1 %v565_v29  ;;  %p741_p7 = por %p740_p6, %p739_p5 }
  0x2d   : > { %p737_p3 = pneg %p736_p2 }
  0x2f   : > { %360 = vmatpush.bf16.msra.mxu0 %v553_v34  ;;  %p742_p9 = pnand %p741_p7, %p737_p3 }
  0x30   : > { %373 = vmatpush.bf16.msra.mxu1 %v557_v35 }
  0x33   : > { %361 = vmatpush.bf16.msra.mxu0 %v545_v40 }
  0x34   : > { %374 = vmatpush.bf16.msra.mxu1 %v549_v41 }
  0x37   : > { %362 = vmatpush.bf16.msra.mxu0 %v537_v46 }
  0x38   : > { %375 = vmatpush.bf16.msra.mxu1 %v541_v47 }
  0x3a   : > { %363 = vmatmul.bf16.vlgmr.msra.gmra.mxu0 %v258_v48 }
  0x3b   : > { %376 = vmatmul.bf16.vlgmr.msra.gmra.mxu1 %v258_v48 }
  0xb7   : > { %v364_v52 = vpop.f32.mrf.mxu0 }
  0xb8   : > { %v396_v53 = vadd.f32 %v392_v50, %v364_v52  ;;  %v377_v54 = vpop.f32.mrf.mxu1 }
  0xb9   : > { %v397_v55 = vadd.f32 %v393_v51, %v377_v54 }
  0xba   : > { %398 = vst [vmem:[%s234_s29] sm:$0xff] %v396_v53 }
  0xbb   : > { %399 = vst [vmem:[%s234_s29 + $0x8] sm:$0xff] %v397_v55 }
  0xbc   : > { %745 = shalt.err (!%p742_p9)
}
  0xbd   : > { %624 = dma.vmem_to_hbm [thread:$0]  (%p865_p4), %s417_s30, 256, %s419_s4, %s401_s15  }
  0xbf   : > { %v366_v56 = vpop.f32.mrf.mxu0 }
  0xc0   : > { %v379_v57 = vpop.f32.mrf.mxu1 }
  0xc1 PF: > { %p636_p10 = scmp.ge.s32.totalorder %s800_s17, 2  ;;  %s430_s11 = sand.u32 1, %s780_s12  }
  0xc2   : > { %s431_s19 = scalar_lea.sflag [#allocation5], %s430_s11 }
  0xc3   : > { %p631_p11 = pnand %p636_p10, %p872_p8 }
  0xc5   : > { %p632_p12 = pneg %p631_p11 }
  0xc7   : > { %775 = dma.done.wait (%p632_p12), %s431_s19, 256  }
  0xc8   : > { %777 = vsyncadd (%p632_p12), %s431_s19, 4294967040  ;;  %s17_s17 = sadd.s32 1, %s800_s17   ;;  %s934_s12 = smov %s784_s13 }
  0xc9   : > { %p14_p13 = scmp.ge.s32.totalorder %s17_s17, 4   ;;  %s935_s13 = smov %s788_s14 }
  0xca   : > { %s936_s14 = smov %s878_s25  ;;  %s937_s15 = smov %s796_s16 }
  0xcb   : > { %s938_s16 = smov %s940_s20  ;;  %16 = sbr.rel (!%p14_p13) target bundleno = 5 (0x5), region = 84 }
  0xd0   :  { %437 = vsyncpa [#allocation4], 1 }
  0xd1   :  { %439 = vsyncpa [#allocation4 + $0x1], 1 }
  0xd2   :  { %440 = vsyncpa [#allocation5], 1 }
  0xd3   :  { %442 = vsyncpa [#allocation5 + $0x1], 1 }

// kernel: baseline_transformer_forward.56
= control target key start
LH: loop header
LB: loop body
LE: loop exit
PB: predicated region body
PF: predicated region fallthrough
CT: control target
= control target key end

     0   :  { %s1006_s15 = smov 0   ;;  %s1008_s16 = smov 0   ;;  %s1187_s0 = inlined_call_operand.vmem [shape: bf16[2,8,128], index: 0, kind: input, shape index: {}]   ;;  %s1188_s1 = inlined_call_operand.vmem [shape: bf16[2,8,256], index: 1, kind: input, shape index: {}, may-alias: {1,2}]   ;;  %s1189_s2 = inlined_call_operand.vmem [shape: bf16[2,8,256], index: 2, kind: input, shape index: {}, may-alias: {1,2}]   ;;  %s1190_s3 = inlined_call_operand.vmem [shape: f32[2,1,8], index: 3, kind: input, shape index: {}]   ;;  %s1191_s4 = inlined_call_operand.vmem [shape: bf16[2,8,128], index: 4, kind: output, shape index: {}]  }
   0x1   :  { %s1010_s17 = smov 0  }
   0x2 LB: > { %s33_s18 = sadd.s32 1, %s966_s16  ;;  %p864_p0 = scmp.ge.s32.totalorder %s970_s17, 1  ;;  %s970_s17 = sphi %s1010_s17, %s14_s17   ;;  %s966_s16 = sphi %s1008_s16, %s1193_s16   ;;  %s962_s15 = sphi %s1006_s15, %s1192_s15  }
   0x3   : > { %p35_p1 = scmp.ge.s32.totalorder %s33_s18, 2  ;;  %p233_p2 = scmp.lt.s32.totalorder %s970_s17, 3 }
   0x5   : > { %s1195_s18 = smov (%p35_p1, %s33_s18), 0  ;;  %p234_p3 = pnand %p864_p0, %p233_p2 }
   0x6   : > { %p288_p4 = scmp.lt.s32.totalorder (!%p234_p3), %s962_s15, 1  ;;  %s973_s30 = smov (!%p234_p3), 64  }
   0x7   : > { %237 = sbr.rel (%p234_p3) target bundleno = 1102 (0x44e), region = 36  ;;  %s974_s5 = smov (!%p234_p3), 96  }
   0x8   : > { %s975_s6 = smov (!%p234_p3), 32  }
   0xc   : > { %s1197_s15 = smov (!%p288_p4, %s962_s15), 1  ;;  %vm343_vm0 = vcmask 261120   ;;  %vm332_vm1 = vcmask 31744   ;;  %v972_v3 = vmov -1e+30   ;;  %vm364_vm2 = vcmask 64512  }
   0xd   : > { %s882_s19 = sshll.u32 %s1197_s15, 3  ;;  %s865_s23 = sshll.u32 %s1197_s15, 2  ;;  %333 = vst.msk [vmem:[#allocation2] sm:$0xff] %vm332_vm1, %v972_v3  ;;  %v976_v13 = vmov 0   ;;  %v977_v14 = vmov 0.0   ;;  %vm386_vm3 = vcmask 7168  }
   0xe   : > { %s303_s22 = scalar_lea.vmem %s1188_s1, %s882_s19  ;;  %s319_s26 = scalar_lea.vmem %s1190_s3, %s1197_s15  ;;  %917 = vset.pattern.permute.xlu1 %v976_v13  ;;  %335 = vst [vmem:[#allocation4] sm:$0xff] %v977_v14  ;;  %vm399_vm4 = vcmask 1043456   ;;  %v978_v51 = vmov 1   ;;  %v979_v52 = vmov 2   ;;  %v980_v53 = vmov 3  }
   0xf   : > { %v338_v0 = vld [vmem:[%s303_s22] sm:$0xf]  ;;  %s294_s29 = scalar_lea.vmem %s1187_s0, %s865_s23  ;;  %334 = vst.msk [vmem:[#allocation3] sm:$0xff] %vm332_vm1, %v977_v14  ;;  %s798_s9 = scalar_lea.vmem %s1189_s2, %s882_s19  ;;  %918 = vset.pattern.permute.xlu2 %v978_v51  ;;  %919 = vset.pattern.permute.xlu0 %v979_v52  ;;  %vm470_vm5 = vcmask 15368   ;;  %vm557_vm6 = vcmask 23568   ;;  %vm641_vm7 = vcmask 31768  }
  0x10   : > { %v348_v1 = vsel %vm343_vm0, %v338_v0, 0  ;;  %v337_v2 = vld [vmem:[%s294_s29] sm:$0xf]  ;;  %v425_v8 = vunpack.c.l.b16 %v338_v0  ;;  %v871_v21 = vld [vmem:[%s798_s9 + $0x4] sm:$0xf]  ;;  %vm509_vm8 = vcmask 523520   ;;  %s326_s12 = scalar_lea.vmem %s1191_s4, %s865_s23 }
  0x11   : > { %357 = vmatpush.bf16.xpose.msra.mxu0 %v348_v1  ;;  %v1045_v4 = vld [vmem:[%s319_s26] ss:$0 sm:$0xff]  ;;  %v420_v11 = vunpack.c.l.b16 %v337_v2  ;;  %v401_v22 = vsel %vm399_vm4, %v871_v21, 0  ;;  %v481_v48 = vunpack.c.l.b16 %v871_v21  ;;  %vm593_vm9 = vcmask 785920  }
  0x12   : > { %v426_v10 = vpack.c.b16 %v425_v8, %v425_v8  ;;  %410 = vmatpush.bf16.msra.mxu1 %v401_v22  ;;  %vm677_vm10 = vcmask 1048320  }
  0x13   : > { %v421_v12 = vpack.c.b16 %v420_v11, %v420_v11  ;;  %v482_v50 = vpack.c.b16 %v481_v48, %v481_v48 }
  0x14   : > { %514 = vrot.lane.b32.xlu2 %v426_v10, %s973_s30  ;;  %v1055_v15 = vld [vmem:[#allocation2] sm:$0xff] }
  0x18   : > { %872 = vmatmul.msk.bf16.vlgmr.msra.gmra.mxu0 %vm343_vm0, %v337_v2 }
  0x1c   : > { %512 = vrot.lane.b32.xlu2 %v421_v12, %s973_s30 }
  0x24   : > { %596 = vrot.lane.b32.xlu2 %v421_v12, %s975_s6 }
  0x6e   : > { %v515_v23 = vpop.permute.xlu2 %514 }
  0x6f   : > { %v520_v24 = vsel %vm343_vm0, %v515_v23, 0 }
  0x70   : > { %529 = vmatpush.bf16.xpose.msrb.mxu1 %v520_v24 }
  0x76   : > { %v513_v31 = vpop.permute.xlu2 %512 }
  0x7e   : > { %v597_v34 = vpop.permute.xlu2 %596 }
  0x95   : > { %v359_v5 = vpop.f32.mrf.mxu0 }
  0x96   : > { %v360_v6 = vadd.f32 %v1045_v4, %v359_v5 }
  0x98   : > { %v365_v7 = vsel %vm364_vm2, %v360_v6, -inf }
  0x99   : > { %366 = vmax.xlane.f32.xlu0 %v365_v7 }
  0x9d   : > { %v361_v9 = vpop.f32.mrf.mxu0 }
  0xad   : > { %427 = vrot.lane.b32.xlu0 %v426_v10, %s974_s5 }
 0x10c   : > { %v367_v16 = vpop.xlane.xlu0 %366 }
 0x10d   : > { %v1058_v17 = vmax.f32 %v1055_v15, %v367_v16 }
 0x10f   : > { %v369_v18 = vsub.f32 %v1055_v15, %v1058_v17  ;;  %418 = vst.msk [vmem:[#allocation2] sm:$0xff] %vm386_vm3, %v1058_v17  ;;  %374 = vperm.xlu1 %917, %v1058_v17  }
 0x111   : > { %v370_v60 = vmul.f32 1.442695, %v369_v18 }
 0x116   : > { %v448_v54 = vld [vmem:[#allocation2] sm:$0xff] }
 0x117   : > { %422 = vrot.lane.b32.xlu1 %v421_v12, %s974_s5 }
 0x118   : > { %920 = vset.pattern.permute.xlu1 %v980_v53 }
 0x11f   : > { %598 = vrot.lane.b32.xlu1 %v426_v10, %s975_s6  ;;  %v428_v19 = vpop.permute.xlu0 %427 }
 0x120   : > { %v433_v20 = vsel %vm343_vm0, %v428_v19, 0 }
 0x121   : > { %442 = vmatpush.bf16.xpose.msra.mxu2 %v433_v20 }
 0x181   : > { %v375_v25 = vpop.permute.xlu1 %374 }
 0x182   : > { %v377_v26 = vsub.f32 %v360_v6, %v375_v25 }
 0x184   : > { %v378_v27 = vmul.f32 1.442695, %v377_v26 }
 0x186   : > { %930 = vpow2.f32 %v378_v27 }
 0x187   : > { %932 = vpow2.f32 %v370_v60 }
 0x189   : > { %v423_v28 = vpop.permute.xlu1 %422 }
 0x18a   : > { %874 = vmatmul.msk.bf16.vlgmr.msra.gmra.mxu2 %vm343_vm0, %v423_v28 }
 0x18c   : > { %v1076_v29 = vpop.eup %930 }
 0x18d   : > { %v395_v30 = vpack.c.bf16 %v1076_v29, %v1076_v29  ;;  %v933_v1 = vpop.eup %932 }
 0x18f   : > { %873 = vmatmul.msk.bf16.vlgmr.msra.gmra.mxu1 %vm364_vm2, %v395_v30 }
 0x191   : > { %v599_v32 = vpop.permute.xlu1 %598 }
 0x192   : > { %v604_v33 = vsel %vm343_vm0, %v599_v32, 0 }
 0x193   : > { %613 = vmatpush.bf16.xpose.msrb.mxu0 %v604_v33 }
 0x19a   : > { %878 = vmatmul.msk.bf16.vlgmr.msrb.gmra.mxu0 %vm343_vm0, %v597_v34 }
 0x19f   : > { %876 = vmatmul.msk.bf16.vlgmr.msrb.gmra.mxu1 %vm343_vm0, %v513_v31 }
 0x20c   : > { %v1084_v35 = vpop.f32.mrf.mxu1 }
 0x20d   : > { %v444_v36 = vpop.f32.mrf.mxu2 }
 0x20e   : > { %v1087_v37 = vadd.f32 %v1045_v4, %v444_v36 }
 0x210   : > { %v449_v38 = vsel %vm364_vm2, %v1087_v37, -inf }
 0x211   : > { %450 = vmax.xlane.f32.xlu1 %v449_v38 }
 0x214   : > { %v414_v39 = vpop.f32.mrf.mxu1 }
 0x215   : > { %v446_v40 = vpop.f32.mrf.mxu2 }
 0x217   : > { %v615_v41 = vpop.f32.mrf.mxu0 }
 0x218   : > { %v1092_v42 = vadd.f32 %v1045_v4, %v615_v41 }
 0x21a   : > { %v620_v43 = vsel %vm364_vm2, %v1092_v42, -inf }
 0x21b   : > { %621 = vmax.xlane.f32.xlu0 %v620_v43 }
 0x21c   : > { %v531_v44 = vpop.f32.mrf.mxu1 }
 0x21d   : > { %v1097_v45 = vadd.f32 %v1045_v4, %v531_v44  ;;  %v382_v4 = vsel %vm364_vm2, %v1076_v29, 0.0 }
 0x21f   : > { %v536_v46 = vsel %vm364_vm2, %v1097_v45, -inf  ;;  %v617_v47 = vpop.f32.mrf.mxu0 }
 0x220   : > { %537 = vmax.xlane.f32.xlu2 %v536_v46 }
 0x224   : > { %v533_v49 = vpop.f32.mrf.mxu1 }
 0x22a   : > { %483 = vrot.lane.b32.xlu1 %v482_v50, %s974_s5 }
 0x284   : > { %v451_v55 = vpop.xlane.xlu1 %450 }
 0x285   : > { %v452_v56 = vmax.f32 %v448_v54, %v451_v55 }
 0x287   : > { %v453_v57 = vsub.f32 %v448_v54, %v452_v56  ;;  %511 = vst.msk [vmem:[#allocation2] sm:$0xff] %vm470_vm5, %v452_v56  ;;  %458 = vperm.xlu2 %918, %v452_v56  }
 0x289   : > { %v454_v7 = vmul.f32 1.442695, %v453_v57 }
 0x28b   : > { %934 = vpow2.f32 %v454_v7 }
 0x28e   : > { %v1107_v59 = vld [vmem:[#allocation2] sm:$0xff]  ;;  %v622_v63 = vpop.xlane.xlu0 %621 }
 0x28f   : > { %567 = vrot.lane.b32.xlu2 %v482_v50, %s973_s30 }
 0x290   : > { %921 = vset.pattern.permute.xlu2 %v976_v13 }
 0x291   : > { %v935_v9 = vpop.eup %934 }
 0x293   : > { %v538_v58 = vpop.xlane.xlu2 %537 }
 0x294   : > { %v1113_v61 = vmax.f32 %v1107_v59, %v538_v58 }
 0x296   : > { %v540_v62 = vsub.f32 %v1107_v59, %v1113_v61  ;;  %595 = vst.msk [vmem:[#allocation2] sm:$0xff] %vm557_vm6, %v1113_v61  ;;  %545 = vperm.xlu0 %919, %v1113_v61  }
 0x297   : > { %651 = vrot.lane.b32.xlu2 %v482_v50, %s975_s6 }
 0x29c   : > { %v484_v5 = vpop.permute.xlu1 %483 }
 0x29d   : > { %v1121_v0 = vld [vmem:[#allocation2] sm:$0xff]  ;;  %v489_v6 = vsel %vm399_vm4, %v484_v5, 0 }
 0x29e   : > { %v1124_v2 = vmax.f32 %v1121_v0, %v622_v63  ;;  %498 = vmatpush.bf16.msra.mxu3 %v489_v6 }
 0x29f   : > { %391 = vperm.xlu2 %921, %v933_v1  }
 0x2a0   : > { %v624_v3 = vsub.f32 %v1121_v0, %v1124_v2  ;;  %679 = vst.msk [vmem:[#allocation2] sm:$0xff] %vm641_vm7, %v1124_v2  ;;  %629 = vperm.xlu1 %920, %v1124_v2  }
 0x2a7   : > { %926 = vset.pattern.permute.xlu2 %v979_v52 }
 0x2a8   : > { %922 = vset.pattern.permute.xlu1 %v978_v51 }
 0x2ca   : > { %383 = vadd.xlane.f32.xlu1 %v382_v4 }
 0x2e1   : > { %v459_v8 = vpop.permute.xlu2 %458 }
 0x2e2   : > { %v461_v10 = vsub.f32 %v1087_v37, %v459_v8  ;;  %v380_v37 = vld [vmem:[#allocation3] sm:$0xff] }
 0x2e3   : > { %475 = vperm.xlu1 %922, %v935_v9   ;;  %v381_v38 = vmul.f32 %v933_v1, %v380_v37 }
 0x2e4   : > { %v462_v11 = vmul.f32 1.442695, %v461_v10 }
 0x2e6   : > { %936 = vpow2.f32 %v462_v11 }
 0x2e9   : > { %v568_v12 = vpop.permute.xlu2 %567 }
 0x2ea   : > { %v573_v14 = vsel %vm399_vm4, %v568_v12, 0 }
 0x2eb   : > { %582 = vmatpush.bf16.msrb.mxu3 %v573_v14  ;;  %923 = vset.pattern.permute.xlu1 %v980_v53 }
 0x2ec   : > { %v937_v15 = vpop.eup %936 }
 0x2ed   : > { %v466_v16 = vsel %vm364_vm2, %v937_v15, 0.0  ;;  %v479_v17 = vpack.c.bf16 %v937_v15, %v937_v15 }
 0x2ee   : > { %467 = vadd.xlane.f32.xlu0 %v466_v16 }
 0x2ef   : > { %875 = vmatmul.msk.bf16.vlgmr.msra.gmra.mxu3 %vm364_vm2, %v479_v17 }
 0x2f1   : > { %v652_v18 = vpop.permute.xlu2 %651 }
 0x2f2   : > { %v657_v19 = vsel %vm399_vm4, %v652_v18, 0 }
 0x2f3   : > { %666 = vmatpush.bf16.msrb.mxu2 %v657_v19 }
 0x2f9   : > { %v392_v20 = vpop.permute.xlu2 %391 }
 0x2fa   : > { %v394_v21 = vmul.f32 0.0, %v392_v20 }
 0x2fc   : > { %v416_v22 = vadd.f32 %v1084_v35, %v394_v21  ;;  %v541_v35 = vmul.f32 1.442695, %v540_v62 }
 0x2fe   : > { %417 = vst.msk [vmem:[#allocation4] sm:$0xff] %vm343_vm0, %v416_v22 }
 0x305   : > { %v472_v1 = vld [vmem:[#allocation4] sm:$0xff] }
 0x308   : > { %v546_v23 = vpop.permute.xlu0 %545 }
 0x309   : > { %v548_v24 = vsub.f32 %v1097_v45, %v546_v23 }
 0x30b   : > { %v549_v25 = vmul.f32 1.442695, %v548_v24 }
 0x30d   : > { %938 = vpow2.f32 %v549_v25 }
 0x312   : > { %v630_v26 = vpop.permute.xlu1 %629 }
 0x313   : > { %v939_v27 = vpop.eup %938  ;;  %v632_v28 = vsub.f32 %v1092_v42, %v630_v26 }
 0x314   : > { %v553_v29 = vsel %vm364_vm2, %v939_v27, 0.0  ;;  %v566_v30 = vpack.c.bf16 %v939_v27, %v939_v27 }
 0x315   : > { %v633_v31 = vmul.f32 1.442695, %v632_v28  ;;  %554 = vadd.xlane.f32.xlu2 %v553_v29 }
 0x316   : > { %877 = vmatmul.msk.bf16.vlgmr.msrb.gmra.mxu3 %vm364_vm2, %v566_v30 }
 0x317   : > { %940 = vpow2.f32 %v633_v31 }
 0x318   : > { %942 = vpow2.f32 %v541_v35 }
 0x31d   : > { %v941_v32 = vpop.eup %940 }
 0x31e   : > { %v637_v33 = vsel %vm364_vm2, %v941_v32, 0.0  ;;  %v650_v34 = vpack.c.bf16 %v941_v32, %v941_v32  ;;  %v943_v36 = vpop.eup %942 }
 0x31f   : > { %638 = vadd.xlane.f32.xlu0 %v637_v33 }
 0x320   : > { %879 = vmatmul.msk.bf16.vlgmr.msrb.gmra.mxu2 %vm364_vm2, %v650_v34 }
 0x333   : > { %562 = vperm.xlu0 %919, %v943_v36  }
 0x33b   : > { %924 = vset.pattern.permute.xlu0 %v976_v13  ;;  %v625_v13 = vmul.f32 1.442695, %v624_v3 }
 0x33d   : > { %v384_v39 = vpop.xlane.xlu1 %383  ;;  %944 = vpow2.f32 %v625_v13 }
 0x33e   : > { %v385_v40 = vadd.f32 %v384_v39, %v381_v38 }
 0x340   : > { %387 = vst.msk [vmem:[#allocation3] sm:$0xff] %vm386_vm3, %v385_v40 }
 0x343   : > { %v945_v52 = vpop.eup %944 }
 0x347   : > { %v464_v41 = vld [vmem:[#allocation3] sm:$0xff] }
 0x348   : > { %v465_v42 = vmul.f32 %v935_v9, %v464_v41 }
 0x355   : > { %v476_v0 = vpop.permute.xlu1 %475 }
 0x356   : > { %v478_v2 = vmul.f32 %v476_v0, %v472_v1 }
 0x361   : > { %v468_v43 = vpop.xlane.xlu0 %467 }
 0x362   : > { %v469_v44 = vadd.f32 %v468_v43, %v465_v42 }
 0x364   : > { %471 = vst.msk [vmem:[#allocation3] sm:$0xff] %vm470_vm5, %v469_v44 }
 0x36b   : > { %v551_v47 = vld [vmem:[#allocation3] sm:$0xff] }
 0x36c   : > { %v552_v48 = vmul.f32 %v943_v36, %v551_v47 }
 0x372   : > { %v500_v45 = vpop.f32.mrf.mxu3 }
 0x373   : > { %505 = vrot.lane.b32.xlu2 %v500_v45, %s975_s6 }
 0x37a   : > { %v502_v46 = vpop.f32.mrf.mxu3 }
 0x388   : > { %v555_v49 = vpop.xlane.xlu2 %554 }
 0x389   : > { %v556_v50 = vadd.f32 %v555_v49, %v552_v48 }
 0x38b   : > { %558 = vst.msk [vmem:[#allocation3] sm:$0xff] %vm557_vm6, %v556_v50 }
 0x392   : > { %v635_v54 = vld [vmem:[#allocation3] sm:$0xff]  ;;  %v639_v56 = vpop.xlane.xlu0 %638 }
 0x393   : > { %v636_v55 = vmul.f32 %v945_v52, %v635_v54 }
 0x395   : > { %v640_v57 = vadd.f32 %v639_v56, %v636_v55 }
 0x397   : > { %642 = vst.msk [vmem:[#allocation3] sm:$0xff] %vm641_vm7, %v640_v57 }
 0x399   : > { %v584_v58 = vpop.f32.mrf.mxu3 }
 0x39a   : > { %589 = vrot.lane.b32.xlu1 %v584_v58, %s973_s30 }
 0x39e   : > { %v684_v59 = vld [vmem:[#allocation3] sm:$0xff] }
 0x39f   : > { %946 = vrcp.f32 %v684_v59 }
 0x3a1   : > { %v586_v60 = vpop.f32.mrf.mxu3 }
 0x3a2   : > { %646 = vperm.xlu1 %923, %v945_v52  }
 0x3a3   : > { %v668_v61 = vpop.f32.mrf.mxu2 }
 0x3a4   : > { %673 = vrot.lane.b32.xlu2 %v668_v61, %s974_s5 }
 0x3a5   : > { %v947_v62 = vpop.eup %946  ;;  %v563_v6 = vpop.permute.xlu0 %562 }
 0x3a6   : > { %688 = vperm.xlu0 %924, %v947_v62  }
 0x3aa   : > { %925 = vset.pattern.permute.xlu1 %v978_v51 }
 0x3ab   : > { %v670_v63 = vpop.f32.mrf.mxu2  ;;  %698 = vperm.xlu1 %925, %v947_v62  }
 0x3ac   : > { %708 = vperm.xlu2 %926, %v947_v62  }
 0x3ae   : > { %928 = vset.pattern.permute.xlu0 %v980_v53 }
 0x3b3   : > { %927 = vset.pattern.permute.xlu1 %v980_v53 }
 0x3b4   : > { %718 = vperm.xlu1 %927, %v947_v62  }
 0x3cd   : > { %v506_v3 = vpop.permute.xlu2 %505 }
 0x3ce   : > { %v508_v4 = vadd.f32 %v506_v3, %v478_v2 }
 0x3d0   : > { %510 = vst.msk [vmem:[#allocation4] sm:$0xff] %vm509_vm8, %v508_v4 }
 0x3d7   : > { %v559_v5 = vld [vmem:[#allocation4] sm:$0xff] }
 0x3d8   : > { %v565_v7 = vmul.f32 %v563_v6, %v559_v5 }
 0x3fe   : > { %v674_v11 = vpop.permute.xlu2 %673 }
 0x406   : > { %v709_v20 = vpop.permute.xlu2 %708 }
 0x40c   : > { %v590_v51 = vpop.permute.xlu1 %589 }
 0x40d   : > { %v592_v8 = vadd.f32 %v590_v51, %v565_v7 }
 0x40f   : > { %594 = vst.msk [vmem:[#allocation4] sm:$0xff] %vm593_vm9, %v592_v8 }
 0x414   : > { %v647_v9 = vpop.permute.xlu1 %646 }
 0x416   : > { %v643_v10 = vld [vmem:[#allocation4] sm:$0xff] }
 0x417   : > { %v649_v53 = vmul.f32 %v647_v9, %v643_v10 }
 0x418   : > { %v689_v15 = vpop.permute.xlu0 %688 }
 0x419   : > { %v676_v12 = vadd.f32 %v674_v11, %v649_v53 }
 0x41b   : > { %678 = vst.msk [vmem:[#allocation4] sm:$0xff] %vm677_vm10, %v676_v12 }
 0x41d   : > { %v699_v17 = vpop.permute.xlu1 %698 }
 0x422   : > { %v683_v14 = vld [vmem:[#allocation4] sm:$0xff] }
 0x423   : > { %v691_v16 = vmul.f32 %v689_v15, %v683_v14 }
 0x425   : > { %692 = vst.msk [vmem:[#allocation4] sm:$0xff] %vm343_vm0, %v691_v16 }
 0x426   : > { %v719_v23 = vpop.permute.xlu1 %718 }
 0x42c   : > { %v693_v18 = vld [vmem:[#allocation4] sm:$0xff] }
 0x42d   : > { %v701_v19 = vmul.f32 %v699_v17, %v693_v18 }
 0x42f   : > { %702 = vst.msk [vmem:[#allocation4] sm:$0xff] %vm509_vm8, %v701_v19 }
 0x436   : > { %v703_v21 = vld [vmem:[#allocation4] sm:$0xff] }
 0x437   : > { %v711_v22 = vmul.f32 %v709_v20, %v703_v21 }
 0x439   : > { %712 = vst.msk [vmem:[#allocation4] sm:$0xff] %vm593_vm9, %v711_v22 }
 0x440   : > { %v713_v24 = vld [vmem:[#allocation4] sm:$0xff] }
 0x441   : > { %v721_v25 = vmul.f32 %v719_v23, %v713_v24 }
 0x443   : > { %722 = vst.msk [vmem:[#allocation4] sm:$0xff] %vm677_vm10, %v721_v25 }
 0x44a   : > { %v723_v26 = vld [vmem:[#allocation4] sm:$0xff] }
 0x44b   : > { %v724_v27 = vpack.c.bf16 %v723_v26, %v723_v26 }
 0x44d   : > { %725 = vst [vmem:[%s326_s12] sm:$0xf] %v724_v27 }
 0x44e PF: > { %s14_s17 = sadd.s32 1, %s970_s17   ;;  %s1192_s15 = smov %s966_s16 }
 0x44f   : > { %p11_p5 = scmp.ge.s32.totalorder %s14_s17, 4   ;;  %s1193_s16 = smov %s1195_s18 }
 0x451   :  { %13 = sbr.rel (!%p11_p5) target bundleno = 2 (0x2), region = 83 }

</bundles_post_ra>
